<compile_context>
chip_gen: v5e
topology: v5e:2x2
jax: 0.10.0
libtpu: 0.0.40
codegen_flags: <defaults>
</compile_context>

<pallas_src>
import functools

import jax
import jax.numpy as jnp
import numpy as np
from jax.experimental import pallas as pl
from jax.experimental.pallas import tpu as pltpu


def basic_conv2d_kernel(x_ref, w_ref, bias_ref, o_ref, xp_ref, patches_ref, dma_sem,
                        *, Cin, Cin_pad, H, W, Wout, KH, KW, stride, dilation,
                        padding, tile_h, dma_input):
    """One (batch image, output-row tile) per grid step.

    x_ref:       dma_input=True : (N, Cin, H, W) HBM ref (memory_space=pl.ANY)
                 dma_input=False: (1, Cin, H, W) VMEM block
    w_ref:       (Cout, KH*KW*Cin_pad)  BN-scale-folded weights, cols ordered (kh,kw,cin)
    bias_ref:    (Cout, 1)              folded BN bias (f32)
    o_ref:       (1, Cout, tile_h*Wout) lane-dense output tile
    xp_ref:      (Cin, Hp, Wp)          VMEM scratch: zero-padded image (persists over h)
    patches_ref: (Cin_pad*KH*KW, tile_h*Wout) VMEM scratch: im2col patch matrix
    dma_sem:     DMA semaphore for the HBM->VMEM image copy
    """
    n = pl.program_id(0)
    h = pl.program_id(1)
    Hp, Wp = H + 2 * padding, W + 2 * padding
    L = tile_h * Wout
    cdt = xp_ref.dtype

    # Per-image setup at h == 0 (self-contained per image -> batch axis stays
    # megacore-"parallel" safe).  Scratch persists over the h axis.
    @pl.when(h == 0)
    def _load_image():
        # Zero only the halo strips; the interior is fully overwritten below, so no
        # full padded-image zero pass is ever issued.
        if padding > 0:
            xp_ref[:, 0:padding, :] = jnp.zeros((Cin, padding, Wp), cdt)
            xp_ref[:, padding + H:Hp, :] = jnp.zeros((Cin, padding, Wp), cdt)
            xp_ref[:, :, 0:padding] = jnp.zeros((Cin, Hp, padding), cdt)
            xp_ref[:, :, padding + W:Wp] = jnp.zeros((Cin, Hp, padding), cdt)
        # Zero the K-padding rows of the patch matrix (their weight columns are zero,
        # but uninitialized VMEM must never reach the MXU).
        if Cin_pad > Cin:
            for t in range(KH * KW):
                patches_ref[t * Cin_pad + Cin:(t + 1) * Cin_pad, :] = jnp.zeros(
                    (Cin_pad - Cin, L), patches_ref.dtype)
        if dma_input:
            # Copy engine moves HBM x[n] straight into the padded-scratch interior.
            dst = (xp_ref.at[:, padding:padding + H, padding:padding + W]
                   if padding > 0 else xp_ref)
            cp = pltpu.make_async_copy(x_ref.at[n], dst, dma_sem)
            cp.start()
            cp.wait()
        else:
            # Fallback: input arrived as a VMEM block; vector-copy the interior.
            if padding > 0:
                xp_ref[:, padding:padding + H, padding:padding + W] = (
                    x_ref[0].astype(cdt))
            else:
                xp_ref[...] = x_ref[0].astype(cdt)

    # Padded-input row window covering this output-row tile (all taps).
    in_rows = (tile_h - 1) * stride + (KH - 1) * dilation + 1
    row_step = tile_h * stride
    row0 = h * row_step
    if row_step % 8 == 0:  # sublane-aligned dynamic slice when statically provable
        row0 = pl.multiple_of(row0, 8)
    xt = xp_ref[:, pl.ds(row0, in_rows), :]                    # (Cin, in_rows, Wp)

    # im2col: write each (kh,kw) tap into the persistent patches scratch so the conv
    # is ONE matmul with K = KH*KW*Cin_pad (no taps list, no concatenate copy).
    # TODO(synk): stride==1 roll-based lane shifts would cut relayouts KH*KW -> KH.
    for kh in range(KH):
        for kw in range(KW):
            t = kh * KW + kw
            p = jax.lax.slice(
                xt,
                (0, kh * dilation, kw * dilation),
                (Cin,
                 kh * dilation + (tile_h - 1) * stride + 1,
                 kw * dilation + (Wout - 1) * stride + 1),
                (1, stride, stride))                           # (Cin, tile_h, Wout)
            patches_ref[t * Cin_pad:t * Cin_pad + Cin, :] = p.reshape(Cin, L)

    # Lane-dense MXU matmul: (Cout, K) @ (K, tile_h*Wout) -> (Cout, tile_h*Wout).
    acc = jnp.dot(w_ref[...], patches_ref[...], preferred_element_type=jnp.float32)

    # BN scale already folded into the weights; epilogue is bias-add + ReLU.
    o_ref[0] = jnp.maximum(acc + bias_ref[...], 0.0).astype(o_ref.dtype)


def _vmem_capacity_bytes():
    try:
        info = pltpu.get_tpu_info()
        for name in ("vmem_capacity_bytes", "vmem_size_bytes", "vmem_bytes"):
            v = getattr(info, name, None)
            if v:
                return int(v)
    except Exception:
        pass
    return 64 * 1024 * 1024  # conservative: v7x per-TensorCore VMEM


def _pick_tile_h(Hout, Wout, per_row_bytes, target_lanes, max_tile_bytes):
    """Smallest legal output-row tile with >= target lane-dense elements that fits
    the per-tile VMEM budget; otherwise the largest fitting legal tile."""
    legal = [t for t in range(1, Hout + 1)
             if Hout % t == 0 and ((t * Wout) % 128 == 0 or t == Hout)]
    fitting = [t for t in legal if t * per_row_bytes <= max_tile_bytes] or [legal[0]]
    target = min(target_lanes, max(128, Hout * Wout))
    for t in fitting:
        if t * Wout >= target:
            return t
    return fitting[-1]


def basic_conv2d(x_nchw, weight_oihw, gamma, beta, running_mean, running_var,
                 *, stride=1, padding=0, dilation=1, eps=1e-5,
                 compute_dtype=jnp.bfloat16, out_dtype=None, target_lanes=2048):
    """Forward pass of BasicConv2d (Conv2d bias=False -> eval-mode BN -> ReLU)."""
    N, Cin, H, W = map(int, x_nchw.shape)
    Cout, Cin_w, KH, KW = map(int, weight_oihw.shape)
    assert Cin == Cin_w
    compute_dtype = jnp.dtype(compute_dtype)
    out_dtype = jnp.dtype(out_dtype if out_dtype is not None else x_nchw.dtype)

    Hout = (H + 2 * padding - dilation * (KH - 1) - 1) // stride + 1
    Wout = (W + 2 * padding - dilation * (KW - 1) - 1) // stride + 1
    Hp, Wp = H + 2 * padding, W + 2 * padding

    dsize = compute_dtype.itemsize
    osize = out_dtype.itemsize
    pack = max(8, 32 // dsize)                       # sublane packing: 8 f32, 16 bf16
    Cin_pad = ((Cin + pack - 1) // pack) * pack
    Kpad = KH * KW * Cin_pad

    # --- generation-aware VMEM budget and tile size --------------------------------
    usable = int(_vmem_capacity_bytes() * 0.75)
    xp_bytes = Cin * Hp * Wp * dsize
    w_bytes = Cout * Kpad * dsize
    fixed_bytes = (xp_bytes + 2 * w_bytes + 2 * Cout * 128 * 4
                   + 2 * Cin * H * W * dsize        # fallback input block, 2x buffered
                   + (1 << 20))
    per_row_bytes = Wout * (Kpad * dsize + 2 * Cout * osize)   # patches + 2x out tile
    tile_budget = max(per_row_bytes, usable - fixed_bytes)
    tile_h = _pick_tile_h(Hout, Wout, per_row_bytes, target_lanes, tile_budget)
    nH = Hout // tile_h
    L = tile_h * Wout
    vmem_limit = int(min(usable,
                         max(fixed_bytes + tile_h * per_row_bytes + (8 << 20),
                             32 << 20)))

    # --- operands (all host-side prep is tiny except the x cast) -------------------
    x_c = x_nchw.astype(compute_dtype)   # wrapper-side cast: halves the HBM read for bf16
    w_pad = weight_oihw.astype(jnp.float32)
    if Cin_pad != Cin:
        w_pad = jnp.pad(w_pad, ((0, 0), (0, Cin_pad - Cin), (0, 0), (0, 0)))
    scale_v = gamma.astype(jnp.float32) / jnp.sqrt(running_var.astype(jnp.float32) + eps)
    # Fold BN scale into the weights (exact; done in f32 before the compute cast).
    w2 = (jnp.transpose(w_pad, (0, 2, 3, 1)).reshape(Cout, Kpad)
          * scale_v[:, None]).astype(compute_dtype)
    bias = (beta.astype(jnp.float32)
            - running_mean.astype(jnp.float32) * scale_v).reshape(Cout, 1)

    out_struct = jax.ShapeDtypeStruct((N, Cout, Hout * Wout), out_dtype)
    scratch = [pltpu.VMEM((Cin, Hp, Wp), compute_dtype),
               pltpu.VMEM((Kpad, L), compute_dtype),
               pltpu.SemaphoreType.DMA(())]
    cparams = pltpu.CompilerParams(
        dimension_semantics=("parallel", "arbitrary"),
        vmem_limit_bytes=vmem_limit)

    def run(dma_input, single_buffer_consts):
        kernel = functools.partial(
            basic_conv2d_kernel, Cin=Cin, Cin_pad=Cin_pad, H=H, W=W, Wout=Wout,
            KH=KH, KW=KW, stride=stride, dilation=dilation, padding=padding,
            tile_h=tile_h, dma_input=dma_input)
        const_kw = dict(pipeline_mode=pl.Buffered(1)) if single_buffer_consts else {}
        if dma_input:
            x_spec = pl.BlockSpec(memory_space=pl.ANY)          # raw HBM ref, manual DMA
        else:
            x_spec = pl.BlockSpec((1, Cin, H, W), lambda n, h: (n, 0, 0, 0))
        in_specs = [
            x_spec,
            pl.BlockSpec((Cout, Kpad), lambda n, h: (0, 0), **const_kw),
            pl.BlockSpec((Cout, 1), lambda n, h: (0, 0), **const_kw),
        ]
        out = pl.pallas_call(
            kernel,
            out_shape=out_struct,
            grid=(N, nH),
            in_specs=in_specs,
            out_specs=pl.BlockSpec((1, Cout, L), lambda n, h: (n, 0, h)),
            scratch_shapes=scratch,
            compiler_params=cparams,
        )(x_c, w2, bias)
        return jax.block_until_ready(out)

    # Prefer the DMA-into-scratch + single-buffered-constants configuration; degrade
    # gracefully (without changing semantics) if a feature does not lower here.
    last_err, out_flat = None, None
    for cfg in ((True, True), (True, False), (False, True), (False, False)):
        try:
            out_flat = run(*cfg)
            break
        except Exception as e:  # noqa: BLE001 - fall back to a known-good config
            last_err = e
    if out_flat is None:
        raise last_err

    # Free reshape: (N, Cout, Hout*Wout) and (N, Cout, Hout, Wout) share the same
    # row-major layout, so no transpose/copy pass is emitted.
    return out_flat.reshape(N, Cout, Hout, Wout)


def _reference(x_nchw, weight_oihw, gamma, beta, running_mean, running_var,
               *, stride, padding, dilation, eps=1e-5):
    y = jax.lax.conv_general_dilated(
        x_nchw.astype(jnp.float32), weight_oihw.astype(jnp.float32),
        window_strides=(stride, stride),
        padding=[(padding, padding), (padding, padding)],
        rhs_dilation=(dilation, dilation),
        dimension_numbers=("NCHW", "OIHW", "NCHW"),
    )
    scale = gamma / jnp.sqrt(running_var + eps)
    bias = beta - running_mean * scale
    y = y * scale[None, :, None, None] + bias[None, :, None, None]
    return jnp.maximum(y, 0.0)


if __name__ == "__main__":
    # BasicConv2d(in_planes=4, out_planes=8, kernel_size=3, stride=1, padding=1)
    N, Cin, H, W = 2, 4, 16, 16
    Cout, K = 8, 3
    stride, padding, dilation = 1, 1, 1

    key = jax.random.PRNGKey(0)
    kx, kw, kg, kb, km, kv = jax.random.split(key, 6)

    x = jax.random.normal(kx, (N, Cin, H, W), jnp.float32)
    weight = jax.random.normal(kw, (Cout, Cin, K, K), jnp.float32) * 0.1
    gamma = jax.random.normal(kg, (Cout,), jnp.float32) * 0.1 + 1.0
    beta = jax.random.normal(kb, (Cout,), jnp.float32) * 0.1
    running_mean = jax.random.normal(km, (Cout,), jnp.float32) * 0.1
    running_var = jnp.abs(jax.random.normal(kv, (Cout,), jnp.float32)) * 0.1 + 1.0

    ref = _reference(x, weight, gamma, beta, running_mean, running_var,
                     stride=stride, padding=padding, dilation=dilation)
    ref = jax.block_until_ready(ref)

    # f32 compute path: tight tolerance.
    out_f32 = basic_conv2d(x, weight, gamma, beta, running_mean, running_var,
                           stride=stride, padding=padding, dilation=dilation,
                           compute_dtype=jnp.float32, out_dtype=jnp.float32)
    out_f32 = jax.block_until_ready(out_f32)
    np.testing.assert_allclose(np.asarray(out_f32), np.asarray(ref),
                               rtol=1e-4, atol=1e-4)

    # bf16 production path (wrapper-side cast, f32 accumulation): loose tolerance.
    out_bf16 = basic_conv2d(x, weight, gamma, beta, running_mean, running_var,
                            stride=stride, padding=padding, dilation=dilation,
                            compute_dtype=jnp.bfloat16, out_dtype=jnp.float32)
    out_bf16 = jax.block_until_ready(out_bf16)
    np.testing.assert_allclose(np.asarray(out_bf16), np.asarray(ref),
                               rtol=0.1, atol=0.1)

    print("KERNEL_OK")
</pallas_src>

<mosaic_0001>
module attributes {stable_mosaic.version = 11 : i64} {
  func.func @basic_conv2d_kernel(%arg0: i32, %arg1: i32, %arg2: memref<2x4x16x16xf32, #tpu.memory_space<any>>, %arg3: memref<8x72xf32, #tpu.memory_space<vmem>>, %arg4: memref<8x1xf32, #tpu.memory_space<vmem>>, %arg5: memref<1x8x256xf32, #tpu.memory_space<vmem>>, %arg6: memref<4x18x18xf32, #tpu.memory_space<vmem>>, %arg7: memref<72x256xf32, #tpu.memory_space<vmem>>, %arg8: memref<!tpu.dma_semaphore, #tpu.memory_space<semaphore_mem>>) attributes {dimension_semantics = [#tpu.dimension_semantics<parallel>, #tpu.dimension_semantics<arbitrary>], iteration_bounds = array<i64: 2, 1>, scalar_prefetch = 0 : i64, scratch_operands = 3 : i64, tpu.core_type = #tpu.core_type<tc>, window_params = [{}, {pipeline_mode = #tpu.pipeline_mode<synchronous>, transform_indices = @transform_1, window_bounds = array<i64: 8, 72>}, {pipeline_mode = #tpu.pipeline_mode<synchronous>, transform_indices = @transform_2, window_bounds = array<i64: 8, 1>}, {transform_indices = @transform_3, window_bounds = array<i64: 1, 8, 256>}]} {
    %c0_i32 = arith.constant 0 : i32
    %0 = arith.cmpi eq, %arg1, %c0_i32 : i32
    %1 = arith.extui %0 : i1 to i32
    %c0_i32_0 = arith.constant 0 : i32
    %2 = arith.cmpi ne, %1, %c0_i32_0 : i32
    scf.if %2 {
      %cst_22 = arith.constant 0.000000e+00 : f32
      %45 = vector.broadcast %cst_22 : f32 to vector<4x1x18xf32>
      %c0_23 = arith.constant 0 : index
      %c0_24 = arith.constant 0 : index
      %c0_25 = arith.constant 0 : index
      %46 = vector.load %arg6[%c0_23, %c0_24, %c0_25] : memref<4x18x18xf32, #tpu.memory_space<vmem>>, vector<4x1x18xf32>
      tpu.vector_store %arg6[%c0_23, %c0_24, %c0_25], %45 {strides = array<i32>} : memref<4x18x18xf32, #tpu.memory_space<vmem>>, vector<4x1x18xf32>,
      %cst_26 = arith.constant 0.000000e+00 : f32
      %47 = vector.broadcast %cst_26 : f32 to vector<4x1x18xf32>
      %c0_27 = arith.constant 0 : index
      %c17 = arith.constant 17 : index
      %c0_28 = arith.constant 0 : index
      %48 = vector.load %arg6[%c0_27, %c17, %c0_28] : memref<4x18x18xf32, #tpu.memory_space<vmem>>, vector<4x1x18xf32>
      tpu.vector_store %arg6[%c0_27, %c17, %c0_28], %47 {strides = array<i32>} : memref<4x18x18xf32, #tpu.memory_space<vmem>>, vector<4x1x18xf32>,
      %cst_29 = arith.constant 0.000000e+00 : f32
      %49 = vector.broadcast %cst_29 : f32 to vector<4x18x1xf32>
      %c0_30 = arith.constant 0 : index
      %c0_31 = arith.constant 0 : index
      %c0_32 = arith.constant 0 : index
      %50 = vector.load %arg6[%c0_30, %c0_31, %c0_32] : memref<4x18x18xf32, #tpu.memory_space<vmem>>, vector<4x18x1xf32>
      tpu.vector_store %arg6[%c0_30, %c0_31, %c0_32], %49 {strides = array<i32>} : memref<4x18x18xf32, #tpu.memory_space<vmem>>, vector<4x18x1xf32>,
      %cst_33 = arith.constant 0.000000e+00 : f32
      %51 = vector.broadcast %cst_33 : f32 to vector<4x18x1xf32>
      %c0_34 = arith.constant 0 : index
      %c0_35 = arith.constant 0 : index
      %c17_36 = arith.constant 17 : index
      %52 = vector.load %arg6[%c0_34, %c0_35, %c17_36] : memref<4x18x18xf32, #tpu.memory_space<vmem>>, vector<4x18x1xf32>
      tpu.vector_store %arg6[%c0_34, %c0_35, %c17_36], %51 {strides = array<i32>} : memref<4x18x18xf32, #tpu.memory_space<vmem>>, vector<4x18x1xf32>,
      %cst_37 = arith.constant 0.000000e+00 : f32
      %53 = vector.broadcast %cst_37 : f32 to vector<4x256xf32>
      %c4 = arith.constant 4 : index
      %c0_38 = arith.constant 0 : index
      %54 = vector.load %arg7[%c4, %c0_38] : memref<72x256xf32, #tpu.memory_space<vmem>>, vector<4x256xf32>
      tpu.vector_store %arg7[%c4, %c0_38], %53 {strides = array<i32>} : memref<72x256xf32, #tpu.memory_space<vmem>>, vector<4x256xf32>,
      %cst_39 = arith.constant 0.000000e+00 : f32
      %55 = vector.broadcast %cst_39 : f32 to vector<4x256xf32>
      %c12 = arith.constant 12 : index
      %c0_40 = arith.constant 0 : index
      %56 = vector.load %arg7[%c12, %c0_40] : memref<72x256xf32, #tpu.memory_space<vmem>>, vector<4x256xf32>
      tpu.vector_store %arg7[%c12, %c0_40], %55 {strides = array<i32>} : memref<72x256xf32, #tpu.memory_space<vmem>>, vector<4x256xf32>,
      %cst_41 = arith.constant 0.000000e+00 : f32
      %57 = vector.broadcast %cst_41 : f32 to vector<4x256xf32>
      %c20 = arith.constant 20 : index
      %c0_42 = arith.constant 0 : index
      %58 = vector.load %arg7[%c20, %c0_42] : memref<72x256xf32, #tpu.memory_space<vmem>>, vector<4x256xf32>
      tpu.vector_store %arg7[%c20, %c0_42], %57 {strides = array<i32>} : memref<72x256xf32, #tpu.memory_space<vmem>>, vector<4x256xf32>,
      %cst_43 = arith.constant 0.000000e+00 : f32
      %59 = vector.broadcast %cst_43 : f32 to vector<4x256xf32>
      %c28 = arith.constant 28 : index
      %c0_44 = arith.constant 0 : index
      %60 = vector.load %arg7[%c28, %c0_44] : memref<72x256xf32, #tpu.memory_space<vmem>>, vector<4x256xf32>
      tpu.vector_store %arg7[%c28, %c0_44], %59 {strides = array<i32>} : memref<72x256xf32, #tpu.memory_space<vmem>>, vector<4x256xf32>,
      %cst_45 = arith.constant 0.000000e+00 : f32
      %61 = vector.broadcast %cst_45 : f32 to vector<4x256xf32>
      %c36 = arith.constant 36 : index
      %c0_46 = arith.constant 0 : index
      %62 = vector.load %arg7[%c36, %c0_46] : memref<72x256xf32, #tpu.memory_space<vmem>>, vector<4x256xf32>
      tpu.vector_store %arg7[%c36, %c0_46], %61 {strides = array<i32>} : memref<72x256xf32, #tpu.memory_space<vmem>>, vector<4x256xf32>,
      %cst_47 = arith.constant 0.000000e+00 : f32
      %63 = vector.broadcast %cst_47 : f32 to vector<4x256xf32>
      %c44 = arith.constant 44 : index
      %c0_48 = arith.constant 0 : index
      %64 = vector.load %arg7[%c44, %c0_48] : memref<72x256xf32, #tpu.memory_space<vmem>>, vector<4x256xf32>
      tpu.vector_store %arg7[%c44, %c0_48], %63 {strides = array<i32>} : memref<72x256xf32, #tpu.memory_space<vmem>>, vector<4x256xf32>,
      %cst_49 = arith.constant 0.000000e+00 : f32
      %65 = vector.broadcast %cst_49 : f32 to vector<4x256xf32>
      %c52 = arith.constant 52 : index
      %c0_50 = arith.constant 0 : index
      %66 = vector.load %arg7[%c52, %c0_50] : memref<72x256xf32, #tpu.memory_space<vmem>>, vector<4x256xf32>
      tpu.vector_store %arg7[%c52, %c0_50], %65 {strides = array<i32>} : memref<72x256xf32, #tpu.memory_space<vmem>>, vector<4x256xf32>,
      %cst_51 = arith.constant 0.000000e+00 : f32
      %67 = vector.broadcast %cst_51 : f32 to vector<4x256xf32>
      %c60 = arith.constant 60 : index
      %c0_52 = arith.constant 0 : index
      %68 = vector.load %arg7[%c60, %c0_52] : memref<72x256xf32, #tpu.memory_space<vmem>>, vector<4x256xf32>
      tpu.vector_store %arg7[%c60, %c0_52], %67 {strides = array<i32>} : memref<72x256xf32, #tpu.memory_space<vmem>>, vector<4x256xf32>,
      %cst_53 = arith.constant 0.000000e+00 : f32
      %69 = vector.broadcast %cst_53 : f32 to vector<4x256xf32>
      %c68 = arith.constant 68 : index
      %c0_54 = arith.constant 0 : index
      %70 = vector.load %arg7[%c68, %c0_54] : memref<72x256xf32, #tpu.memory_space<vmem>>, vector<4x256xf32>
      tpu.vector_store %arg7[%c68, %c0_54], %69 {strides = array<i32>} : memref<72x256xf32, #tpu.memory_space<vmem>>, vector<4x256xf32>,
      %c0_i32_55 = arith.constant 0 : i32
      %c0_i32_56 = arith.constant 0 : i32
      %c0_i32_57 = arith.constant 0 : i32
      %71 = tpu.memref_slice %arg2[%arg0, %c0_i32_55, %c0_i32_56, %c0_i32_57] : memref<2x4x16x16xf32, #tpu.memory_space<any>> -> memref<1x4x16x16xf32, #tpu.memory_space<any>>
      %72 = tpu.memref_squeeze %71 : memref<1x4x16x16xf32, #tpu.memory_space<any>> -> memref<4x16x16xf32, #tpu.memory_space<any>>
      %c0_i32_58 = arith.constant 0 : i32
      %c1_i32 = arith.constant 1 : i32
      %c1_i32_59 = arith.constant 1 : i32
      %73 = tpu.memref_slice %arg6[%c0_i32_58, %c1_i32, %c1_i32_59] : memref<4x18x18xf32, #tpu.memory_space<vmem>> -> memref<4x16x16xf32, #tpu.memory_space<vmem>>
      tpu.enqueue_dma source(%72 : memref<4x16x16xf32, #tpu.memory_space<any>>) target(%73 : memref<4x16x16xf32, #tpu.memory_space<vmem>>) target_semaphore(%arg8 : memref<!tpu.dma_semaphore, #tpu.memory_space<semaphore_mem>>)
      %c0_i32_60 = arith.constant 0 : i32
      %c0_i32_61 = arith.constant 0 : i32
      %c0_i32_62 = arith.constant 0 : i32
      %74 = tpu.memref_slice %arg2[%arg0, %c0_i32_60, %c0_i32_61, %c0_i32_62] : memref<2x4x16x16xf32, #tpu.memory_space<any>> -> memref<1x4x16x16xf32, #tpu.memory_space<any>>
      %75 = tpu.memref_squeeze %74 : memref<1x4x16x16xf32, #tpu.memory_space<any>> -> memref<4x16x16xf32, #tpu.memory_space<any>>
      %c0_i32_63 = arith.constant 0 : i32
      %c1_i32_64 = arith.constant 1 : i32
      %c1_i32_65 = arith.constant 1 : i32
      %76 = tpu.memref_slice %arg6[%c0_i32_63, %c1_i32_64, %c1_i32_65] : memref<4x18x18xf32, #tpu.memory_space<vmem>> -> memref<4x16x16xf32, #tpu.memory_space<vmem>>
      tpu.wait_dma2 semaphore(%arg8 : memref<!tpu.dma_semaphore, #tpu.memory_space<semaphore_mem>>) src(%75 : memref<4x16x16xf32, #tpu.memory_space<any>>) dst(%76 : memref<4x16x16xf32, #tpu.memory_space<vmem>>)
    } else {
    }
    %c16_i32 = arith.constant 16 : i32
    %3 = arith.muli %arg1, %c16_i32 : i32
    %4 = tpu.assume_multiple %3, 8 : i32
    %c0 = arith.constant 0 : index
    %5 = arith.index_cast %4 : i32 to index
    %c0_1 = arith.constant 0 : index
    %6 = vector.load %arg6[%c0, %5, %c0_1] : memref<4x18x18xf32, #tpu.memory_space<vmem>>, vector<4x18x18xf32>
    %7 = vector.extract_strided_slice %6 {offsets = [0, 0, 0], sizes = [4, 16, 16], strides = [1, 1, 1]} : vector<4x18x18xf32> to vector<4x16x16xf32>
    %8 = vector.shape_cast %7 : vector<4x16x16xf32> to vector<4x256xf32>
    %c0_2 = arith.constant 0 : index
    %c0_3 = arith.constant 0 : index
    %9 = vector.load %arg7[%c0_2, %c0_3] : memref<72x256xf32, #tpu.memory_space<vmem>>, vector<4x256xf32>
    tpu.vector_store %arg7[%c0_2, %c0_3], %8 {strides = array<i32>} : memref<72x256xf32, #tpu.memory_space<vmem>>, vector<4x256xf32>,
    %10 = vector.extract_strided_slice %6 {offsets = [0, 0, 1], sizes = [4, 16, 16], strides = [1, 1, 1]} : vector<4x18x18xf32> to vector<4x16x16xf32>
    %11 = vector.shape_cast %10 : vector<4x16x16xf32> to vector<4x256xf32>
    %c8 = arith.constant 8 : index
    %c0_4 = arith.constant 0 : index
    %12 = vector.load %arg7[%c8, %c0_4] : memref<72x256xf32, #tpu.memory_space<vmem>>, vector<4x256xf32>
    tpu.vector_store %arg7[%c8, %c0_4], %11 {strides = array<i32>} : memref<72x256xf32, #tpu.memory_space<vmem>>, vector<4x256xf32>,
    %13 = vector.extract_strided_slice %6 {offsets = [0, 0, 2], sizes = [4, 16, 16], strides = [1, 1, 1]} : vector<4x18x18xf32> to vector<4x16x16xf32>
    %14 = vector.shape_cast %13 : vector<4x16x16xf32> to vector<4x256xf32>
    %c16 = arith.constant 16 : index
    %c0_5 = arith.constant 0 : index
    %15 = vector.load %arg7[%c16, %c0_5] : memref<72x256xf32, #tpu.memory_space<vmem>>, vector<4x256xf32>
    tpu.vector_store %arg7[%c16, %c0_5], %14 {strides = array<i32>} : memref<72x256xf32, #tpu.memory_space<vmem>>, vector<4x256xf32>,
    %16 = vector.extract_strided_slice %6 {offsets = [0, 1, 0], sizes = [4, 16, 16], strides = [1, 1, 1]} : vector<4x18x18xf32> to vector<4x16x16xf32>
    %17 = vector.shape_cast %16 : vector<4x16x16xf32> to vector<4x256xf32>
    %c24 = arith.constant 24 : index
    %c0_6 = arith.constant 0 : index
    %18 = vector.load %arg7[%c24, %c0_6] : memref<72x256xf32, #tpu.memory_space<vmem>>, vector<4x256xf32>
    tpu.vector_store %arg7[%c24, %c0_6], %17 {strides = array<i32>} : memref<72x256xf32, #tpu.memory_space<vmem>>, vector<4x256xf32>,
    %19 = vector.extract_strided_slice %6 {offsets = [0, 1, 1], sizes = [4, 16, 16], strides = [1, 1, 1]} : vector<4x18x18xf32> to vector<4x16x16xf32>
    %20 = vector.shape_cast %19 : vector<4x16x16xf32> to vector<4x256xf32>
    %c32 = arith.constant 32 : index
    %c0_7 = arith.constant 0 : index
    %21 = vector.load %arg7[%c32, %c0_7] : memref<72x256xf32, #tpu.memory_space<vmem>>, vector<4x256xf32>
    tpu.vector_store %arg7[%c32, %c0_7], %20 {strides = array<i32>} : memref<72x256xf32, #tpu.memory_space<vmem>>, vector<4x256xf32>,
    %22 = vector.extract_strided_slice %6 {offsets = [0, 1, 2], sizes = [4, 16, 16], strides = [1, 1, 1]} : vector<4x18x18xf32> to vector<4x16x16xf32>
    %23 = vector.shape_cast %22 : vector<4x16x16xf32> to vector<4x256xf32>
    %c40 = arith.constant 40 : index
    %c0_8 = arith.constant 0 : index
    %24 = vector.load %arg7[%c40, %c0_8] : memref<72x256xf32, #tpu.memory_space<vmem>>, vector<4x256xf32>
    tpu.vector_store %arg7[%c40, %c0_8], %23 {strides = array<i32>} : memref<72x256xf32, #tpu.memory_space<vmem>>, vector<4x256xf32>,
    %25 = vector.extract_strided_slice %6 {offsets = [0, 2, 0], sizes = [4, 16, 16], strides = [1, 1, 1]} : vector<4x18x18xf32> to vector<4x16x16xf32>
    %26 = vector.shape_cast %25 : vector<4x16x16xf32> to vector<4x256xf32>
    %c48 = arith.constant 48 : index
    %c0_9 = arith.constant 0 : index
    %27 = vector.load %arg7[%c48, %c0_9] : memref<72x256xf32, #tpu.memory_space<vmem>>, vector<4x256xf32>
    tpu.vector_store %arg7[%c48, %c0_9], %26 {strides = array<i32>} : memref<72x256xf32, #tpu.memory_space<vmem>>, vector<4x256xf32>,
    %28 = vector.extract_strided_slice %6 {offsets = [0, 2, 1], sizes = [4, 16, 16], strides = [1, 1, 1]} : vector<4x18x18xf32> to vector<4x16x16xf32>
    %29 = vector.shape_cast %28 : vector<4x16x16xf32> to vector<4x256xf32>
    %c56 = arith.constant 56 : index
    %c0_10 = arith.constant 0 : index
    %30 = vector.load %arg7[%c56, %c0_10] : memref<72x256xf32, #tpu.memory_space<vmem>>, vector<4x256xf32>
    tpu.vector_store %arg7[%c56, %c0_10], %29 {strides = array<i32>} : memref<72x256xf32, #tpu.memory_space<vmem>>, vector<4x256xf32>,
    %31 = vector.extract_strided_slice %6 {offsets = [0, 2, 2], sizes = [4, 16, 16], strides = [1, 1, 1]} : vector<4x18x18xf32> to vector<4x16x16xf32>
    %32 = vector.shape_cast %31 : vector<4x16x16xf32> to vector<4x256xf32>
    %c64 = arith.constant 64 : index
    %c0_11 = arith.constant 0 : index
    %33 = vector.load %arg7[%c64, %c0_11] : memref<72x256xf32, #tpu.memory_space<vmem>>, vector<4x256xf32>
    tpu.vector_store %arg7[%c64, %c0_11], %32 {strides = array<i32>} : memref<72x256xf32, #tpu.memory_space<vmem>>, vector<4x256xf32>,
    %c0_12 = arith.constant 0 : index
    %c0_13 = arith.constant 0 : index
    %34 = vector.load %arg3[%c0_12, %c0_13] : memref<8x72xf32, #tpu.memory_space<vmem>>, vector<8x72xf32>
    %c0_14 = arith.constant 0 : index
    %c0_15 = arith.constant 0 : index
    %35 = vector.load %arg7[%c0_14, %c0_15] : memref<72x256xf32, #tpu.memory_space<vmem>>, vector<72x256xf32>
    %cst = arith.constant dense<0.000000e+00> : vector<8x256xf32>
    %36 = tpu.matmul %34, %35, %cst {dimension_numbers = #tpu.dot_dimension_numbers<[1], [0], [0], [1], [0, 0, 1, 1], [], []>} : vector<8x72xf32>, vector<72x256xf32>, vector<8x256xf32> -> vector<8x256xf32>
    %c0_16 = arith.constant 0 : index
    %c0_17 = arith.constant 0 : index
    %37 = vector.load %arg4[%c0_16, %c0_17] : memref<8x1xf32, #tpu.memory_space<vmem>>, vector<8x1xf32>
    %38 = vector.broadcast %37 : vector<8x1xf32> to vector<8x256xf32>
    %39 = arith.addf %36, %38 : vector<8x256xf32>
    %cst_18 = arith.constant 0.000000e+00 : f32
    %40 = vector.broadcast %cst_18 : f32 to vector<8x256xf32>
    %41 = arith.maximumf %39, %40 : vector<8x256xf32>
    %c0_19 = arith.constant 0 : index
    %c0_20 = arith.constant 0 : index
    %c0_21 = arith.constant 0 : index
    %42 = vector.load %arg5[%c0_19, %c0_20, %c0_21] : memref<1x8x256xf32, #tpu.memory_space<vmem>>, vector<1x8x256xf32>
    %43 = vector.shape_cast %42 : vector<1x8x256xf32> to vector<8x256xf32>
    %44 = vector.shape_cast %41 : vector<8x256xf32> to vector<1x8x256xf32>
    tpu.vector_store %arg5[%c0_19, %c0_20, %c0_21], %44 {strides = array<i32>} : memref<1x8x256xf32, #tpu.memory_space<vmem>>, vector<1x8x256xf32>,
    return
  }
  func.func @transform_1(%arg0: i32, %arg1: i32) -> (i32, i32) {
    %c0_i32 = arith.constant 0 : i32
    %c0_i32_0 = arith.constant 0 : i32
    %c0_i32_1 = arith.constant 0 : i32
    return %c0_i32, %c0_i32_0 : i32, i32
  }
  func.func @transform_2(%arg0: i32, %arg1: i32) -> (i32, i32) {
    %c0_i32 = arith.constant 0 : i32
    %c0_i32_0 = arith.constant 0 : i32
    %c0_i32_1 = arith.constant 0 : i32
    return %c0_i32, %c0_i32_0 : i32, i32
  }
  func.func @transform_3(%arg0: i32, %arg1: i32) -> (i32, i32, i32) {
    %c0_i32 = arith.constant 0 : i32
    %c0_i32_0 = arith.constant 0 : i32
    return %arg0, %c0_i32, %arg1 : i32, i32, i32
  }
}

module attributes {stable_mosaic.version = 11 : i64} {
  func.func @basic_conv2d_kernel(%arg0: i32, %arg1: i32, %arg2: memref<2x4x16x16xf32, #tpu.memory_space<any>>, %arg3: memref<8x72xf32, #tpu.memory_space<vmem>>, %arg4: memref<8x1xf32, #tpu.memory_space<vmem>>, %arg5: memref<1x8x256xf32, #tpu.memory_space<vmem>>, %arg6: memref<4x18x18xf32, #tpu.memory_space<vmem>>, %arg7: memref<72x256xf32, #tpu.memory_space<vmem>>, %arg8: memref<!tpu.dma_semaphore, #tpu.memory_space<semaphore_mem>>) attributes {dimension_semantics = [#tpu.dimension_semantics<parallel>, #tpu.dimension_semantics<arbitrary>], iteration_bounds = array<i64: 2, 1>, scalar_prefetch = 0 : i64, scratch_operands = 3 : i64, tpu.core_type = #tpu.core_type<tc>, window_params = [{}, {pipeline_mode = #tpu.pipeline_mode<synchronous>, transform_indices = @transform_1, window_bounds = array<i64: 8, 72>}, {pipeline_mode = #tpu.pipeline_mode<synchronous>, transform_indices = @transform_2, window_bounds = array<i64: 8, 1>}, {transform_indices = @transform_3, window_bounds = array<i64: 1, 8, 256>}]} {
    %c0_i32 = arith.constant 0 : i32
    %0 = arith.cmpi eq, %arg1, %c0_i32 : i32
    %1 = arith.extui %0 : i1 to i32
    %c0_i32_0 = arith.constant 0 : i32
    %2 = arith.cmpi ne, %1, %c0_i32_0 : i32
    scf.if %2 {
      %cst_22 = arith.constant 0.000000e+00 : f32
      %45 = vector.broadcast %cst_22 : f32 to vector<4x1x18xf32>
      %c0_23 = arith.constant 0 : index
      %c0_24 = arith.constant 0 : index
      %c0_25 = arith.constant 0 : index
      %46 = vector.load %arg6[%c0_23, %c0_24, %c0_25] : memref<4x18x18xf32, #tpu.memory_space<vmem>>, vector<4x1x18xf32>
      tpu.vector_store %arg6[%c0_23, %c0_24, %c0_25], %45 {strides = array<i32>} : memref<4x18x18xf32, #tpu.memory_space<vmem>>, vector<4x1x18xf32>,
      %cst_26 = arith.constant 0.000000e+00 : f32
      %47 = vector.broadcast %cst_26 : f32 to vector<4x1x18xf32>
      %c0_27 = arith.constant 0 : index
      %c17 = arith.constant 17 : index
      %c0_28 = arith.constant 0 : index
      %48 = vector.load %arg6[%c0_27, %c17, %c0_28] : memref<4x18x18xf32, #tpu.memory_space<vmem>>, vector<4x1x18xf32>
      tpu.vector_store %arg6[%c0_27, %c17, %c0_28], %47 {strides = array<i32>} : memref<4x18x18xf32, #tpu.memory_space<vmem>>, vector<4x1x18xf32>,
      %cst_29 = arith.constant 0.000000e+00 : f32
      %49 = vector.broadcast %cst_29 : f32 to vector<4x18x1xf32>
      %c0_30 = arith.constant 0 : index
      %c0_31 = arith.constant 0 : index
      %c0_32 = arith.constant 0 : index
      %50 = vector.load %arg6[%c0_30, %c0_31, %c0_32] : memref<4x18x18xf32, #tpu.memory_space<vmem>>, vector<4x18x1xf32>
      tpu.vector_store %arg6[%c0_30, %c0_31, %c0_32], %49 {strides = array<i32>} : memref<4x18x18xf32, #tpu.memory_space<vmem>>, vector<4x18x1xf32>,
      %cst_33 = arith.constant 0.000000e+00 : f32
      %51 = vector.broadcast %cst_33 : f32 to vector<4x18x1xf32>
      %c0_34 = arith.constant 0 : index
      %c0_35 = arith.constant 0 : index
      %c17_36 = arith.constant 17 : index
      %52 = vector.load %arg6[%c0_34, %c0_35, %c17_36] : memref<4x18x18xf32, #tpu.memory_space<vmem>>, vector<4x18x1xf32>
      tpu.vector_store %arg6[%c0_34, %c0_35, %c17_36], %51 {strides = array<i32>} : memref<4x18x18xf32, #tpu.memory_space<vmem>>, vector<4x18x1xf32>,
      %cst_37 = arith.constant 0.000000e+00 : f32
      %53 = vector.broadcast %cst_37 : f32 to vector<4x256xf32>
      %c4 = arith.constant 4 : index
      %c0_38 = arith.constant 0 : index
      %54 = vector.load %arg7[%c4, %c0_38] : memref<72x256xf32, #tpu.memory_space<vmem>>, vector<4x256xf32>
      tpu.vector_store %arg7[%c4, %c0_38], %53 {strides = array<i32>} : memref<72x256xf32, #tpu.memory_space<vmem>>, vector<4x256xf32>,
      %cst_39 = arith.constant 0.000000e+00 : f32
      %55 = vector.broadcast %cst_39 : f32 to vector<4x256xf32>
      %c12 = arith.constant 12 : index
      %c0_40 = arith.constant 0 : index
      %56 = vector.load %arg7[%c12, %c0_40] : memref<72x256xf32, #tpu.memory_space<vmem>>, vector<4x256xf32>
      tpu.vector_store %arg7[%c12, %c0_40], %55 {strides = array<i32>} : memref<72x256xf32, #tpu.memory_space<vmem>>, vector<4x256xf32>,
      %cst_41 = arith.constant 0.000000e+00 : f32
      %57 = vector.broadcast %cst_41 : f32 to vector<4x256xf32>
      %c20 = arith.constant 20 : index
      %c0_42 = arith.constant 0 : index
      %58 = vector.load %arg7[%c20, %c0_42] : memref<72x256xf32, #tpu.memory_space<vmem>>, vector<4x256xf32>
      tpu.vector_store %arg7[%c20, %c0_42], %57 {strides = array<i32>} : memref<72x256xf32, #tpu.memory_space<vmem>>, vector<4x256xf32>,
      %cst_43 = arith.constant 0.000000e+00 : f32
      %59 = vector.broadcast %cst_43 : f32 to vector<4x256xf32>
      %c28 = arith.constant 28 : index
      %c0_44 = arith.constant 0 : index
      %60 = vector.load %arg7[%c28, %c0_44] : memref<72x256xf32, #tpu.memory_space<vmem>>, vector<4x256xf32>
      tpu.vector_store %arg7[%c28, %c0_44], %59 {strides = array<i32>} : memref<72x256xf32, #tpu.memory_space<vmem>>, vector<4x256xf32>,
      %cst_45 = arith.constant 0.000000e+00 : f32
      %61 = vector.broadcast %cst_45 : f32 to vector<4x256xf32>
      %c36 = arith.constant 36 : index
      %c0_46 = arith.constant 0 : index
      %62 = vector.load %arg7[%c36, %c0_46] : memref<72x256xf32, #tpu.memory_space<vmem>>, vector<4x256xf32>
      tpu.vector_store %arg7[%c36, %c0_46], %61 {strides = array<i32>} : memref<72x256xf32, #tpu.memory_space<vmem>>, vector<4x256xf32>,
      %cst_47 = arith.constant 0.000000e+00 : f32
      %63 = vector.broadcast %cst_47 : f32 to vector<4x256xf32>
      %c44 = arith.constant 44 : index
      %c0_48 = arith.constant 0 : index
      %64 = vector.load %arg7[%c44, %c0_48] : memref<72x256xf32, #tpu.memory_space<vmem>>, vector<4x256xf32>
      tpu.vector_store %arg7[%c44, %c0_48], %63 {strides = array<i32>} : memref<72x256xf32, #tpu.memory_space<vmem>>, vector<4x256xf32>,
      %cst_49 = arith.constant 0.000000e+00 : f32
      %65 = vector.broadcast %cst_49 : f32 to vector<4x256xf32>
      %c52 = arith.constant 52 : index
      %c0_50 = arith.constant 0 : index
      %66 = vector.load %arg7[%c52, %c0_50] : memref<72x256xf32, #tpu.memory_space<vmem>>, vector<4x256xf32>
      tpu.vector_store %arg7[%c52, %c0_50], %65 {strides = array<i32>} : memref<72x256xf32, #tpu.memory_space<vmem>>, vector<4x256xf32>,
      %cst_51 = arith.constant 0.000000e+00 : f32
      %67 = vector.broadcast %cst_51 : f32 to vector<4x256xf32>
      %c60 = arith.constant 60 : index
      %c0_52 = arith.constant 0 : index
      %68 = vector.load %arg7[%c60, %c0_52] : memref<72x256xf32, #tpu.memory_space<vmem>>, vector<4x256xf32>
      tpu.vector_store %arg7[%c60, %c0_52], %67 {strides = array<i32>} : memref<72x256xf32, #tpu.memory_space<vmem>>, vector<4x256xf32>,
      %cst_53 = arith.constant 0.000000e+00 : f32
      %69 = vector.broadcast %cst_53 : f32 to vector<4x256xf32>
      %c68 = arith.constant 68 : index
      %c0_54 = arith.constant 0 : index
      %70 = vector.load %arg7[%c68, %c0_54] : memref<72x256xf32, #tpu.memory_space<vmem>>, vector<4x256xf32>
      tpu.vector_store %arg7[%c68, %c0_54], %69 {strides = array<i32>} : memref<72x256xf32, #tpu.memory_space<vmem>>, vector<4x256xf32>,
      %c0_i32_55 = arith.constant 0 : i32
      %c0_i32_56 = arith.constant 0 : i32
      %c0_i32_57 = arith.constant 0 : i32
      %71 = tpu.memref_slice %arg2[%arg0, %c0_i32_55, %c0_i32_56, %c0_i32_57] : memref<2x4x16x16xf32, #tpu.memory_space<any>> -> memref<1x4x16x16xf32, #tpu.memory_space<any>>
      %72 = tpu.memref_squeeze %71 : memref<1x4x16x16xf32, #tpu.memory_space<any>> -> memref<4x16x16xf32, #tpu.memory_space<any>>
      %c0_i32_58 = arith.constant 0 : i32
      %c1_i32 = arith.constant 1 : i32
      %c1_i32_59 = arith.constant 1 : i32
      %73 = tpu.memref_slice %arg6[%c0_i32_58, %c1_i32, %c1_i32_59] : memref<4x18x18xf32, #tpu.memory_space<vmem>> -> memref<4x16x16xf32, #tpu.memory_space<vmem>>
      tpu.enqueue_dma source(%72 : memref<4x16x16xf32, #tpu.memory_space<any>>) target(%73 : memref<4x16x16xf32, #tpu.memory_space<vmem>>) target_semaphore(%arg8 : memref<!tpu.dma_semaphore, #tpu.memory_space<semaphore_mem>>)
      %c0_i32_60 = arith.constant 0 : i32
      %c0_i32_61 = arith.constant 0 : i32
      %c0_i32_62 = arith.constant 0 : i32
      %74 = tpu.memref_slice %arg2[%arg0, %c0_i32_60, %c0_i32_61, %c0_i32_62] : memref<2x4x16x16xf32, #tpu.memory_space<any>> -> memref<1x4x16x16xf32, #tpu.memory_space<any>>
      %75 = tpu.memref_squeeze %74 : memref<1x4x16x16xf32, #tpu.memory_space<any>> -> memref<4x16x16xf32, #tpu.memory_space<any>>
      %c0_i32_63 = arith.constant 0 : i32
      %c1_i32_64 = arith.constant 1 : i32
      %c1_i32_65 = arith.constant 1 : i32
      %76 = tpu.memref_slice %arg6[%c0_i32_63, %c1_i32_64, %c1_i32_65] : memref<4x18x18xf32, #tpu.memory_space<vmem>> -> memref<4x16x16xf32, #tpu.memory_space<vmem>>
      tpu.wait_dma2 semaphore(%arg8 : memref<!tpu.dma_semaphore, #tpu.memory_space<semaphore_mem>>) src(%75 : memref<4x16x16xf32, #tpu.memory_space<any>>) dst(%76 : memref<4x16x16xf32, #tpu.memory_space<vmem>>)
    } else {
    }
    %c16_i32 = arith.constant 16 : i32
    %3 = arith.muli %arg1, %c16_i32 : i32
    %4 = tpu.assume_multiple %3, 8 : i32
    %c0 = arith.constant 0 : index
    %5 = arith.index_cast %4 : i32 to index
    %c0_1 = arith.constant 0 : index
    %6 = vector.load %arg6[%c0, %5, %c0_1] : memref<4x18x18xf32, #tpu.memory_space<vmem>>, vector<4x18x18xf32>
    %7 = vector.extract_strided_slice %6 {offsets = [0, 0, 0], sizes = [4, 16, 16], strides = [1, 1, 1]} : vector<4x18x18xf32> to vector<4x16x16xf32>
    %8 = vector.shape_cast %7 : vector<4x16x16xf32> to vector<4x256xf32>
    %c0_2 = arith.constant 0 : index
    %c0_3 = arith.constant 0 : index
    %9 = vector.load %arg7[%c0_2, %c0_3] : memref<72x256xf32, #tpu.memory_space<vmem>>, vector<4x256xf32>
    tpu.vector_store %arg7[%c0_2, %c0_3], %8 {strides = array<i32>} : memref<72x256xf32, #tpu.memory_space<vmem>>, vector<4x256xf32>,
    %10 = vector.extract_strided_slice %6 {offsets = [0, 0, 1], sizes = [4, 16, 16], strides = [1, 1, 1]} : vector<4x18x18xf32> to vector<4x16x16xf32>
    %11 = vector.shape_cast %10 : vector<4x16x16xf32> to vector<4x256xf32>
    %c8 = arith.constant 8 : index
    %c0_4 = arith.constant 0 : index
    %12 = vector.load %arg7[%c8, %c0_4] : memref<72x256xf32, #tpu.memory_space<vmem>>, vector<4x256xf32>
    tpu.vector_store %arg7[%c8, %c0_4], %11 {strides = array<i32>} : memref<72x256xf32, #tpu.memory_space<vmem>>, vector<4x256xf32>,
    %13 = vector.extract_strided_slice %6 {offsets = [0, 0, 2], sizes = [4, 16, 16], strides = [1, 1, 1]} : vector<4x18x18xf32> to vector<4x16x16xf32>
    %14 = vector.shape_cast %13 : vector<4x16x16xf32> to vector<4x256xf32>
    %c16 = arith.constant 16 : index
    %c0_5 = arith.constant 0 : index
    %15 = vector.load %arg7[%c16, %c0_5] : memref<72x256xf32, #tpu.memory_space<vmem>>, vector<4x256xf32>
    tpu.vector_store %arg7[%c16, %c0_5], %14 {strides = array<i32>} : memref<72x256xf32, #tpu.memory_space<vmem>>, vector<4x256xf32>,
    %16 = vector.extract_strided_slice %6 {offsets = [0, 1, 0], sizes = [4, 16, 16], strides = [1, 1, 1]} : vector<4x18x18xf32> to vector<4x16x16xf32>
    %17 = vector.shape_cast %16 : vector<4x16x16xf32> to vector<4x256xf32>
    %c24 = arith.constant 24 : index
    %c0_6 = arith.constant 0 : index
    %18 = vector.load %arg7[%c24, %c0_6] : memref<72x256xf32, #tpu.memory_space<vmem>>, vector<4x256xf32>
    tpu.vector_store %arg7[%c24, %c0_6], %17 {strides = array<i32>} : memref<72x256xf32, #tpu.memory_space<vmem>>, vector<4x256xf32>,
    %19 = vector.extract_strided_slice %6 {offsets = [0, 1, 1], sizes = [4, 16, 16], strides = [1, 1, 1]} : vector<4x18x18xf32> to vector<4x16x16xf32>
    %20 = vector.shape_cast %19 : vector<4x16x16xf32> to vector<4x256xf32>
    %c32 = arith.constant 32 : index
    %c0_7 = arith.constant 0 : index
    %21 = vector.load %arg7[%c32, %c0_7] : memref<72x256xf32, #tpu.memory_space<vmem>>, vector<4x256xf32>
    tpu.vector_store %arg7[%c32, %c0_7], %20 {strides = array<i32>} : memref<72x256xf32, #tpu.memory_space<vmem>>, vector<4x256xf32>,
    %22 = vector.extract_strided_slice %6 {offsets = [0, 1, 2], sizes = [4, 16, 16], strides = [1, 1, 1]} : vector<4x18x18xf32> to vector<4x16x16xf32>
    %23 = vector.shape_cast %22 : vector<4x16x16xf32> to vector<4x256xf32>
    %c40 = arith.constant 40 : index
    %c0_8 = arith.constant 0 : index
    %24 = vector.load %arg7[%c40, %c0_8] : memref<72x256xf32, #tpu.memory_space<vmem>>, vector<4x256xf32>
    tpu.vector_store %arg7[%c40, %c0_8], %23 {strides = array<i32>} : memref<72x256xf32, #tpu.memory_space<vmem>>, vector<4x256xf32>,
    %25 = vector.extract_strided_slice %6 {offsets = [0, 2, 0], sizes = [4, 16, 16], strides = [1, 1, 1]} : vector<4x18x18xf32> to vector<4x16x16xf32>
    %26 = vector.shape_cast %25 : vector<4x16x16xf32> to vector<4x256xf32>
    %c48 = arith.constant 48 : index
    %c0_9 = arith.constant 0 : index
    %27 = vector.load %arg7[%c48, %c0_9] : memref<72x256xf32, #tpu.memory_space<vmem>>, vector<4x256xf32>
    tpu.vector_store %arg7[%c48, %c0_9], %26 {strides = array<i32>} : memref<72x256xf32, #tpu.memory_space<vmem>>, vector<4x256xf32>,
    %28 = vector.extract_strided_slice %6 {offsets = [0, 2, 1], sizes = [4, 16, 16], strides = [1, 1, 1]} : vector<4x18x18xf32> to vector<4x16x16xf32>
    %29 = vector.shape_cast %28 : vector<4x16x16xf32> to vector<4x256xf32>
    %c56 = arith.constant 56 : index
    %c0_10 = arith.constant 0 : index
    %30 = vector.load %arg7[%c56, %c0_10] : memref<72x256xf32, #tpu.memory_space<vmem>>, vector<4x256xf32>
    tpu.vector_store %arg7[%c56, %c0_10], %29 {strides = array<i32>} : memref<72x256xf32, #tpu.memory_space<vmem>>, vector<4x256xf32>,
    %31 = vector.extract_strided_slice %6 {offsets = [0, 2, 2], sizes = [4, 16, 16], strides = [1, 1, 1]} : vector<4x18x18xf32> to vector<4x16x16xf32>
    %32 = vector.shape_cast %31 : vector<4x16x16xf32> to vector<4x256xf32>
    %c64 = arith.constant 64 : index
    %c0_11 = arith.constant 0 : index
    %33 = vector.load %arg7[%c64, %c0_11] : memref<72x256xf32, #tpu.memory_space<vmem>>, vector<4x256xf32>
    tpu.vector_store %arg7[%c64, %c0_11], %32 {strides = array<i32>} : memref<72x256xf32, #tpu.memory_space<vmem>>, vector<4x256xf32>,
    %c0_12 = arith.constant 0 : index
    %c0_13 = arith.constant 0 : index
    %34 = vector.load %arg3[%c0_12, %c0_13] : memref<8x72xf32, #tpu.memory_space<vmem>>, vector<8x72xf32>
    %c0_14 = arith.constant 0 : index
    %c0_15 = arith.constant 0 : index
    %35 = vector.load %arg7[%c0_14, %c0_15] : memref<72x256xf32, #tpu.memory_space<vmem>>, vector<72x256xf32>
    %cst = arith.constant dense<0.000000e+00> : vector<8x256xf32>
    %36 = tpu.matmul %34, %35, %cst {dimension_numbers = #tpu.dot_dimension_numbers<[1], [0], [0], [1], [0, 0, 1, 1], [], []>} : vector<8x72xf32>, vector<72x256xf32>, vector<8x256xf32> -> vector<8x256xf32>
    %c0_16 = arith.constant 0 : index
    %c0_17 = arith.constant 0 : index
    %37 = vector.load %arg4[%c0_16, %c0_17] : memref<8x1xf32, #tpu.memory_space<vmem>>, vector<8x1xf32>
    %38 = vector.broadcast %37 : vector<8x1xf32> to vector<8x256xf32>
    %39 = arith.addf %36, %38 : vector<8x256xf32>
    %cst_18 = arith.constant 0.000000e+00 : f32
    %40 = vector.broadcast %cst_18 : f32 to vector<8x256xf32>
    %41 = arith.maximumf %39, %40 : vector<8x256xf32>
    %c0_19 = arith.constant 0 : index
    %c0_20 = arith.constant 0 : index
    %c0_21 = arith.constant 0 : index
    %42 = vector.load %arg5[%c0_19, %c0_20, %c0_21] : memref<1x8x256xf32, #tpu.memory_space<vmem>>, vector<1x8x256xf32>
    %43 = vector.shape_cast %42 : vector<1x8x256xf32> to vector<8x256xf32>
    %44 = vector.shape_cast %41 : vector<8x256xf32> to vector<1x8x256xf32>
    tpu.vector_store %arg5[%c0_19, %c0_20, %c0_21], %44 {strides = array<i32>} : memref<1x8x256xf32, #tpu.memory_space<vmem>>, vector<1x8x256xf32>,
    return
  }
  func.func @transform_1(%arg0: i32, %arg1: i32) -> (i32, i32) {
    %c0_i32 = arith.constant 0 : i32
    %c0_i32_0 = arith.constant 0 : i32
    %c0_i32_1 = arith.constant 0 : i32
    return %c0_i32, %c0_i32_0 : i32, i32
  }
  func.func @transform_2(%arg0: i32, %arg1: i32) -> (i32, i32) {
    %c0_i32 = arith.constant 0 : i32
    %c0_i32_0 = arith.constant 0 : i32
    %c0_i32_1 = arith.constant 0 : i32
    return %c0_i32, %c0_i32_0 : i32, i32
  }
  func.func @transform_3(%arg0: i32, %arg1: i32) -> (i32, i32, i32) {
    %c0_i32 = arith.constant 0 : i32
    %c0_i32_0 = arith.constant 0 : i32
    return %arg0, %c0_i32, %arg1 : i32, i32, i32
  }
}

module attributes {stable_mosaic.version = 11 : i64} {
  func.func @basic_conv2d_kernel(%arg0: i32, %arg1: i32, %arg2: memref<1x4x16x16xf32, #tpu.memory_space<vmem>>, %arg3: memref<8x72xf32, #tpu.memory_space<vmem>>, %arg4: memref<8x1xf32, #tpu.memory_space<vmem>>, %arg5: memref<1x8x256xf32, #tpu.memory_space<vmem>>, %arg6: memref<4x18x18xf32, #tpu.memory_space<vmem>>, %arg7: memref<72x256xf32, #tpu.memory_space<vmem>>, %arg8: memref<!tpu.dma_semaphore, #tpu.memory_space<semaphore_mem>>) attributes {dimension_semantics = [#tpu.dimension_semantics<parallel>, #tpu.dimension_semantics<arbitrary>], iteration_bounds = array<i64: 2, 1>, scalar_prefetch = 0 : i64, scratch_operands = 3 : i64, tpu.core_type = #tpu.core_type<tc>, window_params = [{transform_indices = @transform_0, window_bounds = array<i64: 1, 4, 16, 16>}, {pipeline_mode = #tpu.pipeline_mode<synchronous>, transform_indices = @transform_1, window_bounds = array<i64: 8, 72>}, {pipeline_mode = #tpu.pipeline_mode<synchronous>, transform_indices = @transform_2, window_bounds = array<i64: 8, 1>}, {transform_indices = @transform_3, window_bounds = array<i64: 1, 8, 256>}]} {
    %c0_i32 = arith.constant 0 : i32
    %0 = arith.cmpi eq, %arg1, %c0_i32 : i32
    %1 = arith.extui %0 : i1 to i32
    %c0_i32_0 = arith.constant 0 : i32
    %2 = arith.cmpi ne, %1, %c0_i32_0 : i32
    scf.if %2 {
      %cst_22 = arith.constant 0.000000e+00 : f32
      %45 = vector.broadcast %cst_22 : f32 to vector<4x1x18xf32>
      %c0_23 = arith.constant 0 : index
      %c0_24 = arith.constant 0 : index
      %c0_25 = arith.constant 0 : index
      %46 = vector.load %arg6[%c0_23, %c0_24, %c0_25] : memref<4x18x18xf32, #tpu.memory_space<vmem>>, vector<4x1x18xf32>
      tpu.vector_store %arg6[%c0_23, %c0_24, %c0_25], %45 {strides = array<i32>} : memref<4x18x18xf32, #tpu.memory_space<vmem>>, vector<4x1x18xf32>,
      %cst_26 = arith.constant 0.000000e+00 : f32
      %47 = vector.broadcast %cst_26 : f32 to vector<4x1x18xf32>
      %c0_27 = arith.constant 0 : index
      %c17 = arith.constant 17 : index
      %c0_28 = arith.constant 0 : index
      %48 = vector.load %arg6[%c0_27, %c17, %c0_28] : memref<4x18x18xf32, #tpu.memory_space<vmem>>, vector<4x1x18xf32>
      tpu.vector_store %arg6[%c0_27, %c17, %c0_28], %47 {strides = array<i32>} : memref<4x18x18xf32, #tpu.memory_space<vmem>>, vector<4x1x18xf32>,
      %cst_29 = arith.constant 0.000000e+00 : f32
      %49 = vector.broadcast %cst_29 : f32 to vector<4x18x1xf32>
      %c0_30 = arith.constant 0 : index
      %c0_31 = arith.constant 0 : index
      %c0_32 = arith.constant 0 : index
      %50 = vector.load %arg6[%c0_30, %c0_31, %c0_32] : memref<4x18x18xf32, #tpu.memory_space<vmem>>, vector<4x18x1xf32>
      tpu.vector_store %arg6[%c0_30, %c0_31, %c0_32], %49 {strides = array<i32>} : memref<4x18x18xf32, #tpu.memory_space<vmem>>, vector<4x18x1xf32>,
      %cst_33 = arith.constant 0.000000e+00 : f32
      %51 = vector.broadcast %cst_33 : f32 to vector<4x18x1xf32>
      %c0_34 = arith.constant 0 : index
      %c0_35 = arith.constant 0 : index
      %c17_36 = arith.constant 17 : index
      %52 = vector.load %arg6[%c0_34, %c0_35, %c17_36] : memref<4x18x18xf32, #tpu.memory_space<vmem>>, vector<4x18x1xf32>
      tpu.vector_store %arg6[%c0_34, %c0_35, %c17_36], %51 {strides = array<i32>} : memref<4x18x18xf32, #tpu.memory_space<vmem>>, vector<4x18x1xf32>,
      %cst_37 = arith.constant 0.000000e+00 : f32
      %53 = vector.broadcast %cst_37 : f32 to vector<4x256xf32>
      %c4 = arith.constant 4 : index
      %c0_38 = arith.constant 0 : index
      %54 = vector.load %arg7[%c4, %c0_38] : memref<72x256xf32, #tpu.memory_space<vmem>>, vector<4x256xf32>
      tpu.vector_store %arg7[%c4, %c0_38], %53 {strides = array<i32>} : memref<72x256xf32, #tpu.memory_space<vmem>>, vector<4x256xf32>,
      %cst_39 = arith.constant 0.000000e+00 : f32
      %55 = vector.broadcast %cst_39 : f32 to vector<4x256xf32>
      %c12 = arith.constant 12 : index
      %c0_40 = arith.constant 0 : index
      %56 = vector.load %arg7[%c12, %c0_40] : memref<72x256xf32, #tpu.memory_space<vmem>>, vector<4x256xf32>
      tpu.vector_store %arg7[%c12, %c0_40], %55 {strides = array<i32>} : memref<72x256xf32, #tpu.memory_space<vmem>>, vector<4x256xf32>,
      %cst_41 = arith.constant 0.000000e+00 : f32
      %57 = vector.broadcast %cst_41 : f32 to vector<4x256xf32>
      %c20 = arith.constant 20 : index
      %c0_42 = arith.constant 0 : index
      %58 = vector.load %arg7[%c20, %c0_42] : memref<72x256xf32, #tpu.memory_space<vmem>>, vector<4x256xf32>
      tpu.vector_store %arg7[%c20, %c0_42], %57 {strides = array<i32>} : memref<72x256xf32, #tpu.memory_space<vmem>>, vector<4x256xf32>,
      %cst_43 = arith.constant 0.000000e+00 : f32
      %59 = vector.broadcast %cst_43 : f32 to vector<4x256xf32>
      %c28 = arith.constant 28 : index
      %c0_44 = arith.constant 0 : index
      %60 = vector.load %arg7[%c28, %c0_44] : memref<72x256xf32, #tpu.memory_space<vmem>>, vector<4x256xf32>
      tpu.vector_store %arg7[%c28, %c0_44], %59 {strides = array<i32>} : memref<72x256xf32, #tpu.memory_space<vmem>>, vector<4x256xf32>,
      %cst_45 = arith.constant 0.000000e+00 : f32
      %61 = vector.broadcast %cst_45 : f32 to vector<4x256xf32>
      %c36 = arith.constant 36 : index
      %c0_46 = arith.constant 0 : index
      %62 = vector.load %arg7[%c36, %c0_46] : memref<72x256xf32, #tpu.memory_space<vmem>>, vector<4x256xf32>
      tpu.vector_store %arg7[%c36, %c0_46], %61 {strides = array<i32>} : memref<72x256xf32, #tpu.memory_space<vmem>>, vector<4x256xf32>,
      %cst_47 = arith.constant 0.000000e+00 : f32
      %63 = vector.broadcast %cst_47 : f32 to vector<4x256xf32>
      %c44 = arith.constant 44 : index
      %c0_48 = arith.constant 0 : index
      %64 = vector.load %arg7[%c44, %c0_48] : memref<72x256xf32, #tpu.memory_space<vmem>>, vector<4x256xf32>
      tpu.vector_store %arg7[%c44, %c0_48], %63 {strides = array<i32>} : memref<72x256xf32, #tpu.memory_space<vmem>>, vector<4x256xf32>,
      %cst_49 = arith.constant 0.000000e+00 : f32
      %65 = vector.broadcast %cst_49 : f32 to vector<4x256xf32>
      %c52 = arith.constant 52 : index
      %c0_50 = arith.constant 0 : index
      %66 = vector.load %arg7[%c52, %c0_50] : memref<72x256xf32, #tpu.memory_space<vmem>>, vector<4x256xf32>
      tpu.vector_store %arg7[%c52, %c0_50], %65 {strides = array<i32>} : memref<72x256xf32, #tpu.memory_space<vmem>>, vector<4x256xf32>,
      %cst_51 = arith.constant 0.000000e+00 : f32
      %67 = vector.broadcast %cst_51 : f32 to vector<4x256xf32>
      %c60 = arith.constant 60 : index
      %c0_52 = arith.constant 0 : index
      %68 = vector.load %arg7[%c60, %c0_52] : memref<72x256xf32, #tpu.memory_space<vmem>>, vector<4x256xf32>
      tpu.vector_store %arg7[%c60, %c0_52], %67 {strides = array<i32>} : memref<72x256xf32, #tpu.memory_space<vmem>>, vector<4x256xf32>,
      %cst_53 = arith.constant 0.000000e+00 : f32
      %69 = vector.broadcast %cst_53 : f32 to vector<4x256xf32>
      %c68 = arith.constant 68 : index
      %c0_54 = arith.constant 0 : index
      %70 = vector.load %arg7[%c68, %c0_54] : memref<72x256xf32, #tpu.memory_space<vmem>>, vector<4x256xf32>
      tpu.vector_store %arg7[%c68, %c0_54], %69 {strides = array<i32>} : memref<72x256xf32, #tpu.memory_space<vmem>>, vector<4x256xf32>,
      %c0_55 = arith.constant 0 : index
      %c0_56 = arith.constant 0 : index
      %c0_57 = arith.constant 0 : index
      %c0_58 = arith.constant 0 : index
      %71 = vector.load %arg2[%c0_55, %c0_56, %c0_57, %c0_58] : memref<1x4x16x16xf32, #tpu.memory_space<vmem>>, vector<1x4x16x16xf32>
      %72 = vector.shape_cast %71 : vector<1x4x16x16xf32> to vector<4x16x16xf32>
      %c0_59 = arith.constant 0 : index
      %c1 = arith.constant 1 : index
      %c1_60 = arith.constant 1 : index
      %73 = vector.load %arg6[%c0_59, %c1, %c1_60] : memref<4x18x18xf32, #tpu.memory_space<vmem>>, vector<4x16x16xf32>
      tpu.vector_store %arg6[%c0_59, %c1, %c1_60], %72 {strides = array<i32>} : memref<4x18x18xf32, #tpu.memory_space<vmem>>, vector<4x16x16xf32>,
    } else {
    }
    %c16_i32 = arith.constant 16 : i32
    %3 = arith.muli %arg1, %c16_i32 : i32
    %4 = tpu.assume_multiple %3, 8 : i32
    %c0 = arith.constant 0 : index
    %5 = arith.index_cast %4 : i32 to index
    %c0_1 = arith.constant 0 : index
    %6 = vector.load %arg6[%c0, %5, %c0_1] : memref<4x18x18xf32, #tpu.memory_space<vmem>>, vector<4x18x18xf32>
    %7 = vector.extract_strided_slice %6 {offsets = [0, 0, 0], sizes = [4, 16, 16], strides = [1, 1, 1]} : vector<4x18x18xf32> to vector<4x16x16xf32>
    %8 = vector.shape_cast %7 : vector<4x16x16xf32> to vector<4x256xf32>
    %c0_2 = arith.constant 0 : index
    %c0_3 = arith.constant 0 : index
    %9 = vector.load %arg7[%c0_2, %c0_3] : memref<72x256xf32, #tpu.memory_space<vmem>>, vector<4x256xf32>
    tpu.vector_store %arg7[%c0_2, %c0_3], %8 {strides = array<i32>} : memref<72x256xf32, #tpu.memory_space<vmem>>, vector<4x256xf32>,
    %10 = vector.extract_strided_slice %6 {offsets = [0, 0, 1], sizes = [4, 16, 16], strides = [1, 1, 1]} : vector<4x18x18xf32> to vector<4x16x16xf32>
    %11 = vector.shape_cast %10 : vector<4x16x16xf32> to vector<4x256xf32>
    %c8 = arith.constant 8 : index
    %c0_4 = arith.constant 0 : index
    %12 = vector.load %arg7[%c8, %c0_4] : memref<72x256xf32, #tpu.memory_space<vmem>>, vector<4x256xf32>
    tpu.vector_store %arg7[%c8, %c0_4], %11 {strides = array<i32>} : memref<72x256xf32, #tpu.memory_space<vmem>>, vector<4x256xf32>,
    %13 = vector.extract_strided_slice %6 {offsets = [0, 0, 2], sizes = [4, 16, 16], strides = [1, 1, 1]} : vector<4x18x18xf32> to vector<4x16x16xf32>
    %14 = vector.shape_cast %13 : vector<4x16x16xf32> to vector<4x256xf32>
    %c16 = arith.constant 16 : index
    %c0_5 = arith.constant 0 : index
    %15 = vector.load %arg7[%c16, %c0_5] : memref<72x256xf32, #tpu.memory_space<vmem>>, vector<4x256xf32>
    tpu.vector_store %arg7[%c16, %c0_5], %14 {strides = array<i32>} : memref<72x256xf32, #tpu.memory_space<vmem>>, vector<4x256xf32>,
    %16 = vector.extract_strided_slice %6 {offsets = [0, 1, 0], sizes = [4, 16, 16], strides = [1, 1, 1]} : vector<4x18x18xf32> to vector<4x16x16xf32>
    %17 = vector.shape_cast %16 : vector<4x16x16xf32> to vector<4x256xf32>
    %c24 = arith.constant 24 : index
    %c0_6 = arith.constant 0 : index
    %18 = vector.load %arg7[%c24, %c0_6] : memref<72x256xf32, #tpu.memory_space<vmem>>, vector<4x256xf32>
    tpu.vector_store %arg7[%c24, %c0_6], %17 {strides = array<i32>} : memref<72x256xf32, #tpu.memory_space<vmem>>, vector<4x256xf32>,
    %19 = vector.extract_strided_slice %6 {offsets = [0, 1, 1], sizes = [4, 16, 16], strides = [1, 1, 1]} : vector<4x18x18xf32> to vector<4x16x16xf32>
    %20 = vector.shape_cast %19 : vector<4x16x16xf32> to vector<4x256xf32>
    %c32 = arith.constant 32 : index
    %c0_7 = arith.constant 0 : index
    %21 = vector.load %arg7[%c32, %c0_7] : memref<72x256xf32, #tpu.memory_space<vmem>>, vector<4x256xf32>
    tpu.vector_store %arg7[%c32, %c0_7], %20 {strides = array<i32>} : memref<72x256xf32, #tpu.memory_space<vmem>>, vector<4x256xf32>,
    %22 = vector.extract_strided_slice %6 {offsets = [0, 1, 2], sizes = [4, 16, 16], strides = [1, 1, 1]} : vector<4x18x18xf32> to vector<4x16x16xf32>
    %23 = vector.shape_cast %22 : vector<4x16x16xf32> to vector<4x256xf32>
    %c40 = arith.constant 40 : index
    %c0_8 = arith.constant 0 : index
    %24 = vector.load %arg7[%c40, %c0_8] : memref<72x256xf32, #tpu.memory_space<vmem>>, vector<4x256xf32>
    tpu.vector_store %arg7[%c40, %c0_8], %23 {strides = array<i32>} : memref<72x256xf32, #tpu.memory_space<vmem>>, vector<4x256xf32>,
    %25 = vector.extract_strided_slice %6 {offsets = [0, 2, 0], sizes = [4, 16, 16], strides = [1, 1, 1]} : vector<4x18x18xf32> to vector<4x16x16xf32>
    %26 = vector.shape_cast %25 : vector<4x16x16xf32> to vector<4x256xf32>
    %c48 = arith.constant 48 : index
    %c0_9 = arith.constant 0 : index
    %27 = vector.load %arg7[%c48, %c0_9] : memref<72x256xf32, #tpu.memory_space<vmem>>, vector<4x256xf32>
    tpu.vector_store %arg7[%c48, %c0_9], %26 {strides = array<i32>} : memref<72x256xf32, #tpu.memory_space<vmem>>, vector<4x256xf32>,
    %28 = vector.extract_strided_slice %6 {offsets = [0, 2, 1], sizes = [4, 16, 16], strides = [1, 1, 1]} : vector<4x18x18xf32> to vector<4x16x16xf32>
    %29 = vector.shape_cast %28 : vector<4x16x16xf32> to vector<4x256xf32>
    %c56 = arith.constant 56 : index
    %c0_10 = arith.constant 0 : index
    %30 = vector.load %arg7[%c56, %c0_10] : memref<72x256xf32, #tpu.memory_space<vmem>>, vector<4x256xf32>
    tpu.vector_store %arg7[%c56, %c0_10], %29 {strides = array<i32>} : memref<72x256xf32, #tpu.memory_space<vmem>>, vector<4x256xf32>,
    %31 = vector.extract_strided_slice %6 {offsets = [0, 2, 2], sizes = [4, 16, 16], strides = [1, 1, 1]} : vector<4x18x18xf32> to vector<4x16x16xf32>
    %32 = vector.shape_cast %31 : vector<4x16x16xf32> to vector<4x256xf32>
    %c64 = arith.constant 64 : index
    %c0_11 = arith.constant 0 : index
    %33 = vector.load %arg7[%c64, %c0_11] : memref<72x256xf32, #tpu.memory_space<vmem>>, vector<4x256xf32>
    tpu.vector_store %arg7[%c64, %c0_11], %32 {strides = array<i32>} : memref<72x256xf32, #tpu.memory_space<vmem>>, vector<4x256xf32>,
    %c0_12 = arith.constant 0 : index
    %c0_13 = arith.constant 0 : index
    %34 = vector.load %arg3[%c0_12, %c0_13] : memref<8x72xf32, #tpu.memory_space<vmem>>, vector<8x72xf32>
    %c0_14 = arith.constant 0 : index
    %c0_15 = arith.constant 0 : index
    %35 = vector.load %arg7[%c0_14, %c0_15] : memref<72x256xf32, #tpu.memory_space<vmem>>, vector<72x256xf32>
    %cst = arith.constant dense<0.000000e+00> : vector<8x256xf32>
    %36 = tpu.matmul %34, %35, %cst {dimension_numbers = #tpu.dot_dimension_numbers<[1], [0], [0], [1], [0, 0, 1, 1], [], []>} : vector<8x72xf32>, vector<72x256xf32>, vector<8x256xf32> -> vector<8x256xf32>
    %c0_16 = arith.constant 0 : index
    %c0_17 = arith.constant 0 : index
    %37 = vector.load %arg4[%c0_16, %c0_17] : memref<8x1xf32, #tpu.memory_space<vmem>>, vector<8x1xf32>
    %38 = vector.broadcast %37 : vector<8x1xf32> to vector<8x256xf32>
    %39 = arith.addf %36, %38 : vector<8x256xf32>
    %cst_18 = arith.constant 0.000000e+00 : f32
    %40 = vector.broadcast %cst_18 : f32 to vector<8x256xf32>
    %41 = arith.maximumf %39, %40 : vector<8x256xf32>
    %c0_19 = arith.constant 0 : index
    %c0_20 = arith.constant 0 : index
    %c0_21 = arith.constant 0 : index
    %42 = vector.load %arg5[%c0_19, %c0_20, %c0_21] : memref<1x8x256xf32, #tpu.memory_space<vmem>>, vector<1x8x256xf32>
    %43 = vector.shape_cast %42 : vector<1x8x256xf32> to vector<8x256xf32>
    %44 = vector.shape_cast %41 : vector<8x256xf32> to vector<1x8x256xf32>
    tpu.vector_store %arg5[%c0_19, %c0_20, %c0_21], %44 {strides = array<i32>} : memref<1x8x256xf32, #tpu.memory_space<vmem>>, vector<1x8x256xf32>,
    return
  }
  func.func @transform_0(%arg0: i32, %arg1: i32) -> (i32, i32, i32, i32) {
    %c0_i32 = arith.constant 0 : i32
    %c0_i32_0 = arith.constant 0 : i32
    %c0_i32_1 = arith.constant 0 : i32
    %c0_i32_2 = arith.constant 0 : i32
    return %arg0, %c0_i32, %c0_i32_0, %c0_i32_1 : i32, i32, i32, i32
  }
  func.func @transform_1(%arg0: i32, %arg1: i32) -> (i32, i32) {
    %c0_i32 = arith.constant 0 : i32
    %c0_i32_0 = arith.constant 0 : i32
    %c0_i32_1 = arith.constant 0 : i32
    return %c0_i32, %c0_i32_0 : i32, i32
  }
  func.func @transform_2(%arg0: i32, %arg1: i32) -> (i32, i32) {
    %c0_i32 = arith.constant 0 : i32
    %c0_i32_0 = arith.constant 0 : i32
    %c0_i32_1 = arith.constant 0 : i32
    return %c0_i32, %c0_i32_0 : i32, i32
  }
  func.func @transform_3(%arg0: i32, %arg1: i32) -> (i32, i32, i32) {
    %c0_i32 = arith.constant 0 : i32
    %c0_i32_0 = arith.constant 0 : i32
    return %arg0, %c0_i32, %arg1 : i32, i32, i32
  }
}

module attributes {stable_mosaic.version = 11 : i64} {
  func.func @basic_conv2d_kernel(%arg0: i32, %arg1: i32, %arg2: memref<1x4x16x16xf32, #tpu.memory_space<vmem>>, %arg3: memref<8x72xf32, #tpu.memory_space<vmem>>, %arg4: memref<8x1xf32, #tpu.memory_space<vmem>>, %arg5: memref<1x8x256xf32, #tpu.memory_space<vmem>>, %arg6: memref<4x18x18xf32, #tpu.memory_space<vmem>>, %arg7: memref<72x256xf32, #tpu.memory_space<vmem>>, %arg8: memref<!tpu.dma_semaphore, #tpu.memory_space<semaphore_mem>>) attributes {dimension_semantics = [#tpu.dimension_semantics<parallel>, #tpu.dimension_semantics<arbitrary>], iteration_bounds = array<i64: 2, 1>, scalar_prefetch = 0 : i64, scratch_operands = 3 : i64, tpu.core_type = #tpu.core_type<tc>, window_params = [{transform_indices = @transform_0, window_bounds = array<i64: 1, 4, 16, 16>}, {pipeline_mode = #tpu.pipeline_mode<synchronous>, transform_indices = @transform_1, window_bounds = array<i64: 8, 72>}, {pipeline_mode = #tpu.pipeline_mode<synchronous>, transform_indices = @transform_2, window_bounds = array<i64: 8, 1>}, {transform_indices = @transform_3, window_bounds = array<i64: 1, 8, 256>}]} {
    %c0_i32 = arith.constant 0 : i32
    %0 = arith.cmpi eq, %arg1, %c0_i32 : i32
    %1 = arith.extui %0 : i1 to i32
    %c0_i32_0 = arith.constant 0 : i32
    %2 = arith.cmpi ne, %1, %c0_i32_0 : i32
    scf.if %2 {
      %cst_22 = arith.constant 0.000000e+00 : f32
      %45 = vector.broadcast %cst_22 : f32 to vector<4x1x18xf32>
      %c0_23 = arith.constant 0 : index
      %c0_24 = arith.constant 0 : index
      %c0_25 = arith.constant 0 : index
      %46 = vector.load %arg6[%c0_23, %c0_24, %c0_25] : memref<4x18x18xf32, #tpu.memory_space<vmem>>, vector<4x1x18xf32>
      tpu.vector_store %arg6[%c0_23, %c0_24, %c0_25], %45 {strides = array<i32>} : memref<4x18x18xf32, #tpu.memory_space<vmem>>, vector<4x1x18xf32>,
      %cst_26 = arith.constant 0.000000e+00 : f32
      %47 = vector.broadcast %cst_26 : f32 to vector<4x1x18xf32>
      %c0_27 = arith.constant 0 : index
      %c17 = arith.constant 17 : index
      %c0_28 = arith.constant 0 : index
      %48 = vector.load %arg6[%c0_27, %c17, %c0_28] : memref<4x18x18xf32, #tpu.memory_space<vmem>>, vector<4x1x18xf32>
      tpu.vector_store %arg6[%c0_27, %c17, %c0_28], %47 {strides = array<i32>} : memref<4x18x18xf32, #tpu.memory_space<vmem>>, vector<4x1x18xf32>,
      %cst_29 = arith.constant 0.000000e+00 : f32
      %49 = vector.broadcast %cst_29 : f32 to vector<4x18x1xf32>
      %c0_30 = arith.constant 0 : index
      %c0_31 = arith.constant 0 : index
      %c0_32 = arith.constant 0 : index
      %50 = vector.load %arg6[%c0_30, %c0_31, %c0_32] : memref<4x18x18xf32, #tpu.memory_space<vmem>>, vector<4x18x1xf32>
      tpu.vector_store %arg6[%c0_30, %c0_31, %c0_32], %49 {strides = array<i32>} : memref<4x18x18xf32, #tpu.memory_space<vmem>>, vector<4x18x1xf32>,
      %cst_33 = arith.constant 0.000000e+00 : f32
      %51 = vector.broadcast %cst_33 : f32 to vector<4x18x1xf32>
      %c0_34 = arith.constant 0 : index
      %c0_35 = arith.constant 0 : index
      %c17_36 = arith.constant 17 : index
      %52 = vector.load %arg6[%c0_34, %c0_35, %c17_36] : memref<4x18x18xf32, #tpu.memory_space<vmem>>, vector<4x18x1xf32>
      tpu.vector_store %arg6[%c0_34, %c0_35, %c17_36], %51 {strides = array<i32>} : memref<4x18x18xf32, #tpu.memory_space<vmem>>, vector<4x18x1xf32>,
      %cst_37 = arith.constant 0.000000e+00 : f32
      %53 = vector.broadcast %cst_37 : f32 to vector<4x256xf32>
      %c4 = arith.constant 4 : index
      %c0_38 = arith.constant 0 : index
      %54 = vector.load %arg7[%c4, %c0_38] : memref<72x256xf32, #tpu.memory_space<vmem>>, vector<4x256xf32>
      tpu.vector_store %arg7[%c4, %c0_38], %53 {strides = array<i32>} : memref<72x256xf32, #tpu.memory_space<vmem>>, vector<4x256xf32>,
      %cst_39 = arith.constant 0.000000e+00 : f32
      %55 = vector.broadcast %cst_39 : f32 to vector<4x256xf32>
      %c12 = arith.constant 12 : index
      %c0_40 = arith.constant 0 : index
      %56 = vector.load %arg7[%c12, %c0_40] : memref<72x256xf32, #tpu.memory_space<vmem>>, vector<4x256xf32>
      tpu.vector_store %arg7[%c12, %c0_40], %55 {strides = array<i32>} : memref<72x256xf32, #tpu.memory_space<vmem>>, vector<4x256xf32>,
      %cst_41 = arith.constant 0.000000e+00 : f32
      %57 = vector.broadcast %cst_41 : f32 to vector<4x256xf32>
      %c20 = arith.constant 20 : index
      %c0_42 = arith.constant 0 : index
      %58 = vector.load %arg7[%c20, %c0_42] : memref<72x256xf32, #tpu.memory_space<vmem>>, vector<4x256xf32>
      tpu.vector_store %arg7[%c20, %c0_42], %57 {strides = array<i32>} : memref<72x256xf32, #tpu.memory_space<vmem>>, vector<4x256xf32>,
      %cst_43 = arith.constant 0.000000e+00 : f32
      %59 = vector.broadcast %cst_43 : f32 to vector<4x256xf32>
      %c28 = arith.constant 28 : index
      %c0_44 = arith.constant 0 : index
      %60 = vector.load %arg7[%c28, %c0_44] : memref<72x256xf32, #tpu.memory_space<vmem>>, vector<4x256xf32>
      tpu.vector_store %arg7[%c28, %c0_44], %59 {strides = array<i32>} : memref<72x256xf32, #tpu.memory_space<vmem>>, vector<4x256xf32>,
      %cst_45 = arith.constant 0.000000e+00 : f32
      %61 = vector.broadcast %cst_45 : f32 to vector<4x256xf32>
      %c36 = arith.constant 36 : index
      %c0_46 = arith.constant 0 : index
      %62 = vector.load %arg7[%c36, %c0_46] : memref<72x256xf32, #tpu.memory_space<vmem>>, vector<4x256xf32>
      tpu.vector_store %arg7[%c36, %c0_46], %61 {strides = array<i32>} : memref<72x256xf32, #tpu.memory_space<vmem>>, vector<4x256xf32>,
      %cst_47 = arith.constant 0.000000e+00 : f32
      %63 = vector.broadcast %cst_47 : f32 to vector<4x256xf32>
      %c44 = arith.constant 44 : index
      %c0_48 = arith.constant 0 : index
      %64 = vector.load %arg7[%c44, %c0_48] : memref<72x256xf32, #tpu.memory_space<vmem>>, vector<4x256xf32>
      tpu.vector_store %arg7[%c44, %c0_48], %63 {strides = array<i32>} : memref<72x256xf32, #tpu.memory_space<vmem>>, vector<4x256xf32>,
      %cst_49 = arith.constant 0.000000e+00 : f32
      %65 = vector.broadcast %cst_49 : f32 to vector<4x256xf32>
      %c52 = arith.constant 52 : index
      %c0_50 = arith.constant 0 : index
      %66 = vector.load %arg7[%c52, %c0_50] : memref<72x256xf32, #tpu.memory_space<vmem>>, vector<4x256xf32>
      tpu.vector_store %arg7[%c52, %c0_50], %65 {strides = array<i32>} : memref<72x256xf32, #tpu.memory_space<vmem>>, vector<4x256xf32>,
      %cst_51 = arith.constant 0.000000e+00 : f32
      %67 = vector.broadcast %cst_51 : f32 to vector<4x256xf32>
      %c60 = arith.constant 60 : index
      %c0_52 = arith.constant 0 : index
      %68 = vector.load %arg7[%c60, %c0_52] : memref<72x256xf32, #tpu.memory_space<vmem>>, vector<4x256xf32>
      tpu.vector_store %arg7[%c60, %c0_52], %67 {strides = array<i32>} : memref<72x256xf32, #tpu.memory_space<vmem>>, vector<4x256xf32>,
      %cst_53 = arith.constant 0.000000e+00 : f32
      %69 = vector.broadcast %cst_53 : f32 to vector<4x256xf32>
      %c68 = arith.constant 68 : index
      %c0_54 = arith.constant 0 : index
      %70 = vector.load %arg7[%c68, %c0_54] : memref<72x256xf32, #tpu.memory_space<vmem>>, vector<4x256xf32>
      tpu.vector_store %arg7[%c68, %c0_54], %69 {strides = array<i32>} : memref<72x256xf32, #tpu.memory_space<vmem>>, vector<4x256xf32>,
      %c0_55 = arith.constant 0 : index
      %c0_56 = arith.constant 0 : index
      %c0_57 = arith.constant 0 : index
      %c0_58 = arith.constant 0 : index
      %71 = vector.load %arg2[%c0_55, %c0_56, %c0_57, %c0_58] : memref<1x4x16x16xf32, #tpu.memory_space<vmem>>, vector<1x4x16x16xf32>
      %72 = vector.shape_cast %71 : vector<1x4x16x16xf32> to vector<4x16x16xf32>
      %c0_59 = arith.constant 0 : index
      %c1 = arith.constant 1 : index
      %c1_60 = arith.constant 1 : index
      %73 = vector.load %arg6[%c0_59, %c1, %c1_60] : memref<4x18x18xf32, #tpu.memory_space<vmem>>, vector<4x16x16xf32>
      tpu.vector_store %arg6[%c0_59, %c1, %c1_60], %72 {strides = array<i32>} : memref<4x18x18xf32, #tpu.memory_space<vmem>>, vector<4x16x16xf32>,
    } else {
    }
    %c16_i32 = arith.constant 16 : i32
    %3 = arith.muli %arg1, %c16_i32 : i32
    %4 = tpu.assume_multiple %3, 8 : i32
    %c0 = arith.constant 0 : index
    %5 = arith.index_cast %4 : i32 to index
    %c0_1 = arith.constant 0 : index
    %6 = vector.load %arg6[%c0, %5, %c0_1] : memref<4x18x18xf32, #tpu.memory_space<vmem>>, vector<4x18x18xf32>
    %7 = vector.extract_strided_slice %6 {offsets = [0, 0, 0], sizes = [4, 16, 16], strides = [1, 1, 1]} : vector<4x18x18xf32> to vector<4x16x16xf32>
    %8 = vector.shape_cast %7 : vector<4x16x16xf32> to vector<4x256xf32>
    %c0_2 = arith.constant 0 : index
    %c0_3 = arith.constant 0 : index
    %9 = vector.load %arg7[%c0_2, %c0_3] : memref<72x256xf32, #tpu.memory_space<vmem>>, vector<4x256xf32>
    tpu.vector_store %arg7[%c0_2, %c0_3], %8 {strides = array<i32>} : memref<72x256xf32, #tpu.memory_space<vmem>>, vector<4x256xf32>,
    %10 = vector.extract_strided_slice %6 {offsets = [0, 0, 1], sizes = [4, 16, 16], strides = [1, 1, 1]} : vector<4x18x18xf32> to vector<4x16x16xf32>
    %11 = vector.shape_cast %10 : vector<4x16x16xf32> to vector<4x256xf32>
    %c8 = arith.constant 8 : index
    %c0_4 = arith.constant 0 : index
    %12 = vector.load %arg7[%c8, %c0_4] : memref<72x256xf32, #tpu.memory_space<vmem>>, vector<4x256xf32>
    tpu.vector_store %arg7[%c8, %c0_4], %11 {strides = array<i32>} : memref<72x256xf32, #tpu.memory_space<vmem>>, vector<4x256xf32>,
    %13 = vector.extract_strided_slice %6 {offsets = [0, 0, 2], sizes = [4, 16, 16], strides = [1, 1, 1]} : vector<4x18x18xf32> to vector<4x16x16xf32>
    %14 = vector.shape_cast %13 : vector<4x16x16xf32> to vector<4x256xf32>
    %c16 = arith.constant 16 : index
    %c0_5 = arith.constant 0 : index
    %15 = vector.load %arg7[%c16, %c0_5] : memref<72x256xf32, #tpu.memory_space<vmem>>, vector<4x256xf32>
    tpu.vector_store %arg7[%c16, %c0_5], %14 {strides = array<i32>} : memref<72x256xf32, #tpu.memory_space<vmem>>, vector<4x256xf32>,
    %16 = vector.extract_strided_slice %6 {offsets = [0, 1, 0], sizes = [4, 16, 16], strides = [1, 1, 1]} : vector<4x18x18xf32> to vector<4x16x16xf32>
    %17 = vector.shape_cast %16 : vector<4x16x16xf32> to vector<4x256xf32>
    %c24 = arith.constant 24 : index
    %c0_6 = arith.constant 0 : index
    %18 = vector.load %arg7[%c24, %c0_6] : memref<72x256xf32, #tpu.memory_space<vmem>>, vector<4x256xf32>
    tpu.vector_store %arg7[%c24, %c0_6], %17 {strides = array<i32>} : memref<72x256xf32, #tpu.memory_space<vmem>>, vector<4x256xf32>,
    %19 = vector.extract_strided_slice %6 {offsets = [0, 1, 1], sizes = [4, 16, 16], strides = [1, 1, 1]} : vector<4x18x18xf32> to vector<4x16x16xf32>
    %20 = vector.shape_cast %19 : vector<4x16x16xf32> to vector<4x256xf32>
    %c32 = arith.constant 32 : index
    %c0_7 = arith.constant 0 : index
    %21 = vector.load %arg7[%c32, %c0_7] : memref<72x256xf32, #tpu.memory_space<vmem>>, vector<4x256xf32>
    tpu.vector_store %arg7[%c32, %c0_7], %20 {strides = array<i32>} : memref<72x256xf32, #tpu.memory_space<vmem>>, vector<4x256xf32>,
    %22 = vector.extract_strided_slice %6 {offsets = [0, 1, 2], sizes = [4, 16, 16], strides = [1, 1, 1]} : vector<4x18x18xf32> to vector<4x16x16xf32>
    %23 = vector.shape_cast %22 : vector<4x16x16xf32> to vector<4x256xf32>
    %c40 = arith.constant 40 : index
    %c0_8 = arith.constant 0 : index
    %24 = vector.load %arg7[%c40, %c0_8] : memref<72x256xf32, #tpu.memory_space<vmem>>, vector<4x256xf32>
    tpu.vector_store %arg7[%c40, %c0_8], %23 {strides = array<i32>} : memref<72x256xf32, #tpu.memory_space<vmem>>, vector<4x256xf32>,
    %25 = vector.extract_strided_slice %6 {offsets = [0, 2, 0], sizes = [4, 16, 16], strides = [1, 1, 1]} : vector<4x18x18xf32> to vector<4x16x16xf32>
    %26 = vector.shape_cast %25 : vector<4x16x16xf32> to vector<4x256xf32>
    %c48 = arith.constant 48 : index
    %c0_9 = arith.constant 0 : index
    %27 = vector.load %arg7[%c48, %c0_9] : memref<72x256xf32, #tpu.memory_space<vmem>>, vector<4x256xf32>
    tpu.vector_store %arg7[%c48, %c0_9], %26 {strides = array<i32>} : memref<72x256xf32, #tpu.memory_space<vmem>>, vector<4x256xf32>,
    %28 = vector.extract_strided_slice %6 {offsets = [0, 2, 1], sizes = [4, 16, 16], strides = [1, 1, 1]} : vector<4x18x18xf32> to vector<4x16x16xf32>
    %29 = vector.shape_cast %28 : vector<4x16x16xf32> to vector<4x256xf32>
    %c56 = arith.constant 56 : index
    %c0_10 = arith.constant 0 : index
    %30 = vector.load %arg7[%c56, %c0_10] : memref<72x256xf32, #tpu.memory_space<vmem>>, vector<4x256xf32>
    tpu.vector_store %arg7[%c56, %c0_10], %29 {strides = array<i32>} : memref<72x256xf32, #tpu.memory_space<vmem>>, vector<4x256xf32>,
    %31 = vector.extract_strided_slice %6 {offsets = [0, 2, 2], sizes = [4, 16, 16], strides = [1, 1, 1]} : vector<4x18x18xf32> to vector<4x16x16xf32>
    %32 = vector.shape_cast %31 : vector<4x16x16xf32> to vector<4x256xf32>
    %c64 = arith.constant 64 : index
    %c0_11 = arith.constant 0 : index
    %33 = vector.load %arg7[%c64, %c0_11] : memref<72x256xf32, #tpu.memory_space<vmem>>, vector<4x256xf32>
    tpu.vector_store %arg7[%c64, %c0_11], %32 {strides = array<i32>} : memref<72x256xf32, #tpu.memory_space<vmem>>, vector<4x256xf32>,
    %c0_12 = arith.constant 0 : index
    %c0_13 = arith.constant 0 : index
    %34 = vector.load %arg3[%c0_12, %c0_13] : memref<8x72xf32, #tpu.memory_space<vmem>>, vector<8x72xf32>
    %c0_14 = arith.constant 0 : index
    %c0_15 = arith.constant 0 : index
    %35 = vector.load %arg7[%c0_14, %c0_15] : memref<72x256xf32, #tpu.memory_space<vmem>>, vector<72x256xf32>
    %cst = arith.constant dense<0.000000e+00> : vector<8x256xf32>
    %36 = tpu.matmul %34, %35, %cst {dimension_numbers = #tpu.dot_dimension_numbers<[1], [0], [0], [1], [0, 0, 1, 1], [], []>} : vector<8x72xf32>, vector<72x256xf32>, vector<8x256xf32> -> vector<8x256xf32>
    %c0_16 = arith.constant 0 : index
    %c0_17 = arith.constant 0 : index
    %37 = vector.load %arg4[%c0_16, %c0_17] : memref<8x1xf32, #tpu.memory_space<vmem>>, vector<8x1xf32>
    %38 = vector.broadcast %37 : vector<8x1xf32> to vector<8x256xf32>
    %39 = arith.addf %36, %38 : vector<8x256xf32>
    %cst_18 = arith.constant 0.000000e+00 : f32
    %40 = vector.broadcast %cst_18 : f32 to vector<8x256xf32>
    %41 = arith.maximumf %39, %40 : vector<8x256xf32>
    %c0_19 = arith.constant 0 : index
    %c0_20 = arith.constant 0 : index
    %c0_21 = arith.constant 0 : index
    %42 = vector.load %arg5[%c0_19, %c0_20, %c0_21] : memref<1x8x256xf32, #tpu.memory_space<vmem>>, vector<1x8x256xf32>
    %43 = vector.shape_cast %42 : vector<1x8x256xf32> to vector<8x256xf32>
    %44 = vector.shape_cast %41 : vector<8x256xf32> to vector<1x8x256xf32>
    tpu.vector_store %arg5[%c0_19, %c0_20, %c0_21], %44 {strides = array<i32>} : memref<1x8x256xf32, #tpu.memory_space<vmem>>, vector<1x8x256xf32>,
    return
  }
  func.func @transform_0(%arg0: i32, %arg1: i32) -> (i32, i32, i32, i32) {
    %c0_i32 = arith.constant 0 : i32
    %c0_i32_0 = arith.constant 0 : i32
    %c0_i32_1 = arith.constant 0 : i32
    %c0_i32_2 = arith.constant 0 : i32
    return %arg0, %c0_i32, %c0_i32_0, %c0_i32_1 : i32, i32, i32, i32
  }
  func.func @transform_1(%arg0: i32, %arg1: i32) -> (i32, i32) {
    %c0_i32 = arith.constant 0 : i32
    %c0_i32_0 = arith.constant 0 : i32
    %c0_i32_1 = arith.constant 0 : i32
    return %c0_i32, %c0_i32_0 : i32, i32
  }
  func.func @transform_2(%arg0: i32, %arg1: i32) -> (i32, i32) {
    %c0_i32 = arith.constant 0 : i32
    %c0_i32_0 = arith.constant 0 : i32
    %c0_i32_1 = arith.constant 0 : i32
    return %c0_i32, %c0_i32_0 : i32, i32
  }
  func.func @transform_3(%arg0: i32, %arg1: i32) -> (i32, i32, i32) {
    %c0_i32 = arith.constant 0 : i32
    %c0_i32_0 = arith.constant 0 : i32
    return %arg0, %c0_i32, %arg1 : i32, i32, i32
  }
}

</mosaic_0001>

<bundles_post_ra>
// kernel: tpu_custom_call.1
= control target key start
LH: loop header
LB: loop body
LE: loop exit
PB: predicated region body
PF: predicated region fallthrough
CT: control target
= control target key end

     0   :  { %8 = vsyncpa [#allocation6], 0  ;;  %s4098_s0 = inlined_call_operand.hbm [shape: f32[2,4,16,16], index: 0, kind: input, shape index: {}]   ;;  %s4099_s1 = inlined_call_operand.vmem [shape: f32[8,72], index: 1, kind: input, shape index: {}]   ;;  %s4100_s2 = inlined_call_operand.vmem [shape: f32[8,1], index: 2, kind: input, shape index: {}]   ;;  %s4101_s3 = inlined_call_operand.hbm [shape: f32[2,8,256], index: 3, kind: output, shape index: {}]  }
   0x1   :  { %10 = vsyncpa [#allocation6 + $0x1], 0 }
   0x2   :  { %11 = vsyncpa [#allocation7], 0 }
   0x3   :  { %13 = vsyncpa [#allocation7 + $0x1], 0  ;;  %s2637_s12 = smov 0   ;;  %s2639_s13 = smov 0  }
   0x4   :  { %s2641_s14 = smov 0   ;;  %s2643_s15 = smov 0  }
   0x5   :  { %s2645_s16 = smov 0   ;;  %s2647_s17 = smov 0  }
   0x6 LB: > { %s2387_s18 = sadd.s32 4294967295, %s2599_s17   ;;  %s2388_s19 = sadd.s32 4294967294, %s2599_s17   ;;  %s2599_s17 = sphi %s2647_s17, %s19_s17   ;;  %s2595_s16 = sphi %s2645_s16, %s4110_s16   ;;  %s2591_s15 = sphi %s2643_s15, %s4109_s15   ;;  %s2587_s14 = sphi %s2641_s14, %s4108_s14   ;;  %s2583_s13 = sphi %s2639_s13, %s4107_s13   ;;  %s2579_s12 = sphi %s2637_s12, %s4106_s12  }
   0x7   : > { %s31_s20 = sadd.s32 1, %s2595_s16  ;;  %s38_s21 = sadd.s32 1, %s2587_s14 }
   0x8   : > { %p33_p0 = scmp.ge.s32.totalorder %s31_s20, 2  ;;  %p45_p1 = scmp.ne.s32.totalorder %s2587_s14, %s2583_s13 }
   0x9   : > { %p46_p2 = scmp.eq.s32.totalorder %s2599_s17, 0  ;;  %p51_p3 = scmp.ne.s32.totalorder %s2583_s13, %s2579_s12 }
   0xa   : > { %s4112_s20 = smov (%p33_p0, %s31_s20), 0  ;;  %p52_p5 = scmp.eq.s32.totalorder %s2387_s18, 0 }
   0xb   : > { %p2678_p4 = por %p46_p2, %p45_p1  ;;  %s35_s23 = ssub.s32 %s2595_s16, %s4112_s20 }
   0xc   : > { %p119_p6 = scmp.eq.s32.totalorder %s2387_s18, 1  ;;  %p36_p7 = scmp.eq.s32.totalorder %s35_s23, 0 }
   0xd   : > { %p2684_p8 = por %p52_p5, %p51_p3  ;;  %p125_p10 = scmp.eq.s32.totalorder %s2388_s19, 1 }
   0xe   : > { %p2688_p9 = por %p119_p6, %p45_p1  ;;  %p2390_p12 = scmp.ge.s32.totalorder %s2599_s17, 2 }
   0xf   : > { %s2693_s26 = scalar_select %p36_p7, %s2587_s14, %s38_s21  }
  0x10   : > { %p2695_p11 = por %p125_p10, %p51_p3  ;;  %p2419_p13 = scmp.lt.s32.totalorder %s2599_s17, 2 }
  0x11   : > { %s151_s28 = sand.u32 1, %s2587_s14   ;;  %s2405_s30 = sshll.u32 %s2595_s16, 6 }
  0x12   : > { %s2391_s29 = sshll.u32 %s151_s28, 6  ;;  %s160_s6 = scalar_lea.hbm %s4098_s0, %s2405_s30 }
  0x13   : > { %s155_s7 = scalar_lea.vmem [#allocation5], %s2391_s29  ;;  %s161_s9 = sshll.u32 %s160_s6, 4  ;;  %s162_s9 = int_to_ptr.hbm [resolvable:$true] %s161_s9 }
  0x14   : > { %s163_s8 = sshll.u32 %s155_s7, 4  ;;  %p2412_p0 = pnand %p2419_p13, %p2678_p4  ;;  %s164_s8 = int_to_ptr.vmem [resolvable:$true] %s163_s8 }
  0x15   : > { %p2394_p1 = scmp.ge.s32.totalorder %s2599_s17, 1  ;;  %s152_s10 = scalar_lea.sflag [#allocation6], %s151_s28 }
  0x16   : > { %s2601_s11 = smov 128   ;;  %s2602_s18 = smov 8  }
  0x17   : > { %2414 = dma.hbm_to_vmem [thread:$0]  (!%p2412_p0), %s162_s9, 1024, %s164_s8, %s152_s10, %s2601_s11, %s2601_s11, %s2602_s18  }
  0x18   : > { %p171_p2 = scmp.lt.s32.totalorder %s2599_s17, 3 }
  0x1a   : > { %p172_p3 = pnand %p2394_p1, %p171_p2 }
  0x1b   : > { %s2711_s19 = sand.u32 (!%p172_p3), 1, %s2583_s13  }
  0x1c   : > { %175 = sbr.rel (%p172_p3) target bundleno = 1014 (0x3f6), region = 32  ;;  %s2395_s21 = sshll.u32 (!%p172_p3), %s2711_s19, 6 }
  0x1d   : > { %s178_s23 = scalar_lea.sflag (!%p172_p3), [#allocation6], %s2711_s19  ;;  %s2715_s29 = scalar_lea.vmem (!%p172_p3), [#allocation5], %s2395_s21 }
  0x21   : > { %2570 = dma.done.wait (%p2684_p8), %s178_s23, 1024  }
  0x22   : > { %2572 = vsyncadd (%p2684_p8), %s178_s23, 4294966272  ;;  %vm210_vm0 = vcmask 139264   ;;  %vm219_vm1 = vcmask 7168   ;;  %vm233_vm2 = vcmask 146568   ;;  %v2603_v0 = vmov 0.0   ;;  %v267_v1 = vld [vmem:[%s2715_s29 + $0x10] sm:$0xff] }
  0x23   : > { %213 = vst.msk [vmem:[#allocation2 + $0x30] sm:$0x1] %vm210_vm0, %v2603_v0  ;;  %v265_v2 = vld [vmem:[%s2715_s29] sm:$0xff]  ;;  %s2604_s22 = smov 1   ;;  %v268_v4 = vld [vmem:[%s2715_s29 + $0x18] sm:$0xff]  ;;  %v266_v5 = vld [vmem:[%s2715_s29 + $0x8] sm:$0xff] }
  0x24   : > { %227 = vst.msk [vmem:[#allocation2 + $0x30] sm:$0xff] %vm219_vm1, %v2603_v0  ;;  %285 = vrot.lane.b32.xlu1 %v267_v1, %s2604_s22  ;;  %281 = vrot.lane.b32.xlu0 %v265_v2, %s2604_s22  ;;  %v269_v3 = vld [vmem:[%s2715_s29 + $0x20] sm:$0xff]  ;;  %v270_v6 = vld [vmem:[%s2715_s29 + $0x28] sm:$0xff]  ;;  %vm222_vm3 = vcmask 1024   ;;  %vm236_vm4 = vcmask 140424   ;;  %vm305_vm5 = vcmask 138248  }
  0x25   : > { %228 = vst.msk [vmem:[#allocation2 + $0x38] sm:$0xff] %vm219_vm1, %v2603_v0  ;;  %289 = vrot.lane.b32.xlu2 %v269_v3, %s2604_s22  ;;  %v272_v7 = vld [vmem:[%s2715_s29 + $0x38] sm:$0xff]  ;;  %v271_v8 = vld [vmem:[%s2715_s29 + $0x30] sm:$0xff]  ;;  %s2605_s24 = smov 127   ;;  %vm1577_vm6 = vcmask 1045504   ;;  %s2606_s28 = smov 126  }
  0x26   : > { %241 = vst.msk [vmem:[#allocation2 + $0x30] sm:$0xff] %vm233_vm2, %v2603_v0  ;;  %v2607_v31 = vmov 1983009808   ;;  %vm329_vm7 = vcmask 1047556   ;;  %vm948_vm8 = vcmask 1046528   ;;  %s2609_s30 = smov 32  }
  0x27   : > { %242 = vst.msk [vmem:[#allocation2 + $0x38] sm:$0xff] %vm233_vm2, %v2603_v0  ;;  %v334_v32 = vunpack.c.l.s4 %v2607_v31  ;;  %v2608_v47 = vmov 1934713408   ;;  %s2610_s4 = smov 96   ;;  %s2611_s5 = smov 64   ;;  %vm497_vm9 = vcmask 130048  }
  0x28   : > { %211 = vst.msk [vmem:[#allocation2] sm:$0x1] %vm210_vm0, %v2603_v0  ;;  %v358_v48 = vunpack.c.l.s4 %v2608_v47  ;;  %s2612_s6 = smov 80   ;;  %s2613_s7 = smov 48   ;;  %vm499_vm10 = vcmask 261120   ;;  %vm501_vm11 = vcmask 392192  }
  0x29   : > { %212 = vst.msk [vmem:[#allocation2 + $0x18] sm:$0x1] %vm210_vm0, %v2603_v0  ;;  %v2869_v37 = vunpack.c.0.s8 %v334_v32  ;;  %s2614_s8 = smov 16   ;;  %s2615_s9 = smov 112   ;;  %vm503_vm12 = vcmask 523264   ;;  %vm505_vm13 = vcmask 654336  }
  0x2a   : > { %214 = vst.msk [vmem:[#allocation2 + $0x48] sm:$0x1] %vm210_vm0, %v2603_v0  ;;  %vm507_vm14 = vcmask 785408   ;;  %vm509_vm15 = vcmask 916480   ;;  %s2396_s23 = sshll.u32 %s2711_s19, 4  ;;  %s2406_s29 = sshll.u32 %s2591_s15, 4 }
  0x2b   : > { %215 = vst.msk [vmem:[#allocation2 + $0x11] sm:$0x1] %vm210_vm0, %v2603_v0  ;;  %s2537_s10 = scalar_lea.hbm %s4101_s3, 32 }
  0x2c   : > { %216 = vst.msk [vmem:[#allocation2 + $0x29] sm:$0x1] %vm210_vm0, %v2603_v0  ;;  %287 = vrot.lane.b32.xlu1 %v268_v4, %s2604_s22  ;;  %283 = vrot.lane.b32.xlu0 %v266_v5, %s2604_s22 }
  0x2d   : > { %217 = vst.msk [vmem:[#allocation2 + $0x41] sm:$0x1] %vm210_vm0, %v2603_v0  ;;  %291 = vrot.lane.b32.xlu2 %v270_v6, %s2604_s22 }
  0x2e   : > { %218 = vst.msk [vmem:[#allocation2 + $0x59] sm:$0x1] %vm210_vm0, %v2603_v0  ;;  %vm2231_vm0 = vcmask 588800  }
  0x2f   : > { %221 = vst.msk [vmem:[#allocation2 + $0x8] sm:$0xff] %vm219_vm1, %v2603_v0 }
  0x30   : > { %225 = vst.msk [vmem:[#allocation2 + $0x20] sm:$0xff] %vm219_vm1, %v2603_v0 }
  0x31   : > { %231 = vst.msk [vmem:[#allocation2 + $0x50] sm:$0xff] %vm219_vm1, %v2603_v0 }
  0x32   : > { %247 = vst [vmem:[#allocation3] sm:$0xf0] %v2603_v0 }
  0x33   : > { %248 = vst [vmem:[#allocation3 + $0x38] sm:$0xf0] %v2603_v0 }
  0x34   : > { %249 = vst [vmem:[#allocation3 + $0x78] sm:$0xf0] %v2603_v0  ;;  %295 = vrot.lane.b32.xlu1 %v272_v7, %s2604_s22  ;;  %293 = vrot.lane.b32.xlu0 %v271_v8, %s2604_s22 }
  0x35   : > { %250 = vst [vmem:[#allocation3 + $0x58] sm:$0xf0] %v2603_v0 }
  0x36   : > { %251 = vst [vmem:[#allocation3 + $0x20] sm:$0xf0] %v2603_v0 }
  0x37   : > { %252 = vst [vmem:[#allocation3 + $0x8] sm:$0xf0] %v2603_v0 }
  0x38   : > { %253 = vst [vmem:[#allocation3 + $0x70] sm:$0xf0] %v2603_v0 }
  0x39   : > { %254 = vst [vmem:[#allocation3 + $0x80] sm:$0xf0] %v2603_v0 }
  0x3a   : > { %255 = vst [vmem:[#allocation3 + $0x88] sm:$0xf0] %v2603_v0 }
  0x3b   : > { %256 = vst [vmem:[#allocation3 + $0x40] sm:$0xf0] %v2603_v0 }
  0x3c   : > { %257 = vst [vmem:[#allocation3 + $0x50] sm:$0xf0] %v2603_v0 }
  0x3d   : > { %258 = vst [vmem:[#allocation3 + $0x28] sm:$0xf0] %v2603_v0 }
  0x3e   : > { %259 = vst [vmem:[#allocation3 + $0x10] sm:$0xf0] %v2603_v0 }
  0x3f   : > { %260 = vst [vmem:[#allocation3 + $0x48] sm:$0xf0] %v2603_v0 }
  0x40   : > { %261 = vst [vmem:[#allocation3 + $0x30] sm:$0xf0] %v2603_v0 }
  0x41   : > { %262 = vst [vmem:[#allocation3 + $0x18] sm:$0xf0] %v2603_v0 }
  0x42   : > { %263 = vst [vmem:[#allocation3 + $0x68] sm:$0xf0] %v2603_v0 }
  0x43   : > { %264 = vst [vmem:[#allocation3 + $0x60] sm:$0xf0] %v2603_v0 }
  0x44   : > { %220 = vst.msk [vmem:[#allocation2] sm:$0xff] %vm219_vm1, %v2603_v0 }
  0x45   : > { %224 = vst.msk [vmem:[#allocation2 + $0x18] sm:$0xff] %vm219_vm1, %v2603_v0 }
  0x46   : > { %230 = vst.msk [vmem:[#allocation2 + $0x48] sm:$0xff] %vm219_vm1, %v2603_v0 }
  0x47   : > { %235 = vst.msk [vmem:[#allocation2 + $0x8] sm:$0xff] %vm233_vm2, %v2603_v0 }
  0x48   : > { %239 = vst.msk [vmem:[#allocation2 + $0x20] sm:$0xff] %vm233_vm2, %v2603_v0 }
  0x49   : > { %245 = vst.msk [vmem:[#allocation2 + $0x50] sm:$0xff] %vm233_vm2, %v2603_v0 }
  0x4a   : > { %238 = vst.msk [vmem:[#allocation2 + $0x18] sm:$0xff] %vm233_vm2, %v2603_v0 }
  0x4b   : > { %234 = vst.msk [vmem:[#allocation2] sm:$0xff] %vm233_vm2, %v2603_v0 }
  0x4c   : > { %244 = vst.msk [vmem:[#allocation2 + $0x48] sm:$0xff] %vm233_vm2, %v2603_v0 }
  0x4d   : > { %229 = vst.msk [vmem:[#allocation2 + $0x40] sm:$0x3] %vm222_vm3, %v2603_v0 }
  0x4e   : > { %243 = vst.msk [vmem:[#allocation2 + $0x40] sm:$0x3] %vm236_vm4, %v2603_v0 }
  0x4f   : > { %223 = vst.msk [vmem:[#allocation2 + $0x10] sm:$0x3] %vm222_vm3, %v2603_v0 }
  0x50   : > { %226 = vst.msk [vmem:[#allocation2 + $0x28] sm:$0x3] %vm222_vm3, %v2603_v0 }
  0x51   : > { %232 = vst.msk [vmem:[#allocation2 + $0x58] sm:$0x3] %vm222_vm3, %v2603_v0 }
  0x52   : > { %237 = vst.msk [vmem:[#allocation2 + $0x10] sm:$0x3] %vm236_vm4, %v2603_v0 }
  0x53   : > { %240 = vst.msk [vmem:[#allocation2 + $0x28] sm:$0x3] %vm236_vm4, %v2603_v0 }
  0x54   : > { %246 = vst.msk [vmem:[#allocation2 + $0x58] sm:$0x3] %vm236_vm4, %v2603_v0 }
  0x7f   : > { %v290_v9 = vpop.permute.xlu2 %289 }
  0x80   : > { %310 = vst.msk [vmem:[#allocation2 + $0x31] sm:$0xff] %vm305_vm5, %v290_v9 }
  0x87   : > { %v292_v10 = vpop.permute.xlu2 %291  ;;  %v2807_v13 = vld [vmem:[#allocation2 + $0x30] sm:$0xff] }
  0x88   : > { %311 = vst.msk [vmem:[#allocation2 + $0x39] sm:$0xff] %vm305_vm5, %v292_v10  ;;  %v1588_v20 = vrot.slane %v2807_v13, 2  ;;  %v328_v33 = vrot.slane %v2807_v13, 4  ;;  %v2936_v10 = vunpack.c.0.s8 %v358_v48 }
  0x8f   : > { %v2809_v14 = vld [vmem:[#allocation2 + $0x38] sm:$0xff]  ;;  %v2813_v18 = vld [vmem:[#allocation2 + $0x40] sm:$0x3] }
  0x90   : > { %v1589_v21 = vrot.slane %v2809_v14, 2  ;;  %v1591_v22 = vrot.slane %v2813_v18, 2  ;;  %v385_v55 = vrot.slane %v2809_v14, 4 }
  0x92   : > { %v2827_v23 = vsel %vm1577_vm6, %v1588_v20, %v1589_v21  ;;  %v2830_v24 = vsel %vm1577_vm6, %v1589_v21, %v1591_v22 }
  0x96   : > { %v286_v11 = vpop.permute.xlu1 %285  ;;  %v282_v12 = vpop.permute.xlu0 %281 }
  0x97   : > { %308 = vst.msk [vmem:[#allocation2 + $0x19] sm:$0xff] %vm305_vm5, %v286_v11 }
  0x98   : > { %306 = vst.msk [vmem:[#allocation2 + $0x1] sm:$0xff] %vm305_vm5, %v282_v12 }
  0x9e   : > { %v288_v15 = vpop.permute.xlu1 %287  ;;  %v284_v16 = vpop.permute.xlu0 %283  ;;  %v2811_v17 = vld [vmem:[#allocation2 + $0x18] sm:$0xff] }
  0x9f   : > { %309 = vst.msk [vmem:[#allocation2 + $0x21] sm:$0xff] %vm305_vm5, %v288_v15  ;;  %532 = vrot.lane.b32.xlu0 %v2811_v17, %s2605_s24  ;;  %v2818_v19 = vld [vmem:[#allocation2] sm:$0xff]  ;;  %v343_v38 = vrot.slane %v2811_v17, 4  ;;  %v954_v46 = vrot.slane %v2811_v17, 1  ;;  %v1583_v61 = vrot.slane %v2811_v17, 2 }
  0xa0   : > { %307 = vst.msk [vmem:[#allocation2 + $0x9] sm:$0xff] %vm305_vm5, %v284_v16  ;;  %528 = vrot.lane.b32.xlu1 %v2818_v19, %s2605_s24  ;;  %v331_v34 = vrot.slane %v2818_v19, 4  ;;  %v330_v39 = vsel %vm329_vm7, %v328_v33, %v2818_v19  ;;  %v949_v48 = vrot.slane %v2818_v19, 1 }
  0xa1   : > { %v2888_v51 = vperm.slane %v330_v39, %v2869_v37 }
  0xa2   : > { %v332_v44 = vsel %vm329_vm7, %v2807_v13, %v331_v34 }
  0xa3   : > { %v340_v54 = vperm.slane %v332_v44, %v2869_v37  ;;  %v355_v2 = vrot.slane %v2888_v51, 4 }
  0xa5   : > { %v367_v6 = vrot.slane %v340_v54, 4 }
  0xa6   : > { %v296_v25 = vpop.permute.xlu1 %295  ;;  %v294_v26 = vpop.permute.xlu0 %293  ;;  %v2832_v27 = vld [vmem:[#allocation2 + $0x20] sm:$0xff]  ;;  %v2874_v40 = vld [vmem:[#allocation2 + $0x28] sm:$0x3] }
  0xa7   : > { %313 = vst.msk [vmem:[#allocation2 + $0x51] sm:$0xff] %vm305_vm5, %v296_v25  ;;  %538 = vrot.lane.b32.xlu0 %v2809_v14, %s2605_s24  ;;  %v2837_v28 = vld [vmem:[#allocation2 + $0x8] sm:$0xff]  ;;  %v318_v35 = vld [vmem:[#allocation2 + $0x10] sm:$0x3]  ;;  %v955_v43 = vrot.slane %v2832_v27, 1  ;;  %v1584_v52 = vrot.slane %v2832_v27, 2 }
  0xa8   : > { %312 = vst.msk [vmem:[#allocation2 + $0x49] sm:$0xff] %vm305_vm5, %v294_v26  ;;  %530 = vrot.lane.b32.xlu2 %v2837_v28, %s2605_s24  ;;  %534 = vrot.lane.b32.xlu1 %v2832_v27, %s2605_s24  ;;  %v950_v41 = vrot.slane %v2837_v28, 1  ;;  %v952_v42 = vrot.slane %v318_v35, 1  ;;  %v1586_v53 = vrot.slane %v2874_v40, 2  ;;  %v399_v56 = vrot.slane %v2832_v27, 4 }
  0xa9   : > { %v2904_v59 = vsel %vm948_vm8, %v954_v46, %v955_v43  ;;  %v2927_v5 = vsel %vm1577_vm6, %v1583_v61, %v1584_v52  ;;  %v387_v7 = vrot.slane %v2837_v28, 4  ;;  %v386_v12 = vsel %vm329_vm7, %v385_v55, %v2837_v28 }
  0xaa   : > { %v2899_v58 = vsel %vm948_vm8, %v950_v41, %v952_v42  ;;  %v2924_v4 = vsel %vm1577_vm6, %v1584_v52, %v1586_v53  ;;  %v1579_v20 = vrot.slane %v2837_v28, 2  ;;  %v1581_v21 = vrot.slane %v318_v35, 2 }
  0xab   : > { %v392_v26 = vperm.slane %v386_v12, %v2869_v37  ;;  %v388_v31 = vsel %vm329_vm7, %v2809_v14, %v387_v7  ;;  %v2980_v53 = vsel %vm948_vm8, %v949_v48, %v950_v41  ;;  %v991_v12 = vrot.slane %v2904_v59, 4 }
  0xac   : > { %v396_v39 = vperm.slane %v388_v31, %v2869_v37 }
  0xad   : > { %v411_v42 = vrot.slane %v392_v26, 4 }
  0xae   : > { %v2880_v45 = vld [vmem:[#allocation2 + $0x58] sm:$0x3] }
  0xaf   : > { %738 = vrot.lane.b32.xlu0 %v2837_v28, %s2606_s28  ;;  %v2846_v29 = vld [vmem:[#allocation2 + $0x48] sm:$0xff]  ;;  %v2854_v30 = vld [vmem:[#allocation2 + $0x50] sm:$0xff]  ;;  %v1596_v57 = vrot.slane %v2880_v45, 2 }
  0xb0   : > { %536 = vrot.lane.b32.xlu2 %v2807_v13, %s2605_s24  ;;  %540 = vrot.lane.b32.xlu1 %v2846_v29, %s2605_s24  ;;  %v341_v36 = vrot.slane %v2846_v29, 4  ;;  %v344_v50 = vsel %vm329_vm7, %v2846_v29, %v343_v38  ;;  %v400_v63 = vsel %vm329_vm7, %v2854_v30, %v399_v56  ;;  %v1593_v0 = vrot.slane %v2846_v29, 2 }
  0xb1   : > { %v352_v62 = vperm.slane %v344_v50, %v2869_v37  ;;  %v1594_v1 = vrot.slane %v2854_v30, 2  ;;  %v397_v3 = vrot.slane %v2854_v30, 4  ;;  %v408_v15 = vperm.slane %v400_v63, %v2869_v37 }
  0xb2   : > { %v342_v49 = vsel %vm329_vm7, %v341_v36, %v2811_v17  ;;  %v2959_v36 = vsel %vm1577_vm6, %v1579_v20, %v1581_v21  ;;  %v964_v56 = vrot.slane %v2846_v29, 1  ;;  %v965_v28 = vrot.slane %v2854_v30, 1 }
  0xb3   : > { %v2907_v60 = vperm.slane %v342_v49, %v2869_v37  ;;  %v2931_v8 = vsel %vm1577_vm6, %v1593_v0, %v1594_v1  ;;  %v2934_v9 = vsel %vm1577_vm6, %v1594_v1, %v1596_v57  ;;  %v368_v16 = vsel %vm329_vm7, %v352_v62, %v367_v6 }
  0xb4   : > { %v398_v22 = vsel %vm329_vm7, %v397_v3, %v2832_v27  ;;  %v2956_v33 = vperm.slane %v368_v16, %v2936_v10  ;;  %v421_v34 = vrot.slane %v408_v15, 4  ;;  %v365_v38 = vrot.slane %v352_v62, 4 }
  0xb5   : > { %v356_v11 = vsel %vm329_vm7, %v2907_v60, %v355_v2  ;;  %v404_v35 = vperm.slane %v398_v22, %v2869_v37  ;;  %v957_v57 = vrot.slane %v2874_v40, 1  ;;  %v2994_v63 = vsel %vm948_vm8, %v964_v56, %v965_v28 }
  0xb6   : > { %v364_v25 = vperm.slane %v356_v11, %v2936_v10  ;;  %v422_v44 = vsel %vm329_vm7, %v421_v34, %v396_v39  ;;  %v366_v47 = vsel %vm329_vm7, %v365_v38, %v340_v54  ;;  %v959_v54 = vrot.slane %v2807_v13, 1 }
  0xb7   : > { %744 = vrot.lane.b32.xlu0 %v2807_v13, %s2606_s28  ;;  %v412_v46 = vsel %vm329_vm7, %v404_v35, %v411_v42  ;;  %v428_v49 = vperm.slane %v422_v44, %v2936_v10  ;;  %v372_v52 = vperm.slane %v366_v47, %v2936_v10  ;;  %v409_v55 = vrot.slane %v404_v35, 4 }
  0xb8   : > { %542 = vrot.lane.b32.xlu2 %v2854_v30, %s2605_s24  ;;  %740 = vrot.lane.b32.xlu1 %v2811_v17, %s2606_s28  ;;  %v1578_v17 = vrot.slane %v2818_v19, 2  ;;  %v2974_v50 = vperm.slane %v412_v46, %v2936_v10  ;;  %v379_v61 = vrot.slane %v364_v25, 4  ;;  %v989_v40 = vrot.slane %v2994_v63, 4 }
  0xb9   : > { %v381_v41 = vrot.slane %v372_v52, 4  ;;  %v410_v62 = vsel %vm329_vm7, %v409_v55, %v392_v26  ;;  %v423_v2 = vrot.slane %v396_v39, 4  ;;  %v437_v6 = vrot.slane %v428_v49, 4 }
  0xba   : > { %v2953_v32 = vsel %vm1577_vm6, %v1578_v17, %v1579_v20  ;;  %v3001_v13 = vperm.slane %v410_v62, %v2936_v10  ;;  %v990_v11 = vsel %vm329_vm7, %v989_v40, %v2904_v59  ;;  %v992_v22 = vsel %vm329_vm7, %v2994_v63, %v991_v12 }
  0xbb   : > { %v424_v7 = vsel %vm329_vm7, %v408_v15, %v423_v2  ;;  %v996_v15 = vperm.slane %v990_v11, %v2869_v37  ;;  %v353_v31 = vrot.slane %v2907_v60, 4  ;;  %v962_v34 = vrot.slane %v2813_v18, 1 }
  0xbc   : > { %v433_v3 = vrot.slane %v3001_v13, 4  ;;  %v432_v21 = vperm.slane %v424_v7, %v2936_v10  ;;  %v979_v35 = vrot.slane %v2980_v53, 4  ;;  %v1035_v39 = vrot.slane %v2899_v58, 4 }
  0xbd   : > { %v1000_v44 = vperm.slane %v992_v22, %v2869_v37  ;;  %v354_v48 = vsel %vm329_vm7, %v353_v31, %v2888_v51 }
  0xbe   : > { %v434_v20 = vsel %vm329_vm7, 0.0, %v433_v3  ;;  %v439_v42 = vrot.slane %v432_v21, 4 }
  0xbf   : > { %750 = vrot.lane.b32.xlu0 %v2854_v30, %s2606_s28  ;;  %v380_v30 = vsel %vm329_vm7, 0.0, %v379_v61 }
  0xc0   : > { %736 = vrot.lane.b32.xlu2 %v2818_v19, %s2606_s28  ;;  %746 = vrot.lane.b32.xlu1 %v2809_v14, %s2606_s28  ;;  %v960_v19 = vrot.slane %v2809_v14, 1  ;;  %v382_v14 = vsel %vm329_vm7, 0.0, %v381_v41 }
  0xc2   : > { %v2997_v0 = vsel %vm948_vm8, %v959_v54, %v960_v19  ;;  %v1013_v54 = vrot.slane %v1000_v44, 4 }
  0xc3   : > { %v977_v1 = vrot.slane %v2997_v0, 4  ;;  %v980_v60 = vsel %vm329_vm7, %v2997_v0, %v979_v35 }
  0xc7   : > { %1163 = vrot.lane.b32.xlu0 %v2899_v58, %s2605_s24 }
  0xc8   : > { %742 = vrot.lane.b32.xlu2 %v2832_v27, %s2606_s28  ;;  %1165 = vrot.lane.b32.xlu1 %v2904_v59, %s2605_s24  ;;  %v967_v27 = vrot.slane %v2880_v45, 1 }
  0xca   : > { %v3025_v17 = vsel %vm948_vm8, %v965_v28, %v967_v27  ;;  %v988_v28 = vperm.slane %v980_v60, %v2869_v37 }
  0xcb   : > { %v1045_v18 = vrot.slane %v3025_v17, 4 }
  0xcc   : > { %v1014_v61 = vsel %vm329_vm7, %v1013_v54, %v988_v28 }
  0xcf   : > { %446 = vrot.lane.b32.xlu0 %v364_v25, %s2609_s30  ;;  %v438_v25 = vsel %vm329_vm7, 0.0, %v437_v6 }
  0xd0   : > { %748 = vrot.lane.b32.xlu2 %v2846_v29, %s2606_s28  ;;  %462 = vrot.lane.b32.xlu1 %v2956_v33, %s2610_s4  ;;  %v3006_v29 = vsel %vm948_vm8, %v955_v43, %v957_v57  ;;  %v978_v43 = vsel %vm329_vm7, %v977_v1, %v2980_v53  ;;  %v1020_v1 = vperm.slane %v1014_v61, %v2936_v10 }
  0xd1   : > { %v984_v16 = vperm.slane %v978_v43, %v2869_v37  ;;  %v1047_v45 = vrot.slane %v3006_v29, 4  ;;  %v1046_v41 = vsel %vm329_vm7, %v1045_v18, %v3006_v29  ;;  %v1001_v43 = vrot.slane %v996_v15, 4 }
  0xd3   : > { %v1048_v26 = vsel %vm329_vm7, %v3025_v17, %v1047_v45  ;;  %v1003_v38 = vrot.slane %v984_v16, 4  ;;  %v1029_v45 = vrot.slane %v1020_v1, 4 }
  0xd4   : > { %v1056_v47 = vperm.slane %v1048_v26, %v2869_v37 }
  0xd5   : > { %v1004_v46 = vsel %vm329_vm7, %v996_v15, %v1003_v38  ;;  %v1030_v26 = vsel %vm329_vm7, 0.0, %v1029_v45 }
  0xd6   : > { %v3056_v55 = vperm.slane %v1004_v46, %v2936_v10  ;;  %v1069_v51 = vrot.slane %v1056_v47, 4 }
  0xd7   : > { %482 = vrot.lane.b32.xlu0 %v428_v49, %s2611_s5  ;;  %v3049_v49 = vsel %vm948_vm8, %v960_v19, %v962_v34  ;;  %v3062_v19 = vperm.slane %v354_v48, %v2936_v10 }
  0xd8   : > { %1161 = vrot.lane.b32.xlu2 %v2980_v53, %s2605_s24  ;;  %474 = vrot.lane.b32.xlu1 %v2974_v50, %s2609_s30  ;;  %v1036_v56 = vsel %vm329_vm7, %v3049_v49, %v1035_v39  ;;  %v1033_v40 = vrot.slane %v3049_v49, 4  ;;  %v435_v39 = vrot.slane %v2974_v50, 4 }
  0xd9   : > { %v1044_v57 = vperm.slane %v1036_v56, %v2869_v37 }
  0xda   : > { %v1034_v2 = vsel %vm329_vm7, %v1033_v40, %v2899_v58  ;;  %v436_v18 = vsel %vm329_vm7, 0.0, %v435_v39 }
  0xdb   : > { %v1070_v62 = vsel %vm329_vm7, %v1069_v51, %v1044_v57  ;;  %v1071_v7 = vrot.slane %v1044_v57, 4  ;;  %v1040_v11 = vperm.slane %v1034_v2, %v2869_v37  ;;  %v1027_v2 = vrot.slane %v3056_v55, 4 }
  0xdc   : > { %v3078_v27 = vperm.slane %v1070_v62, %v2936_v10 }
  0xdd   : > { %v1072_v12 = vsel %vm329_vm7, %v1056_v47, %v1071_v7  ;;  %v1059_v60 = vrot.slane %v1040_v11, 4  ;;  %v1028_v7 = vsel %vm329_vm7, 0.0, %v1027_v2 }
  0xde   : > { %v1080_v15 = vperm.slane %v1072_v12, %v2936_v10 }
  0xdf   : > { %458 = vrot.lane.b32.xlu0 %v382_v14, %s2612_s6  ;;  %v377_v14 = vrot.slane %v3062_v19, 4 }
  0xe0   : > { %1167 = vrot.lane.b32.xlu2 %v3006_v29, %s2605_s24  ;;  %450 = vrot.lane.b32.xlu1 %v380_v30, %s2613_s7  ;;  %v1052_v30 = vperm.slane %v1046_v41, %v2869_v37  ;;  %v1087_v61 = vrot.slane %v1080_v15, 4 }
  0xe1   : > { %v378_v3 = vsel %vm329_vm7, 0.0, %v377_v14 }
  0xe2   : > { %v1057_v6 = vrot.slane %v1052_v30, 4  ;;  %v1060_v50 = vsel %vm329_vm7, %v1052_v30, %v1059_v60  ;;  %v1088_v14 = vsel %vm329_vm7, 0.0, %v1087_v61 }
  0xe3   : > { %v1068_v56 = vperm.slane %v1060_v50, %v2936_v10 }
  0xe4   : > { %v1058_v22 = vsel %vm329_vm7, %v1057_v6, %v1040_v11 }
  0xe5   : > { %v3100_v34 = vperm.slane %v1058_v22, %v2936_v10  ;;  %v1083_v57 = vrot.slane %v1068_v56, 4 }
  0xe7   : > { %470 = vrot.lane.b32.xlu0 %v434_v20, %s2614_s8  ;;  %v383_v20 = vrot.slane %v2956_v33, 4  ;;  %v1015_v33 = vrot.slane %v988_v28, 4  ;;  %v1081_v38 = vrot.slane %v3100_v34, 4  ;;  %v1084_v62 = vsel %vm329_vm7, 0.0, %v1083_v57 }
  0xe8   : > { %454 = vrot.lane.b32.xlu2 %v372_v52, %s2611_s5  ;;  %486 = vrot.lane.b32.xlu1 %v438_v25, %s2612_s6  ;;  %v440_v52 = vsel %vm329_vm7, 0.0, %v439_v42 }
  0xe9   : > { %v384_v31 = vsel %vm329_vm7, 0.0, %v383_v20  ;;  %v1016_v42 = vsel %vm329_vm7, %v1000_v44, %v1015_v33  ;;  %v1082_v48 = vsel %vm329_vm7, 0.0, %v1081_v38 }
  0xea   : > { %v1024_v47 = vperm.slane %v1016_v42, %v2936_v10 }
  0xec   : > { %v1031_v54 = vrot.slane %v1024_v47, 4 }
  0xee   : > { %v1032_v44 = vsel %vm329_vm7, 0.0, %v1031_v54 }
  0xef   : > { %494 = vrot.lane.b32.xlu0 %v440_v52, %s2615_s9 }
  0xf0   : > { %490 = vrot.lane.b32.xlu2 %v432_v21, %s2610_s4  ;;  %1094 = vrot.lane.b32.xlu1 %v3056_v55, %s2609_s30  ;;  %v1002_v21 = vsel %vm329_vm7, %v1001_v43, %v984_v16 }
  0xf1   : > { %v3094_v25 = vperm.slane %v1002_v21, %v2936_v10 }
  0xf3   : > { %v1025_v35 = vrot.slane %v3094_v25, 4 }
  0xf5   : > { %v1026_v46 = vsel %vm329_vm7, 0.0, %v1025_v35 }
  0xf7   : > { %1102 = vrot.lane.b32.xlu0 %v1020_v1, %s2611_s5 }
  0xf8   : > { %1130 = vrot.lane.b32.xlu1 %v3078_v27, %s2611_s5  ;;  %442 = vrot.lane.b32.xlu2 %v378_v3, %s2614_s8 }
  0xff   : > { %1138 = vrot.lane.b32.xlu0 %v1080_v15, %s2610_s4 }
 0x100   : > { %1106 = vrot.lane.b32.xlu1 %v1030_v26, %s2612_s6  ;;  %466 = vrot.lane.b32.xlu2 %v384_v31, %s2615_s9  ;;  %v1085_v31 = vrot.slane %v3078_v27, 4 }
 0x102   : > { %v3104_v16 = vpop.permute.xlu2 %530  ;;  %v1086_v27 = vsel %vm329_vm7, 0.0, %v1085_v31 }
 0x103   : > { %v610_v35 = vrot.slane %v3104_v16, 4 }
 0x107   : > { %1090 = vrot.lane.b32.xlu0 %v1026_v46, %s2614_s8 }
 0x108   : > { %1118 = vrot.lane.b32.xlu1 %v1082_v48, %s2614_s8  ;;  %478 = vrot.lane.b32.xlu2 %v436_v18, %s2613_s7 }
 0x10a   : > { %v537_v52 = vpop.permute.xlu2 %536 }
 0x10b   : > { %v552_v43 = vrot.slane %v537_v52, 4 }
 0x10f   : > { %1114 = vrot.lane.b32.xlu0 %v1032_v44, %s2615_s9 }
 0x110   : > { %1171 = vrot.lane.b32.xlu1 %v3049_v49, %s2605_s24  ;;  %1110 = vrot.lane.b32.xlu2 %v1024_v47, %s2610_s4 }
 0x111   : > { %v533_v51 = vpop.permute.xlu0 %532 }
 0x112   : > { %v3124_v28 = vpop.permute.xlu2 %542  ;;  %v529_v41 = vpop.permute.xlu1 %528  ;;  %v566_v11 = vrot.slane %v533_v51, 4 }
 0x113   : > { %v553_v3 = vsel %vm329_vm7, %v552_v43, %v529_v41  ;;  %v554_v12 = vrot.slane %v529_v41, 4 }
 0x114   : > { %v3145_v20 = vperm.slane %v553_v3, %v2869_v37 }
 0x115   : > { %v555_v38 = vsel %vm329_vm7, %v537_v52, %v554_v12  ;;  %v620_v12 = vrot.slane %v3124_v28, 4 }
 0x116   : > { %v578_v42 = vrot.slane %v3145_v20, 4  ;;  %v563_v60 = vperm.slane %v555_v38, %v2869_v37 }
 0x117   : > { %1126 = vrot.lane.b32.xlu0 %v1084_v62, %s2613_s7 }
 0x118   : > { %1142 = vrot.lane.b32.xlu1 %v1088_v14, %s2615_s9  ;;  %1122 = vrot.lane.b32.xlu2 %v1068_v56, %s2609_s30 }
 0x119   : > { %v539_v30 = vpop.permute.xlu0 %538 }
 0x11a   : > { %v3131_v40 = vpop.permute.xlu2 %736  ;;  %v3133_v1 = vpop.permute.xlu1 %534  ;;  %v611_v18 = vsel %vm329_vm7, %v539_v30, %v610_v35  ;;  %v608_v62 = vrot.slane %v539_v30, 4 }
 0x11b   : > { %v622_v6 = vrot.slane %v3133_v1, 4  ;;  %v619_v44 = vperm.slane %v611_v18, %v2869_v37  ;;  %v762_v14 = vrot.slane %v3131_v40, 4 }
 0x11c   : > { %v609_v30 = vsel %vm329_vm7, %v608_v62, %v3104_v16 }
 0x11d   : > { %v623_v22 = vsel %vm329_vm7, %v3124_v28, %v622_v6  ;;  %v646_v3 = vrot.slane %v619_v44, 4 }
 0x11e   : > { %v631_v46 = vperm.slane %v623_v22, %v2869_v37 }
 0x11f   : > { %1169 = vrot.lane.b32.xlu0 %v2997_v0, %s2605_s24 }
 0x120   : > { %1098 = vrot.lane.b32.xlu2 %v1028_v7, %s2613_s7  ;;  %v644_v57 = vrot.slane %v631_v46, 4 }
 0x121   : > { %v3142_v45 = vpop.permute.xlu0 %738 }
 0x122   : > { %v3147_v55 = vpop.permute.xlu2 %742  ;;  %v541_v21 = vpop.permute.xlu1 %540  ;;  %v645_v7 = vsel %vm329_vm7, %v644_v57, %v619_v44 }
 0x123   : > { %v564_v15 = vrot.slane %v541_v21, 4  ;;  %v567_v26 = vsel %vm329_vm7, %v541_v21, %v566_v11  ;;  %v818_v21 = vrot.slane %v3142_v45, 4 }
 0x124   : > { %v575_v33 = vperm.slane %v567_v26, %v2869_v37  ;;  %v590_v26 = vrot.slane %v563_v60, 4 }
 0x125   : > { %v565_v39 = vsel %vm329_vm7, %v564_v15, %v533_v51  ;;  %v3197_v15 = vperm.slane %v645_v7, %v2936_v10 }
 0x126   : > { %v3160_v47 = vperm.slane %v565_v39, %v2869_v37  ;;  %v588_v48 = vrot.slane %v575_v33, 4  ;;  %v647_v39 = vsel %vm329_vm7, %v631_v46, %v646_v3  ;;  %v591_v18 = vsel %vm329_vm7, %v575_v33, %v590_v26 }
 0x127   : > { %1175 = vrot.lane.b32.xlu0 %v3025_v17, %s2605_s24 }
 0x128   : > { %1134 = vrot.lane.b32.xlu2 %v1086_v27, %s2612_s6  ;;  %v579_v52 = vsel %vm329_vm7, %v3160_v47, %v578_v42  ;;  %v589_v41 = vsel %vm329_vm7, %v588_v48, %v563_v60  ;;  %v615_v42 = vperm.slane %v609_v30, %v2869_v37  ;;  %v621_v60 = vsel %vm329_vm7, %v620_v12, %v3133_v1 }
 0x129   : > { %v745_v54 = vpop.permute.xlu0 %744  ;;  %v3171_v50 = vperm.slane %v579_v52, %v2936_v10  ;;  %v3183_v43 = vperm.slane %v589_v41, %v2936_v10  ;;  %v3211_v52 = vperm.slane %v647_v39, %v2936_v10  ;;  %v3215_v41 = vperm.slane %v591_v18, %v2936_v10 }
 0x12a   : > { %v3174_v56 = vpop.permute.xlu2 %748  ;;  %v741_v51 = vpop.permute.xlu1 %740  ;;  %v763_v11 = vsel %vm329_vm7, %v745_v54, %v762_v14  ;;  %v760_v27 = vrot.slane %v745_v54, 4  ;;  %v634_v1 = vrot.slane %v615_v42, 4  ;;  %v627_v62 = vperm.slane %v621_v60, %v2869_v37 }
 0x12b   : > { %v774_v61 = vrot.slane %v741_v51, 4  ;;  %669 = vrot.lane.b32.xlu1 %v3171_v50, %s2609_s30  ;;  %v771_v31 = vperm.slane %v763_v11, %v2869_v37 }
 0x12c   : > { %v761_v54 = vsel %vm329_vm7, %v760_v27, %v3131_v40 }
 0x12d   : > { %v775_v2 = vsel %vm329_vm7, %v3174_v56, %v774_v61  ;;  %v798_v44 = vrot.slane %v771_v31, 4  ;;  %v830_v61 = vrot.slane %v3147_v55, 4  ;;  %v3244_v26 = vperm.slane %v761_v54, %v2869_v37 }
 0x12e   : > { %v783_v6 = vperm.slane %v775_v2, %v2869_v37 }
 0x12f   : > { %677 = vrot.lane.b32.xlu0 %v3183_v43, %s2611_s5  ;;  %v786_v18 = vrot.slane %v3244_v26, 4 }
 0x130   : > { %1173 = vrot.lane.b32.xlu2 %v2994_v63, %s2605_s24  ;;  %v796_v16 = vrot.slane %v783_v6, 4 }
 0x131   : > { %v751_v22 = vpop.permute.xlu0 %750 }
 0x132   : > { %v747_v35 = vpop.permute.xlu1 %746  ;;  %v3200_v38 = vpop.permute.xlu2 %1161  ;;  %v797_v57 = vsel %vm329_vm7, %v796_v16, %v771_v31  ;;  %v828_v14 = vrot.slane %v751_v22, 4  ;;  %v831_v2 = vsel %vm329_vm7, %v751_v22, %v830_v61  ;;  %v635_v22 = vsel %vm329_vm7, %v627_v62, %v634_v1 }
 0x133   : > { %v816_v48 = vrot.slane %v747_v35, 4  ;;  %v819_v28 = vsel %vm329_vm7, %v747_v35, %v818_v21  ;;  %705 = vrot.lane.b32.xlu1 %v3197_v15, %s2611_s5  ;;  %v3232_v7 = vperm.slane %v797_v57, %v2936_v10  ;;  %v799_v21 = vsel %vm329_vm7, %v783_v6, %v798_v44 }
 0x134   : > { %v827_v46 = vperm.slane %v819_v28, %v2869_v37  ;;  %v829_v31 = vsel %vm329_vm7, %v828_v14, %v3147_v55  ;;  %v3253_v35 = vperm.slane %v799_v21, %v2936_v10  ;;  %v3257_v6 = vperm.slane %v635_v22, %v2936_v10 }
 0x135   : > { %v817_v33 = vsel %vm329_vm7, %v816_v48, %v3142_v45  ;;  %v772_v45 = vrot.slane %v3174_v56, 4  ;;  %v839_v56 = vperm.slane %v831_v2, %v2869_v37  ;;  %v576_v28 = vrot.slane %v3160_v47, 4 }
 0x136   : > { %v3236_v11 = vperm.slane %v817_v33, %v2869_v37  ;;  %v854_v30 = vrot.slane %v827_v46, 4  ;;  %v3266_v55 = vperm.slane %v829_v31, %v2869_v37  ;;  %v632_v61 = vrot.slane %v627_v62, 4 }
 0x137   : > { %713 = vrot.lane.b32.xlu0 %v3211_v52, %s2610_s4  ;;  %v773_v39 = vsel %vm329_vm7, %v772_v45, %v741_v51  ;;  %v577_v1 = vsel %vm329_vm7, %v576_v28, %v3145_v20  ;;  %v604_v2 = vrot.slane %v3183_v43, 4  ;;  %v852_v62 = vrot.slane %v839_v56, 4 }
 0x138   : > { %685 = vrot.lane.b32.xlu2 %v3215_v41, %s2610_s4  ;;  %v855_v16 = vsel %vm329_vm7, %v839_v56, %v854_v30  ;;  %v842_v48 = vrot.slane %v3236_v11, 4  ;;  %v779_v51 = vperm.slane %v773_v39, %v2869_v37  ;;  %v3289_v45 = vperm.slane %v577_v1, %v2936_v10 }
 0x139   : > { %v3229_v3 = vpop.permute.xlu0 %1163  ;;  %v3272_v60 = vperm.slane %v855_v16, %v2936_v10  ;;  %v633_v30 = vsel %vm329_vm7, %v632_v61, %v615_v42  ;;  %v605_v31 = vsel %vm329_vm7, 0.0, %v604_v2  ;;  %v853_v56 = vsel %vm329_vm7, %v852_v62, %v827_v46 }
 0x13a   : > { %v3238_v40 = vpop.permute.xlu1 %1165  ;;  %v3240_v12 = vpop.permute.xlu2 %1167  ;;  %v843_v47 = vsel %vm329_vm7, %v3266_v55, %v842_v48  ;;  %v787_v33 = vsel %vm329_vm7, %v779_v51, %v786_v18  ;;  %v600_v43 = vrot.slane %v3289_v45, 4  ;;  %v3303_v39 = vperm.slane %v633_v30, %v2936_v10 }
 0x13b   : > { %885 = vrot.lane.b32.xlu1 %v3232_v7, %s2611_s5  ;;  %v3282_v54 = vperm.slane %v843_v47, %v2936_v10  ;;  %v3285_v14 = vperm.slane %v787_v33, %v2936_v10  ;;  %v3309_v16 = vperm.slane %v853_v56, %v2936_v10  ;;  %v606_v61 = vrot.slane %v3215_v41, 4 }
 0x13c   : > { %v601_v42 = vsel %vm329_vm7, 0.0, %v600_v43  ;;  %v656_v48 = vrot.slane %v3303_v39, 4  ;;  %v784_v33 = vrot.slane %v779_v51, 4  ;;  %v602_v2 = vrot.slane %v3171_v50, 4 }
 0x13d   : > { %v662_v41 = vrot.slane %v3211_v52, 4 }
 0x13e   : > { %v657_v46 = vsel %vm329_vm7, 0.0, %v656_v48  ;;  %v785_v50 = vsel %vm329_vm7, %v784_v33, %v3244_v26  ;;  %v658_v48 = vrot.slane %v3257_v6, 4  ;;  %v660_v26 = vrot.slane %v3197_v15, 4 }
 0x13f   : > { %893 = vrot.lane.b32.xlu0 %v3253_v35, %s2610_s4  ;;  %v663_v52 = vsel %vm329_vm7, 0.0, %v662_v41 }
 0x140   : > { %697 = vrot.lane.b32.xlu2 %v3257_v6, %s2609_s30  ;;  %v661_v6 = vsel %vm329_vm7, 0.0, %v660_v26 }
 0x141   : > { %v447_v27 = vpop.permute.xlu0 %446 }
 0x142   : > { %v463_v44 = vpop.permute.xlu1 %462  ;;  %v455_v57 = vpop.permute.xlu2 %454 }
 0x143   : > { %921 = vrot.lane.b32.xlu1 %v3272_v60, %s2610_s4 }
 0x147   : > { %905 = vrot.lane.b32.xlu0 %v3282_v54, %s2609_s30 }
 0x148   : > { %877 = vrot.lane.b32.xlu2 %v3285_v14, %s2609_s30 }
 0x149   : > { %v3296_v20 = vpop.permute.xlu0 %482 }
 0x14a   : > { %v475_v21 = vpop.permute.xlu1 %474  ;;  %v3298_v22 = vpop.permute.xlu2 %490 }
 0x14b   : > { %681 = vrot.lane.b32.xlu1 %v605_v31, %s2612_s6  ;;  %v607_v31 = vsel %vm329_vm7, 0.0, %v606_v61  ;;  %v840_v61 = vrot.slane %v3266_v55, 4 }
 0x14f   : > { %665 = vrot.lane.b32.xlu0 %v601_v42, %s2614_s8 }
 0x150   : > { %913 = vrot.lane.b32.xlu2 %v3309_v16, %s2611_s5 }
 0x151   : > { %v459_v28 = vpop.permute.xlu0 %458 }
 0x152   : > { %v451_v18 = vpop.permute.xlu1 %450  ;;  %v443_v47 = vpop.permute.xlu2 %442 }
 0x153   : > { %v498_v1 = vsel %vm497_vm9, %v3062_v19, %v443_v47  ;;  %693 = vrot.lane.b32.xlu1 %v657_v46, %s2614_s8  ;;  %v603_v19 = vsel %vm329_vm7, 0.0, %v602_v2  ;;  %v659_v47 = vsel %vm329_vm7, 0.0, %v658_v48 }
 0x154   : > { %v500_v62 = vsel %vm499_vm10, %v498_v1, %v447_v27 }
 0x155   : > { %v502_v30 = vsel %vm501_vm11, %v500_v62, %v451_v18  ;;  %v3336_v18 = vperm.slane %v785_v50, %v2936_v10 }
 0x156   : > { %v504_v43 = vsel %vm503_vm12, %v502_v30, %v455_v57  ;;  %v810_v30 = vrot.slane %v3285_v14, 4  ;;  %v814_v14 = vrot.slane %v3253_v35, 4 }
 0x157   : > { %689 = vrot.lane.b32.xlu0 %v607_v31, %s2615_s9  ;;  %v506_v51 = vsel %vm505_vm13, %v504_v43, %v459_v28  ;;  %v808_v46 = vrot.slane %v3336_v18, 4  ;;  %v841_v43 = vsel %vm329_vm7, %v840_v61, %v3236_v11 }
 0x158   : > { %673 = vrot.lane.b32.xlu2 %v603_v19, %s2613_s7  ;;  %v508_v42 = vsel %vm507_vm14, %v506_v51, %v463_v44  ;;  %v811_v19 = vsel %vm329_vm7, 0.0, %v810_v30 }
 0x159   : > { %v471_v27 = vpop.permute.xlu0 %470  ;;  %v809_v62 = vsel %vm329_vm7, 0.0, %v808_v46 }
 0x15a   : > { %v487_v56 = vpop.permute.xlu1 %486  ;;  %v467_v57 = vpop.permute.xlu2 %466  ;;  %v511_v44 = vsel %vm497_vm9, %v3001_v13, %v471_v27  ;;  %v812_v13 = vrot.slane %v3232_v7, 4 }
 0x15b   : > { %v510_v28 = vsel %vm509_vm15, %v508_v42, %v467_v57  ;;  %717 = vrot.lane.b32.xlu1 %v663_v52, %s2615_s9  ;;  %v512_v15 = vsel %vm499_vm10, %v511_v44, %v475_v21  ;;  %v866_v57 = vrot.slane %v3282_v54, 4 }
 0x15c   : > { %518 = vst [vmem:[#allocation3] sm:$0xf] %v510_v28  ;;  %v813_v7 = vsel %vm329_vm7, 0.0, %v812_v13 }
 0x15f   : > { %701 = vrot.lane.b32.xlu0 %v659_v47, %s2613_s7  ;;  %v867_v47 = vsel %vm329_vm7, 0.0, %v866_v57 }
 0x160   : > { %709 = vrot.lane.b32.xlu2 %v661_v6, %s2612_s6 }
 0x161   : > { %v495_v33 = vpop.permute.xlu0 %494 }
 0x162   : > { %v1095_v1 = vpop.permute.xlu1 %1094  ;;  %v479_v2 = vpop.permute.xlu2 %478 }
 0x163   : > { %v513_v31 = vsel %vm501_vm11, %v512_v15, %v479_v2  ;;  %873 = vrot.lane.b32.xlu1 %v809_v62, %s2614_s8 }
 0x164   : > { %v514_v55 = vsel %vm503_vm12, %v513_v31, %v3296_v20  ;;  %v3368_v20 = vperm.slane %v841_v43, %v2936_v10 }
 0x165   : > { %v515_v41 = vsel %vm505_vm13, %v514_v55, %v487_v56  ;;  %v868_v56 = vrot.slane %v3309_v16, 4  ;;  %v870_v16 = vrot.slane %v3272_v60, 4 }
 0x166   : > { %v516_v21 = vsel %vm507_vm14, %v515_v41, %v3298_v22  ;;  %v815_v22 = vsel %vm329_vm7, 0.0, %v814_v14  ;;  %v864_v35 = vrot.slane %v3368_v20, 4  ;;  %v1199_v41 = vrot.slane %v3238_v40, 4 }
 0x167   : > { %v517_v51 = vsel %vm509_vm15, %v516_v21, %v495_v33  ;;  %881 = vrot.lane.b32.xlu0 %v811_v19, %s2613_s7  ;;  %v869_v42 = vsel %vm329_vm7, 0.0, %v868_v56  ;;  %v871_v46 = vsel %vm329_vm7, 0.0, %v870_v16 }
 0x168   : > { %519 = vst [vmem:[#allocation3 + $0x38] sm:$0xf] %v517_v51  ;;  %889 = vrot.lane.b32.xlu2 %v813_v7, %s2612_s6  ;;  %v865_v52 = vsel %vm329_vm7, 0.0, %v864_v35 }
 0x169   : > { %v1103_v11 = vpop.permute.xlu0 %1102 }
 0x16a   : > { %v1131_v50 = vpop.permute.xlu1 %1130  ;;  %v1111_v27 = vpop.permute.xlu2 %1110 }
 0x16b   : > { %897 = vrot.lane.b32.xlu1 %v815_v22, %s2615_s9 }
 0x16f   : > { %917 = vrot.lane.b32.xlu0 %v869_v42, %s2612_s6  ;;  %v1187_v42 = vrot.slane %v3200_v38, 4 }
 0x170   : > { %901 = vrot.lane.b32.xlu2 %v865_v52, %s2614_s8  ;;  %v1243_v52 = vrot.slane %v3229_v3, 4 }
 0x171   : > { %v1139_v48 = vpop.permute.xlu0 %1138 }
 0x172   : > { %v1107_v28 = vpop.permute.xlu1 %1106  ;;  %v1123_v26 = vpop.permute.xlu2 %1122 }
 0x173   : > { %909 = vrot.lane.b32.xlu1 %v867_v47, %s2613_s7 }
 0x178   : > { %925 = vrot.lane.b32.xlu2 %v871_v46, %s2615_s9 }
 0x179   : > { %v1091_v54 = vpop.permute.xlu0 %1090 }
 0x17a   : > { %v1145_v44 = vsel %vm497_vm9, %v3094_v25, %v1091_v54  ;;  %v1119_v6 = vpop.permute.xlu1 %1118  ;;  %v1099_v61 = vpop.permute.xlu2 %1098 }
 0x17b   : > { %v1146_v33 = vsel %vm499_vm10, %v1145_v44, %v1095_v1  ;;  %v1152_v25 = vsel %vm497_vm9, %v3100_v34, %v1119_v6 }
 0x17c   : > { %v1147_v15 = vsel %vm501_vm11, %v1146_v33, %v1099_v61  ;;  %v1153_v1 = vsel %vm499_vm10, %v1152_v25, %v1123_v26 }
 0x17d   : > { %v1148_v2 = vsel %vm503_vm12, %v1147_v15, %v1103_v11 }
 0x17e   : > { %v1149_v62 = vsel %vm505_vm13, %v1148_v2, %v1107_v28 }
 0x17f   : > { %v1150_v60 = vsel %vm507_vm14, %v1149_v62, %v1111_v27 }
 0x181   : > { %v1115_v30 = vpop.permute.xlu0 %1114 }
 0x182   : > { %v1151_v31 = vsel %vm509_vm15, %v1150_v60, %v1115_v30  ;;  %v1135_v13 = vpop.permute.xlu2 %1134  ;;  %v1172_v55 = vpop.permute.xlu1 %1171 }
 0x183   : > { %1159 = vst [vmem:[#allocation3 + $0x70] sm:$0xf] %v1151_v31  ;;  %v1241_v28 = vrot.slane %v1172_v55, 4  ;;  %v1244_v46 = vsel %vm329_vm7, %v1172_v55, %v1243_v52 }
 0x184   : > { %v1252_v2 = vperm.slane %v1244_v46, %v2869_v37 }
 0x185   : > { %v1242_v33 = vsel %vm329_vm7, %v1241_v28, %v3229_v3 }
 0x186   : > { %v1248_v3 = vperm.slane %v1242_v33, %v2869_v37 }
 0x189   : > { %v1127_v43 = vpop.permute.xlu0 %1126 }
 0x18a   : > { %v1154_v21 = vsel %vm501_vm11, %v1153_v1, %v1127_v43  ;;  %v1174_v19 = vpop.permute.xlu2 %1173  ;;  %v1143_v27 = vpop.permute.xlu1 %1142 }
 0x18b   : > { %v1155_v14 = vsel %vm503_vm12, %v1154_v21, %v1131_v50  ;;  %v1197_v51 = vrot.slane %v1174_v19, 4  ;;  %v1200_v11 = vsel %vm329_vm7, %v1174_v19, %v1199_v41  ;;  %v1279_v19 = vrot.slane %v1252_v2, 4 }
 0x18c   : > { %v1156_v7 = vsel %vm505_vm13, %v1155_v14, %v1135_v13  ;;  %v1208_v35 = vperm.slane %v1200_v11, %v2869_v37  ;;  %v1267_v11 = vrot.slane %v1248_v3, 4 }
 0x18d   : > { %v1157_v22 = vsel %vm507_vm14, %v1156_v7, %v1139_v48  ;;  %v1198_v56 = vsel %vm329_vm7, %v1197_v51, %v3238_v40 }
 0x18e   : > { %v1158_v34 = vsel %vm509_vm15, %v1157_v22, %v1143_v27  ;;  %v1204_v50 = vperm.slane %v1198_v56, %v2869_v37  ;;  %v1221_v48 = vrot.slane %v1208_v35, 4 }
 0x18f   : > { %1160 = vst [vmem:[#allocation3 + $0x80] sm:$0xf] %v1158_v34 }
 0x190   : > { %v1209_v54 = vrot.slane %v1204_v50, 4 }
 0x191   : > { %v1170_v57 = vpop.permute.xlu0 %1169 }
 0x192   : > { %v1185_v26 = vrot.slane %v1170_v57, 4  ;;  %v1188_v47 = vsel %vm329_vm7, %v1170_v57, %v1187_v42  ;;  %v3429_v55 = vpop.permute.xlu2 %685 }
 0x193   : > { %v1196_v16 = vperm.slane %v1188_v47, %v2869_v37 }
 0x194   : > { %v1186_v40 = vsel %vm329_vm7, %v1185_v26, %v3200_v38  ;;  %v1255_v38 = vrot.slane %v3240_v12, 4 }
 0x195   : > { %v1192_v44 = vperm.slane %v1186_v40, %v2869_v37  ;;  %v1223_v6 = vrot.slane %v1196_v16, 4  ;;  %v1222_v61 = vsel %vm329_vm7, %v1221_v48, %v1196_v16 }
 0x196   : > { %v1228_v15 = vperm.slane %v1222_v61, %v2936_v10 }
 0x197   : > { %v1211_v62 = vrot.slane %v1192_v44, 4  ;;  %v1224_v30 = vsel %vm329_vm7, %v1208_v35, %v1223_v6  ;;  %v1210_v60 = vsel %vm329_vm7, %v1209_v54, %v1192_v44 }
 0x198   : > { %1310 = vrot.lane.b32.xlu1 %v1228_v15, %s2611_s5  ;;  %v1232_v31 = vperm.slane %v1224_v30, %v2936_v10  ;;  %v3426_v13 = vperm.slane %v1210_v60, %v2936_v10  ;;  %v1237_v40 = vrot.slane %v1228_v15, 4 }
 0x199   : > { %v1176_v25 = vpop.permute.xlu0 %1175  ;;  %v1212_v43 = vsel %vm329_vm7, %v1204_v50, %v1211_v62 }
 0x19a   : > { %v1253_v1 = vrot.slane %v1176_v25, 4  ;;  %v1256_v41 = vsel %vm329_vm7, %v1176_v25, %v1255_v38  ;;  %1318 = vrot.lane.b32.xlu0 %v1232_v31, %s2610_s4  ;;  %v1220_v21 = vperm.slane %v1212_v43, %v2936_v10  ;;  %v1233_v51 = vrot.slane %v3426_v13, 4  ;;  %v698_v28 = vpop.permute.xlu2 %697 }
 0x19b   : > { %v1264_v14 = vperm.slane %v1256_v41, %v2869_v37  ;;  %v1239_v26 = vrot.slane %v1232_v31, 4  ;;  %v1238_v61 = vsel %vm329_vm7, 0.0, %v1237_v40 }
 0x19c   : > { %v1254_v7 = vsel %vm329_vm7, %v1253_v1, %v3240_v12  ;;  %1302 = vrot.lane.b32.xlu2 %v1220_v21, %s2609_s30  ;;  %v1234_v35 = vsel %vm329_vm7, 0.0, %v1233_v51  ;;  %v1235_v16 = vrot.slane %v1220_v21, 4 }
 0x19d   : > { %v1260_v27 = vperm.slane %v1254_v7, %v2869_v37  ;;  %v1277_v22 = vrot.slane %v1264_v14, 4  ;;  %v3442_v34 = vsel %vm329_vm7, %v1264_v14, %v1279_v19  ;;  %v670_v56 = vpop.permute.xlu1 %669  ;;  %v1240_v46 = vsel %vm329_vm7, 0.0, %v1239_v26 }
 0x19e   : > { %v1236_v6 = vsel %vm329_vm7, 0.0, %v1235_v16 }
 0x19f   : > { %v1268_v42 = vsel %vm329_vm7, %v1260_v27, %v1267_v11  ;;  %v1278_v50 = vsel %vm329_vm7, %v1277_v22, %v1252_v2  ;;  %v1265_v47 = vrot.slane %v1260_v27, 4 }
 0x1a0   : > { %1298 = vrot.lane.b32.xlu1 %v1234_v35, %s2614_s8  ;;  %v1276_v12 = vperm.slane %v1268_v42, %v2936_v10  ;;  %v1284_v52 = vperm.slane %v1278_v50, %v2936_v10 }
 0x1a1   : > { %v678_v57 = vpop.permute.xlu0 %677  ;;  %v1266_v54 = vsel %vm329_vm7, %v1265_v47, %v1248_v3 }
 0x1a2   : > { %1330 = vrot.lane.b32.xlu0 %v1276_v12, %s2609_s30  ;;  %v1291_v33 = vrot.slane %v1276_v12, 4  ;;  %v3459_v2 = vperm.slane %v1266_v54, %v2936_v10  ;;  %v878_v62 = vpop.permute.xlu2 %877  ;;  %v1293_v15 = vrot.slane %v1284_v52, 4 }
 0x1a4   : > { %1338 = vrot.lane.b32.xlu2 %v1284_v52, %s2611_s5  ;;  %v1292_v60 = vsel %vm329_vm7, 0.0, %v1291_v33  ;;  %v1289_v38 = vrot.slane %v3459_v2, 4  ;;  %v1294_v3 = vsel %vm329_vm7, 0.0, %v1293_v15 }
 0x1a5   : > { %v706_v48 = vpop.permute.xlu1 %705 }
 0x1a6   : > { %v1290_v25 = vsel %vm329_vm7, 0.0, %v1289_v38 }
 0x1a8   : > { %1322 = vrot.lane.b32.xlu1 %v1240_v46, %s2615_s9 }
 0x1a9   : > { %v714_v44 = vpop.permute.xlu0 %713 }
 0x1aa   : > { %1306 = vrot.lane.b32.xlu0 %v1236_v6, %s2613_s7  ;;  %v3471_v1 = vpop.permute.xlu2 %913 }
 0x1ac   : > { %1314 = vrot.lane.b32.xlu2 %v1238_v61, %s2612_s6 }
 0x1ad   : > { %v886_v30 = vpop.permute.xlu1 %885 }
 0x1b0   : > { %1334 = vrot.lane.b32.xlu1 %v1292_v60, %s2613_s7 }
 0x1b1   : > { %v894_v31 = vpop.permute.xlu0 %893 }
 0x1b2   : > { %1342 = vrot.lane.b32.xlu0 %v1294_v3, %s2612_s6  ;;  %v674_v19 = vpop.permute.xlu2 %673 }
 0x1b4   : > { %1326 = vrot.lane.b32.xlu2 %v1290_v25, %s2614_s8 }
 0x1b5   : > { %v3469_v43 = vpop.permute.xlu1 %921 }
 0x1b8   : > { %2010 = vrot.lane.b32.xlu1 %v2931_v8, %s2606_s28 }
 0x1b9   : > { %v906_v41 = vpop.permute.xlu0 %905 }
 0x1ba   : > { %1802 = vrot.lane.b32.xlu0 %v2931_v8, %s2605_s24 }
 0x1bc   : > { %2012 = vrot.lane.b32.xlu2 %v2934_v9, %s2606_s28 }
 0x1bd   : > { %v682_v21 = vpop.permute.xlu1 %681 }
 0x1c0   : > { %1804 = vrot.lane.b32.xlu1 %v2934_v9, %s2605_s24 }
 0x1c1   : > { %v666_v14 = vpop.permute.xlu0 %665 }
 0x1c2   : > { %v720_v51 = vsel %vm497_vm9, %v3289_v45, %v666_v14  ;;  %2004 = vrot.lane.b32.xlu0 %v2924_v4, %s2606_s28 }
 0x1c3   : > { %v721_v7 = vsel %vm499_vm10, %v720_v51, %v670_v56  ;;  %v710_v56 = vpop.permute.xlu2 %709 }
 0x1c4   : > { %v722_v11 = vsel %vm501_vm11, %v721_v7, %v674_v19  ;;  %2002 = vrot.lane.b32.xlu2 %v2927_v5, %s2606_s28 }
 0x1c5   : > { %v694_v27 = vpop.permute.xlu1 %693  ;;  %v723_v22 = vsel %vm503_vm12, %v722_v11, %v678_v57 }
 0x1c6   : > { %v724_v35 = vsel %vm505_vm13, %v723_v22, %v682_v21  ;;  %v727_v57 = vsel %vm497_vm9, %v3303_v39, %v694_v27 }
 0x1c7   : > { %v725_v45 = vsel %vm507_vm14, %v724_v35, %v3429_v55  ;;  %v728_v55 = vsel %vm499_vm10, %v727_v57, %v698_v28 }
 0x1c8   : > { %2006 = vrot.lane.b32.xlu1 %v2827_v23, %s2606_s28 }
 0x1c9   : > { %v690_v42 = vpop.permute.xlu0 %689 }
 0x1ca   : > { %v726_v50 = vsel %vm509_vm15, %v725_v45, %v690_v42  ;;  %1794 = vrot.lane.b32.xlu0 %v2927_v5, %s2605_s24 }
 0x1cb   : > { %734 = vst [vmem:[#allocation3 + $0x78] sm:$0xf] %v726_v50  ;;  %v890_v46 = vpop.permute.xlu2 %889 }
 0x1cc   : > { %2008 = vrot.lane.b32.xlu2 %v2830_v24, %s2606_s28 }
 0x1cd   : > { %v718_v12 = vpop.permute.xlu1 %717 }
 0x1d0   : > { %1796 = vrot.lane.b32.xlu1 %v2924_v4, %s2605_s24 }
 0x1d1   : > { %v702_v52 = vpop.permute.xlu0 %701 }
 0x1d2   : > { %v729_v26 = vsel %vm501_vm11, %v728_v55, %v702_v52  ;;  %1800 = vrot.lane.b32.xlu0 %v2830_v24, %s2605_s24 }
 0x1d3   : > { %v730_v47 = vsel %vm503_vm12, %v729_v26, %v706_v48  ;;  %v902_v38 = vpop.permute.xlu2 %901 }
 0x1d4   : > { %v731_v16 = vsel %vm505_vm13, %v730_v47, %v710_v56  ;;  %1798 = vrot.lane.b32.xlu2 %v2827_v23, %s2605_s24 }
 0x1d5   : > { %v732_v39 = vsel %vm507_vm14, %v731_v16, %v714_v44  ;;  %v874_v40 = vpop.permute.xlu1 %873 }
 0x1d6   : > { %v733_v54 = vsel %vm509_vm15, %v732_v39, %v718_v12  ;;  %v928_v28 = vsel %vm497_vm9, %v3336_v18, %v874_v40 }
 0x1d7   : > { %735 = vst [vmem:[#allocation3 + $0x58] sm:$0xf] %v733_v54  ;;  %v929_v48 = vsel %vm499_vm10, %v928_v28, %v878_v62 }
 0x1d8   : > { %1998 = vrot.lane.b32.xlu1 %v2953_v32, %s2606_s28 }
 0x1d9   : > { %v882_v6 = vpop.permute.xlu0 %881 }
 0x1da   : > { %v930_v61 = vsel %vm501_vm11, %v929_v48, %v882_v6  ;;  %1381 = vrot.lane.b32.xlu0 %v2994_v63, %s2606_s28  ;;  %v935_v63 = vsel %vm497_vm9, %v3368_v20, %v902_v38 }
 0x1db   : > { %v931_v44 = vsel %vm503_vm12, %v930_v61, %v886_v30  ;;  %v936_v30 = vsel %vm499_vm10, %v935_v63, %v906_v41  ;;  %v926_v20 = vpop.permute.xlu2 %925 }
 0x1dc   : > { %v932_v33 = vsel %vm505_vm13, %v931_v44, %v890_v46  ;;  %2000 = vrot.lane.b32.xlu2 %v2959_v36, %s2606_s28 }
 0x1dd   : > { %v898_v18 = vpop.permute.xlu1 %897  ;;  %v933_v15 = vsel %vm507_vm14, %v932_v33, %v894_v31 }
 0x1de   : > { %v934_v60 = vsel %vm509_vm15, %v933_v15, %v898_v18 }
 0x1df   : > { %942 = vst [vmem:[#allocation3 + $0x20] sm:$0xf] %v934_v60 }
 0x1e0   : > { %1383 = vrot.lane.b32.xlu1 %v3025_v17, %s2606_s28 }
 0x1e1   : > { %v918_v3 = vpop.permute.xlu0 %917 }
 0x1e2   : > { %1792 = vrot.lane.b32.xlu0 %v2959_v36, %s2605_s24 }
 0x1e4   : > { %1790 = vrot.lane.b32.xlu2 %v2953_v32, %s2605_s24 }
 0x1e5   : > { %v910_v62 = vpop.permute.xlu1 %909 }
 0x1e6   : > { %v937_v31 = vsel %vm501_vm11, %v936_v30, %v910_v62 }
 0x1e7   : > { %v938_v25 = vsel %vm503_vm12, %v937_v31, %v3471_v1 }
 0x1e8   : > { %v939_v17 = vsel %vm505_vm13, %v938_v25, %v918_v3  ;;  %1373 = vrot.lane.b32.xlu1 %v2904_v59, %s2606_s28 }
 0x1e9   : > { %v940_v21 = vsel %vm507_vm14, %v939_v17, %v3469_v43 }
 0x1ea   : > { %v941_v19 = vsel %vm509_vm15, %v940_v21, %v926_v20  ;;  %1377 = vrot.lane.b32.xlu0 %v2997_v0, %s2606_s28 }
 0x1eb   : > { %943 = vst [vmem:[#allocation3 + $0x8] sm:$0xf] %v941_v19 }
 0x1ec   : > { %1375 = vrot.lane.b32.xlu2 %v3006_v29, %s2606_s28 }
 0x1f0   : > { %1379 = vrot.lane.b32.xlu1 %v3049_v49, %s2606_s28 }
 0x1f2   : > { %1371 = vrot.lane.b32.xlu0 %v2899_v58, %s2606_s28 }
 0x1f4   : > { %1369 = vrot.lane.b32.xlu2 %v2980_v53, %s2606_s28  ;;  %s2293_s28 = scalar_lea.hbm %s4101_s3, %s2406_s29 }
 0x1f6   : > { %v1303_v59 = vpop.permute.xlu2 %1302 }
 0x1fe   : > { %v1339_v43 = vpop.permute.xlu2 %1338 }
 0x206   : > { %v1315_v1 = vpop.permute.xlu2 %1314 }
 0x20a   : > { %v1311_v41 = vpop.permute.xlu1 %1310 }
 0x20c   : > { %v1319_v14 = vpop.permute.xlu0 %1318 }
 0x20e   : > { %v1327_v51 = vpop.permute.xlu2 %1326 }
 0x20f   : > { %v1360_v7 = vsel %vm497_vm9, %v3459_v2, %v1327_v51 }
 0x212   : > { %v1299_v0 = vpop.permute.xlu1 %1298 }
 0x213   : > { %v1353_v58 = vsel %vm497_vm9, %v3426_v13, %v1299_v0 }
 0x214   : > { %v1331_v29 = vpop.permute.xlu0 %1330  ;;  %v1354_v53 = vsel %vm499_vm10, %v1353_v58, %v1303_v59 }
 0x215   : > { %v1361_v11 = vsel %vm499_vm10, %v1360_v7, %v1331_v29 }
 0x216   : > { %v2013_v49 = vpop.permute.xlu2 %2012 }
 0x217   : > { %v2090_v40 = vrot.slane %v2013_v49, 4 }
 0x21a   : > { %v1323_v27 = vpop.permute.xlu1 %1322 }
 0x21c   : > { %v1307_v22 = vpop.permute.xlu0 %1306 }
 0x21d   : > { %v1355_v35 = vsel %vm501_vm11, %v1354_v53, %v1307_v22 }
 0x21e   : > { %v1356_v42 = vsel %vm503_vm12, %v1355_v35, %v1311_v41  ;;  %v3564_v45 = vpop.permute.xlu2 %2002 }
 0x21f   : > { %v1357_v50 = vsel %vm505_vm13, %v1356_v42, %v1315_v1 }
 0x220   : > { %v1358_v2 = vsel %vm507_vm14, %v1357_v50, %v1319_v14 }
 0x221   : > { %v1359_v56 = vsel %vm509_vm15, %v1358_v2, %v1323_v27  ;;  %v1674_v2 = vrot.slane %v2934_v9, 4 }
 0x222   : > { %1367 = vst [vmem:[#allocation3 + $0x88] sm:$0xf] %v1359_v56  ;;  %v1335_v12 = vpop.permute.xlu1 %1334 }
 0x223   : > { %v1362_v13 = vsel %vm501_vm11, %v1361_v11, %v1335_v12 }
 0x224   : > { %v1343_v57 = vpop.permute.xlu0 %1342  ;;  %v1363_v52 = vsel %vm503_vm12, %v1362_v13, %v1339_v43 }
 0x225   : > { %v3572_v55 = vsel %vm505_vm13, %v1363_v52, %v1343_v57 }
 0x226   : > { %v2009_v26 = vpop.permute.xlu2 %2008 }
 0x227   : > { %v2078_v28 = vrot.slane %v2009_v26, 4 }
 0x22a   : > { %v3574_v47 = vpop.permute.xlu1 %2010 }
 0x22b   : > { %v2034_v22 = vrot.slane %v3574_v47, 4 }
 0x22c   : > { %v1803_v16 = vpop.permute.xlu0 %1802 }
 0x22d   : > { %v1826_v3 = vrot.slane %v1803_v16, 4 }
 0x22e   : > { %v1799_v46 = vpop.permute.xlu2 %1798 }
 0x22f   : > { %v1814_v21 = vrot.slane %v1799_v46, 4 }
 0x232   : > { %v3576_v39 = vpop.permute.xlu1 %1804 }
 0x234   : > { %v2005_v54 = vpop.permute.xlu0 %2004 }
 0x235   : > { %v2091_v6 = vsel %vm329_vm7, %v2090_v40, %v2005_v54  ;;  %v2092_v48 = vrot.slane %v2005_v54, 4  ;;  %v1675_v54 = vsel %vm329_vm7, %v1674_v2, %v2924_v4 }
 0x236   : > { %v2097_v61 = vperm.slane %v2091_v6, %v2869_v37  ;;  %v2001_v44 = vpop.permute.xlu2 %2000 }
 0x237   : > { %v2093_v33 = vsel %vm329_vm7, %v2013_v49, %v2092_v48  ;;  %v2079_v18 = vsel %vm329_vm7, %v2078_v28, %v2001_v44  ;;  %v2080_v15 = vrot.slane %v2001_v44, 4  ;;  %v2036_v48 = vrot.slane %v3564_v45, 4 }
 0x238   : > { %v2102_v60 = vrot.slane %v2097_v61, 4  ;;  %v2085_v38 = vperm.slane %v2079_v18, %v2869_v37  ;;  %v2101_v62 = vperm.slane %v2093_v33, %v2869_v37  ;;  %v3635_v18 = vperm.slane %v1675_v54, %v2869_v37 }
 0x239   : > { %v2081_v63 = vsel %vm329_vm7, %v2009_v26, %v2080_v15  ;;  %v2037_v15 = vsel %vm329_vm7, %v3574_v47, %v2036_v48 }
 0x23a   : > { %v2007_v30 = vpop.permute.xlu1 %2006  ;;  %v2103_v31 = vsel %vm329_vm7, %v2102_v60, %v2085_v38  ;;  %v2089_v17 = vperm.slane %v2081_v63, %v2869_v37  ;;  %v2114_v1 = vrot.slane %v2101_v62, 4  ;;  %v2104_v11 = vrot.slane %v2085_v38, 4 }
 0x23b   : > { %v3587_v25 = vperm.slane %v2103_v31, %v2936_v10  ;;  %v2022_v33 = vrot.slane %v2007_v30, 4  ;;  %v1662_v31 = vrot.slane %v2830_v24, 4  ;;  %v3652_v47 = vperm.slane %v2037_v15, %v2869_v37 }
 0x23c   : > { %v1795_v20 = vpop.permute.xlu0 %1794  ;;  %v2116_v49 = vrot.slane %v2089_v17, 4  ;;  %v2105_v57 = vsel %vm329_vm7, %v2097_v61, %v2104_v11  ;;  %v3617_v52 = vsel %vm329_vm7, %v2114_v1, %v2089_v17 }
 0x23d   : > { %v1827_v19 = vsel %vm329_vm7, %v1826_v3, %v1795_v20  ;;  %v1828_v59 = vrot.slane %v1795_v20, 4  ;;  %v2126_v43 = vrot.slane %v3587_v25, 4  ;;  %v3629_v6 = vperm.slane %v2105_v57, %v2936_v10 }
 0x23e   : > { %v3593_v41 = vperm.slane %v1827_v19, %v2869_v37  ;;  %v1791_v14 = vpop.permute.xlu2 %1790  ;;  %v3620_v26 = vsel %vm329_vm7, %v2101_v62, %v2116_v49  ;;  %v1882_v19 = vrot.slane %v3576_v39, 4  ;;  %v1663_v1 = vsel %vm329_vm7, %v1662_v31, %v2959_v36 }
 0x23f   : > { %v1829_v51 = vsel %vm329_vm7, %v1803_v16, %v1828_v59  ;;  %v1815_v0 = vsel %vm329_vm7, %v1814_v21, %v1791_v14  ;;  %v1816_v7 = vrot.slane %v1791_v14, 4  ;;  %v2127_v29 = vsel %vm329_vm7, 0.0, %v2126_v43 }
 0x240   : > { %v1838_v58 = vrot.slane %v3593_v41, 4  ;;  %v3600_v27 = vperm.slane %v1815_v0, %v2869_v37  ;;  %2163 = vrot.lane.b32.xlu2 %v2127_v29, %s2614_s8  ;;  %v1837_v35 = vperm.slane %v1829_v51, %v2869_v37  ;;  %v2035_v16 = vsel %vm329_vm7, %v2034_v22, %v3564_v45 }
 0x241   : > { %v1817_v53 = vsel %vm329_vm7, %v1799_v46, %v1816_v7  ;;  %v2041_v61 = vperm.slane %v2035_v16, %v2869_v37  ;;  %v2128_v45 = vrot.slane %v3629_v6, 4  ;;  %v1686_v43 = vrot.slane %v3635_v18, 4 }
 0x242   : > { %v3606_v42 = vpop.permute.xlu1 %1796  ;;  %v1839_v50 = vsel %vm329_vm7, %v1838_v58, %v3600_v27  ;;  %v1825_v12 = vperm.slane %v1817_v53, %v2869_v37  ;;  %v1850_v40 = vrot.slane %v1837_v35, 4  ;;  %v3674_v58 = vperm.slane %v1663_v1, %v2869_v37 }
 0x243   : > { %v3612_v56 = vperm.slane %v1839_v50, %v2936_v10  ;;  %v2046_v3 = vrot.slane %v2041_v61, 4  ;;  %v1883_v7 = vsel %vm329_vm7, %v1882_v19, %v3606_v42  ;;  %v2129_v11 = vsel %vm329_vm7, 0.0, %v2128_v45 }
 0x244   : > { %v1801_v13 = vpop.permute.xlu0 %1800  ;;  %v1852_v44 = vrot.slane %v1825_v12, 4  ;;  %v3640_v38 = vsel %vm329_vm7, %v1850_v40, %v1825_v12  ;;  %v2058_v22 = vrot.slane %v3652_v47, 4  ;;  %v3680_v50 = vperm.slane %v1883_v7, %v2869_v37 }
 0x245   : > { %v1862_v46 = vrot.slane %v3612_v56, 4  ;;  %v1870_v12 = vrot.slane %v1801_v13, 4  ;;  %v1884_v40 = vrot.slane %v3606_v42, 4 }
 0x246   : > { %v3649_v21 = vsel %vm329_vm7, %v1837_v35, %v1852_v44  ;;  %v3659_v14 = vpop.permute.xlu2 %1375 }
 0x247   : > { %v1863_v28 = vsel %vm329_vm7, 0.0, %v1862_v46  ;;  %v1687_v46 = vsel %vm329_vm7, %v1686_v43, %v3674_v58  ;;  %v1885_v42 = vsel %vm329_vm7, %v3576_v39, %v1884_v40  ;;  %v1606_v40 = vrot.slane %v2827_v23, 4 }
 0x248   : > { %1927 = vrot.lane.b32.xlu2 %v1863_v28, %s2614_s8  ;;  %v3697_v15 = vperm.slane %v1687_v46, %v2936_v10  ;;  %v1893_v19 = vperm.slane %v1885_v42, %v2869_v37 }
 0x24a   : > { %v1999_v60 = vpop.permute.xlu1 %1998 }
 0x24b   : > { %v2023_v63 = vsel %vm329_vm7, %v2022_v33, %v1999_v60  ;;  %v2024_v62 = vrot.slane %v1999_v60, 4 }
 0x24c   : > { %v2029_v17 = vperm.slane %v2023_v63, %v2869_v37  ;;  %v3646_v20 = vpop.permute.xlu0 %1381  ;;  %v1618_v63 = vrot.slane %v2931_v8, 4 }
 0x24d   : > { %v2025_v59 = vsel %vm329_vm7, %v2007_v30, %v2024_v62 }
 0x24e   : > { %v2048_v51 = vrot.slane %v2029_v17, 4  ;;  %v2047_v0 = vsel %vm329_vm7, %v2046_v3, %v2029_v17  ;;  %v3665_v29 = vperm.slane %v2025_v59, %v2869_v37  ;;  %v3703_v62 = vpop.permute.xlu2 %1369  ;;  %v1619_v1 = vsel %vm329_vm7, %v1618_v63, %v2927_v5 }
 0x24f   : > { %v3669_v30 = vperm.slane %v2047_v0, %v2936_v10  ;;  %v1395_v59 = vrot.slane %v3703_v62, 4  ;;  %v1840_v0 = vrot.slane %v3600_v27, 4 }
 0x250   : > { %2171 = vrot.lane.b32.xlu2 %v2129_v11, %s2613_s7  ;;  %v2049_v49 = vsel %vm329_vm7, %v2041_v61, %v2048_v51  ;;  %v2059_v16 = vsel %vm329_vm7, %v2058_v22, %v3665_v29  ;;  %v1894_v61 = vrot.slane %v3680_v50, 4 }
 0x251   : > { %v2057_v53 = vperm.slane %v2049_v49, %v2936_v10  ;;  %v2070_v35 = vrot.slane %v3669_v30, 4  ;;  %v2065_v33 = vperm.slane %v2059_v16, %v2936_v10 }
 0x252   : > { %v3682_v2 = vpop.permute.xlu1 %1383 }
 0x253   : > { %2139 = vrot.lane.b32.xlu0 %v2057_v53, %s2609_s30  ;;  %v2071_v57 = vsel %vm329_vm7, 0.0, %v2070_v35  ;;  %v2072_v16 = vrot.slane %v2057_v53, 4  ;;  %v2074_v42 = vrot.slane %v2065_v33, 4 }
 0x254   : > { %v1793_v54 = vpop.permute.xlu0 %1792  ;;  %2135 = vrot.lane.b32.xlu1 %v2071_v57, %s2614_s8 }
 0x255   : > { %v1871_v28 = vsel %vm329_vm7, %v1870_v12, %v1793_v54  ;;  %v1872_v48 = vrot.slane %v1793_v54, 4  ;;  %v1906_v12 = vrot.slane %v1893_v19, 4  ;;  %v1841_v54 = vsel %vm329_vm7, %v3593_v41, %v1840_v0 }
 0x256   : > { %v1877_v44 = vperm.slane %v1871_v28, %v2869_v37  ;;  %v2073_v63 = vsel %vm329_vm7, 0.0, %v2072_v16  ;;  %v1849_v41 = vperm.slane %v1841_v54, %v2936_v10 }
 0x257   : > { %v1873_v60 = vsel %vm329_vm7, %v1801_v13, %v1872_v48  ;;  %v1710_v13 = vrot.slane %v3697_v15, 4 }
 0x258   : > { %2147 = vrot.lane.b32.xlu2 %v2065_v33, %s2611_s5  ;;  %v1895_v45 = vsel %vm329_vm7, %v1894_v61, %v1877_v44  ;;  %v1881_v3 = vperm.slane %v1873_v60, %v2869_v37  ;;  %v1607_v61 = vsel %vm329_vm7, %v1606_v40, %v2953_v32  ;;  %v1896_v60 = vrot.slane %v1877_v44, 4 }
 0x259   : > { %v3708_v31 = vperm.slane %v1895_v45, %v2936_v10  ;;  %v1711_v57 = vsel %vm329_vm7, 0.0, %v1710_v13  ;;  %v1613_v13 = vperm.slane %v1607_v61, %v2869_v37  ;;  %v2075_v44 = vsel %vm329_vm7, 0.0, %v2074_v42 }
 0x25a   : > { %v3711_v17 = vpop.permute.xlu1 %1373  ;;  %v1908_v22 = vrot.slane %v1881_v3, 4  ;;  %v3742_v28 = vsel %vm329_vm7, %v1906_v12, %v1881_v3  ;;  %v1897_v33 = vsel %vm329_vm7, %v3680_v50, %v1896_v60 }
 0x25b   : > { %v1407_v39 = vrot.slane %v3711_v17, 4  ;;  %v1918_v43 = vrot.slane %v3708_v31, 4 }
 0x25c   : > { %v3720_v51 = vpop.permute.xlu0 %1377  ;;  %2167 = vrot.lane.b32.xlu1 %v3629_v6, %s2609_s30  ;;  %v3734_v6 = vperm.slane %v1619_v1, %v2869_v37  ;;  %v3748_v53 = vsel %vm329_vm7, %v1893_v19, %v1908_v22  ;;  %v1461_v19 = vrot.slane %v3682_v2, 4  ;;  %v1688_v1 = vrot.slane %v3674_v58, 4 }
 0x25d   : > { %v1408_v7 = vsel %vm329_vm7, %v3646_v20, %v1407_v39  ;;  %v1396_v11 = vsel %vm329_vm7, %v3720_v51, %v1395_v59  ;;  %v1919_v49 = vsel %vm329_vm7, 0.0, %v1918_v43  ;;  %v2121_v58 = vperm.slane %v3617_v52, %v2936_v10 }
 0x25e   : > { %v1416_v35 = vperm.slane %v1408_v7, %v2869_v37  ;;  %1955 = vrot.lane.b32.xlu0 %v1919_v49, %s2614_s8  ;;  %v1404_v46 = vperm.slane %v1396_v11, %v2869_v37  ;;  %v1630_v45 = vrot.slane %v3734_v6, 4  ;;  %v1905_v11 = vperm.slane %v1897_v33, %v2936_v10 }
 0x25f   : > { %v1462_v49 = vsel %vm329_vm7, %v1461_v19, %v3659_v14  ;;  %v1689_v50 = vsel %vm329_vm7, %v3635_v18, %v1688_v1  ;;  %v2060_v18 = vrot.slane %v3665_v29, 4  ;;  %v1864_v52 = vrot.slane %v1849_v41, 4 }
 0x260   : > { %v1429_v27 = vrot.slane %v1416_v35, 4  ;;  %1747 = vrot.lane.b32.xlu2 %v1711_v57, %s2614_s8  ;;  %v1431_v3 = vrot.slane %v1404_v46, 4  ;;  %v1631_v39 = vsel %vm329_vm7, %v1630_v45, %v1613_v13  ;;  %v3787_v12 = vperm.slane %v1462_v49, %v2869_v37 }
 0x261   : > { %v3779_v22 = vperm.slane %v1631_v39, %v2936_v10  ;;  %v3791_v57 = vperm.slane %v1689_v50, %v2936_v10  ;;  %v2061_v54 = vsel %vm329_vm7, %v3652_v47, %v2060_v18  ;;  %v1865_v29 = vsel %vm329_vm7, 0.0, %v1864_v52 }
 0x262   : > { %v3745_v48 = vsel %vm329_vm7, %v1429_v27, %v1404_v46  ;;  %v3757_v59 = vpop.permute.xlu1 %1379  ;;  %v3769_v0 = vsel %vm329_vm7, %v1416_v35, %v1431_v3  ;;  %v1473_v46 = vrot.slane %v3787_v12, 4  ;;  %v3810_v60 = vperm.slane %v2061_v54, %v2936_v10 }
 0x263   : > { %v1449_v43 = vrot.slane %v3757_v59, 4  ;;  %v1654_v16 = vrot.slane %v3779_v22, 4  ;;  %v2130_v47 = vrot.slane %v2121_v58, 4  ;;  %v1405_v3 = vrot.slane %v3646_v20, 4 }
 0x264   : > { %2143 = vrot.lane.b32.xlu1 %v2073_v63, %s2613_s7  ;;  %v3771_v7 = vpop.permute.xlu0 %1371  ;;  %v1920_v63 = vrot.slane %v1905_v11, 4  ;;  %v1393_v19 = vrot.slane %v3720_v51, 4  ;;  %v1632_v33 = vrot.slane %v1613_v13, 4  ;;  %v1620_v50 = vrot.slane %v2927_v5, 4 }
 0x265   : > { %v1450_v35 = vsel %vm329_vm7, %v1449_v43, %v3771_v7  ;;  %v1655_v40 = vsel %vm329_vm7, 0.0, %v1654_v16  ;;  %v1406_v39 = vsel %vm329_vm7, %v1405_v3, %v3711_v17  ;;  %v1608_v18 = vrot.slane %v2953_v32, 4 }
 0x266   : > { %1931 = vrot.lane.b32.xlu0 %v1849_v41, %s2609_s30  ;;  %v3796_v27 = vperm.slane %v1450_v35, %v2869_v37  ;;  %v1921_v45 = vsel %vm329_vm7, 0.0, %v1920_v63  ;;  %v1633_v1 = vsel %vm329_vm7, %v3734_v6, %v1632_v33  ;;  %v1394_v20 = vsel %vm329_vm7, %v1393_v19, %v3703_v62 }
 0x267   : > { %v1412_v51 = vperm.slane %v1406_v39, %v2869_v37  ;;  %v1641_v13 = vperm.slane %v1633_v1, %v2936_v10  ;;  %v1400_v17 = vperm.slane %v1394_v20, %v2869_v37  ;;  %v1621_v62 = vsel %vm329_vm7, %v2931_v8, %v1620_v50 }
 0x268   : > { %2151 = vrot.lane.b32.xlu2 %v2075_v44, %s2612_s6  ;;  %v1474_v61 = vsel %vm329_vm7, %v1473_v46, %v3796_v27  ;;  %v2131_v44 = vsel %vm329_vm7, 0.0, %v2130_v47  ;;  %v1913_v5 = vperm.slane %v3742_v28, %v2936_v10  ;;  %v3851_v16 = vperm.slane %v1621_v62, %v2869_v37 }
 0x269   : > { %v3813_v42 = vperm.slane %v1474_v61, %v2936_v10  ;;  %v1417_v6 = vrot.slane %v1412_v51, 4  ;;  %v1609_v8 = vsel %vm329_vm7, %v2827_v23, %v1608_v18  ;;  %v1712_v47 = vrot.slane %v3791_v57, 4 }
 0x26a   : > { %v1642_v28 = vrot.slane %v3851_v16, 4  ;;  %v1617_v54 = vperm.slane %v1609_v8, %v2869_v37  ;;  %v1676_v19 = vrot.slane %v2924_v4, 4  ;;  %v1664_v1 = vrot.slane %v2959_v36, 4 }
 0x26b   : > { %v1497_v41 = vrot.slane %v3813_v42, 4  ;;  %v1418_v35 = vsel %vm329_vm7, %v1417_v6, %v1400_v17  ;;  %v1713_v3 = vsel %vm329_vm7, 0.0, %v1712_v47  ;;  %v1463_v50 = vrot.slane %v3659_v14, 4 }
 0x26c   : > { %1959 = vrot.lane.b32.xlu1 %v1905_v11, %s2609_s30  ;;  %v1857_v11 = vperm.slane %v3640_v38, %v2936_v10  ;;  %v3854_v46 = vperm.slane %v1418_v35, %v2936_v10  ;;  %v1677_v39 = vsel %vm329_vm7, %v2934_v9, %v1676_v19  ;;  %v1475_v9 = vrot.slane %v3796_v27, 4 }
 0x26d   : > { %v1498_v43 = vsel %vm329_vm7, 0.0, %v1497_v41  ;;  %v3888_v4 = vperm.slane %v1677_v39, %v2869_v37  ;;  %v1464_v62 = vsel %vm329_vm7, %v3682_v2, %v1463_v50  ;;  %v1644_v2 = vrot.slane %v1617_v54, 4 }
 0x26e   : > { %2175 = vrot.lane.b32.xlu0 %v2121_v58, %s2611_s5  ;;  %v1866_v49 = vrot.slane %v1857_v11, 4  ;;  %v2125_v58 = vperm.slane %v3620_v26, %v2936_v10  ;;  %v1441_v32 = vrot.slane %v3854_v46, 4  ;;  %v1472_v14 = vperm.slane %v1464_v62, %v2869_v37 }
 0x270   : > { %1751 = vrot.lane.b32.xlu2 %v3791_v57, %s2609_s30  ;;  %v1867_v38 = vsel %vm329_vm7, 0.0, %v1866_v49  ;;  %v2132_v52 = vrot.slane %v2125_v58, 4  ;;  %v1442_v61 = vsel %vm329_vm7, 0.0, %v1441_v32  ;;  %v1917_v57 = vperm.slane %v3748_v53, %v2936_v10 }
 0x271   : > { %v1665_v53 = vsel %vm329_vm7, %v2830_v24, %v1664_v1  ;;  %v1451_v24 = vrot.slane %v3771_v7, 4  ;;  %v1485_v8 = vrot.slane %v1472_v14, 4  ;;  %v1861_v32 = vperm.slane %v3649_v21, %v2936_v10 }
 0x272   : > { %v2133_v26 = vsel %vm329_vm7, 0.0, %v2132_v52  ;;  %v1673_v27 = vperm.slane %v1665_v53, %v2869_v37  ;;  %v1924_v35 = vrot.slane %v1917_v57, 4 }
 0x273   : > { %v1452_v18 = vsel %vm329_vm7, %v3757_v59, %v1451_v24  ;;  %v1645_v59 = vsel %vm329_vm7, %v3851_v16, %v1644_v2 }
 0x274   : > { %1719 = vrot.lane.b32.xlu1 %v1655_v40, %s2614_s8  ;;  %v1656_v40 = vrot.slane %v1641_v13, 4  ;;  %v1925_v7 = vsel %vm329_vm7, 0.0, %v1924_v35 }
 0x276   : > { %1935 = vrot.lane.b32.xlu0 %v1865_v29, %s2613_s7  ;;  %v1643_v29 = vsel %vm329_vm7, %v1642_v28, %v1617_v54  ;;  %v1657_v23 = vsel %vm329_vm7, 0.0, %v1656_v40 }
 0x277   : > { %v1649_v63 = vperm.slane %v1643_v29, %v2936_v10 }
 0x278   : > { %2155 = vrot.lane.b32.xlu2 %v3810_v60, %s2610_s4 }
 0x279   : > { %v1658_v49 = vrot.slane %v1649_v63, 4 }
 0x27c   : > { %1963 = vrot.lane.b32.xlu1 %v1921_v45, %s2613_s7  ;;  %v1922_v45 = vrot.slane %v1913_v5, 4 }
 0x27e   : > { %2179 = vrot.lane.b32.xlu0 %v2131_v44, %s2612_s6  ;;  %v1419_v44 = vrot.slane %v1400_v17, 4  ;;  %v1923_v33 = vsel %vm329_vm7, 0.0, %v1922_v45  ;;  %v1476_v17 = vsel %vm329_vm7, %v3787_v12, %v1475_v9  ;;  %v1868_v45 = vrot.slane %v1861_v32, 4 }
 0x27f   : > { %v1700_v9 = vrot.slane %v1673_v27, 4 }
 0x280   : > { %1534 = vrot.lane.b32.xlu2 %v1498_v43, %s2614_s8  ;;  %v2076_v43 = vrot.slane %v3810_v60, 4  ;;  %v1698_v60 = vrot.slane %v3888_v4, 4 }
 0x282   : > { %v1699_v6 = vsel %vm329_vm7, %v1698_v60, %v1673_v27 }
 0x283   : > { %v1705_v12 = vperm.slane %v1699_v6, %v2936_v10 }
 0x284   : > { %1723 = vrot.lane.b32.xlu1 %v1641_v13, %s2609_s30  ;;  %v2077_v13 = vsel %vm329_vm7, 0.0, %v2076_v43  ;;  %v1440_v43 = vperm.slane %v3769_v0, %v2936_v10 }
 0x285   : > { %v1714_v29 = vrot.slane %v1705_v12, 4 }
 0x286   : > { %1939 = vrot.lane.b32.xlu0 %v1857_v11, %s2611_s5  ;;  %v1420_v11 = vsel %vm329_vm7, %v1412_v51, %v1419_v44  ;;  %v1659_v51 = vsel %vm329_vm7, 0.0, %v1658_v49  ;;  %v1869_v44 = vsel %vm329_vm7, 0.0, %v1868_v45 }
 0x287   : > { %v1428_v36 = vperm.slane %v1420_v11, %v2936_v10 }
 0x288   : > { %1943 = vrot.lane.b32.xlu2 %v1867_v38, %s2612_s6 }
 0x289   : > { %v1443_v52 = vrot.slane %v1428_v36, 4 }
 0x28b   : > { %v1444_v40 = vsel %vm329_vm7, 0.0, %v1443_v52 }
 0x28c   : > { %1967 = vrot.lane.b32.xlu1 %v1913_v5, %s2611_s5  ;;  %v1460_v5 = vperm.slane %v1452_v18, %v2869_v37  ;;  %v1653_v37 = vperm.slane %v1645_v59, %v2936_v10 }
 0x28e   : > { %2183 = vrot.lane.b32.xlu0 %v2125_v58, %s2610_s4  ;;  %v1484_v58 = vperm.slane %v1476_v17, %v2936_v10  ;;  %v1486_v28 = vsel %vm329_vm7, %v1485_v8, %v1460_v5  ;;  %v1660_v6 = vrot.slane %v1653_v37, 4  ;;  %v1447_v8 = vrot.slane %v1440_v43, 4 }
 0x290   : > { %2187 = vrot.lane.b32.xlu2 %v2133_v26, %s2615_s9  ;;  %v1499_v54 = vrot.slane %v1484_v58, 4 }
 0x294   : > { %1506 = vrot.lane.b32.xlu1 %v1442_v61, %s2614_s8  ;;  %v1492_v61 = vperm.slane %v1486_v28, %v2936_v10 }
 0x296   : > { %1727 = vrot.lane.b32.xlu0 %v1657_v23, %s2613_s7  ;;  %v1500_v23 = vsel %vm329_vm7, 0.0, %v1499_v54  ;;  %v1501_v16 = vrot.slane %v1492_v61, 4 }
 0x298   : > { %1731 = vrot.lane.b32.xlu2 %v1649_v63, %s2611_s5  ;;  %v1715_v63 = vsel %vm329_vm7, 0.0, %v1714_v29  ;;  %v1502_v47 = vsel %vm329_vm7, 0.0, %v1501_v16 }
 0x29a   : > { %v3873_v41 = vpop.permute.xlu2 %2163 }
 0x29c   : > { %1755 = vrot.lane.b32.xlu1 %v1713_v3, %s2613_s7  ;;  %v1487_v3 = vrot.slane %v1460_v5, 4 }
 0x29e   : > { %1971 = vrot.lane.b32.xlu0 %v1923_v33, %s2612_s6  ;;  %v1436_v33 = vperm.slane %v3745_v48, %v2936_v10  ;;  %v1488_v39 = vsel %vm329_vm7, %v1472_v14, %v1487_v3  ;;  %v1701_v48 = vsel %vm329_vm7, %v3888_v4, %v1700_v9 }
 0x2a0   : > { %1975 = vrot.lane.b32.xlu2 %v1917_v57, %s2610_s4  ;;  %v1445_v27 = vrot.slane %v1436_v33, 4 }
 0x2a2   : > { %v3891_v20 = vpop.permute.xlu2 %1927  ;;  %v1446_v62 = vsel %vm329_vm7, 0.0, %v1445_v27 }
 0x2a3   : > { %v1982_v18 = vsel %vm497_vm9, %v3612_v56, %v3891_v20  ;;  %v1448_v20 = vsel %vm329_vm7, 0.0, %v1447_v8 }
 0x2a4   : > { %2159 = vrot.lane.b32.xlu1 %v2077_v13, %s2615_s9  ;;  %v1496_v13 = vperm.slane %v1488_v39, %v2936_v10 }
 0x2a6   : > { %1510 = vrot.lane.b32.xlu0 %v1428_v36, %s2609_s30  ;;  %v1503_v60 = vrot.slane %v1496_v13, 4 }
 0x2a8   : > { %1735 = vrot.lane.b32.xlu2 %v1659_v51, %s2612_s6  ;;  %v2197_v51 = vsel %vm497_vm9, %v3587_v25, %v3873_v41  ;;  %v1661_v25 = vsel %vm329_vm7, 0.0, %v1660_v6 }
 0x2aa   : > { %v3909_v38 = vpop.permute.xlu2 %2171 }
 0x2ac   : > { %1538 = vrot.lane.b32.xlu1 %v1484_v58, %s2609_s30  ;;  %s204_s30 = scalar_lea.vmem [#allocation8], %s2396_s23 }
 0x2ae   : > { %1759 = vrot.lane.b32.xlu0 %v1705_v12, %s2611_s5 }
 0x2b0   : > { %1979 = vrot.lane.b32.xlu2 %v1925_v7, %s2615_s9 }
 0x2b2   : > { %v3923_v26 = vpop.permute.xlu2 %2147 }
 0x2b4   : > { %1947 = vrot.lane.b32.xlu1 %v1861_v32, %s2610_s4 }
 0x2b6   : > { %1514 = vrot.lane.b32.xlu0 %v1444_v40, %s2613_s7 }
 0x2b8   : > { %1739 = vrot.lane.b32.xlu2 %v1653_v37, %s2610_s4 }
 0x2ba   : > { %v1748_v21 = vpop.permute.xlu2 %1747 }
 0x2bb   : > { %v1781_v53 = vsel %vm497_vm9, %v3697_v15, %v1748_v21  ;;  %v1504_v15 = vsel %vm329_vm7, 0.0, %v1503_v60 }
 0x2bc   : > { %1542 = vrot.lane.b32.xlu1 %v1500_v23, %s2613_s7 }
 0x2be   : > { %1763 = vrot.lane.b32.xlu0 %v1715_v63, %s2612_s6 }
 0x2c0   : > { %1550 = vrot.lane.b32.xlu2 %v1502_v47, %s2612_s6 }
 0x2c2   : > { %v2152_v19 = vpop.permute.xlu2 %2151 }
 0x2c4   : > { %1951 = vrot.lane.b32.xlu1 %v1869_v44, %s2615_s9 }
 0x2c5   : > { %v2140_v1 = vpop.permute.xlu0 %2139 }
 0x2c6   : > { %v2136_v57 = vpop.permute.xlu1 %2135  ;;  %1518 = vrot.lane.b32.xlu0 %v1436_v33, %s2611_s5 }
 0x2c7   : > { %v2190_v11 = vsel %vm497_vm9, %v3669_v30, %v2136_v57  ;;  %v1709_v30 = vperm.slane %v1701_v48, %v2936_v10 }
 0x2c8   : > { %1526 = vrot.lane.b32.xlu2 %v1440_v43, %s2610_s4  ;;  %v2191_v49 = vsel %vm499_vm10, %v2190_v11, %v2140_v1 }
 0x2c9   : > { %v1716_v12 = vrot.slane %v1709_v30, 4 }
 0x2ca   : > { %v1752_v36 = vpop.permute.xlu2 %1751 }
 0x2cb   : > { %v3960_v0 = vsel %vm499_vm10, %v1781_v53, %v1752_v36  ;;  %v1717_v52 = vsel %vm329_vm7, 0.0, %v1716_v12 }
 0x2cc   : > { %1546 = vrot.lane.b32.xlu1 %v1492_v61, %s2611_s5  ;;  %s2297_s5 = sshll.u32 %s2293_s28, 4  ;;  %s2298_s5 = int_to_ptr.hbm [resolvable:$true] %s2297_s5 }
 0x2cd   : > { %s2531_s7 = sshra.s32 %s2298_s5, 4  ;;  %s2532_s7 = int_to_ptr.hbm [resolvable:$true] %s2531_s7 }
 0x2ce   : > { %v2168_v17 = vpop.permute.xlu1 %2167  ;;  %1767 = vrot.lane.b32.xlu0 %v1709_v30, %s2610_s4  ;;  %s2533_s15 = scalar_lea.hbm %s2532_s7, 16  ;;  %p2538_p7 = scmp.lt.s32.totalorder %s2532_s7, %s4101_s3 }
 0x2cf   : > { %v2198_v4 = vsel %vm499_vm10, %v2197_v51, %v2168_v17  ;;  %p2534_p4 = scmp.ne.s32.totalorder %s2532_s7, %s2533_s15  ;;  %p2539_p8 = scmp.lt.s32.totalorder %s2537_s10, %s2533_s15 }
 0x2d0   : > { %v1956_v50 = vpop.permute.xlu0 %1955  ;;  %1558 = vrot.lane.b32.xlu2 %v1504_v15, %s2615_s9  ;;  %v2199_v24 = vsel %vm501_vm11, %v2198_v4, %v3909_v38 }
 0x2d1   : > { %v1989_v53 = vsel %vm497_vm9, %v3708_v31, %v1956_v50  ;;  %p2535_p5 = pnand %p2534_p4, %p2688_p9  ;;  %p2540_p10 = por %p2539_p8, %p2538_p7 }
 0x2d2   : > { %v3973_v58 = vpop.permute.xlu2 %2155 }
 0x2d3   : > { %p2536_p6 = pneg %p2535_p5 }
 0x2d4   : > { %1522 = vrot.lane.b32.xlu1 %v1446_v62, %s2612_s6  ;;  %s2280_s6 = scalar_lea.sflag [#allocation7], %s2711_s19 }
 0x2d5   : > { %p2541_p13 = pnand %p2540_p10, %p2536_p6 }
 0x2d6   : > { %v2144_v41 = vpop.permute.xlu1 %2143  ;;  %1743 = vrot.lane.b32.xlu0 %v1661_v25, %s2615_s9 }
 0x2d7   : > { %v2192_v35 = vsel %vm501_vm11, %v2191_v49, %v2144_v41 }
 0x2d8   : > { %v2193_v38 = vsel %vm503_vm12, %v2192_v35, %v3923_v26  ;;  %v1932_v14 = vpop.permute.xlu0 %1931  ;;  %v1288_v26 = vperm.slane %v3442_v34, %v2936_v10 }
 0x2d9   : > { %v1983_v7 = vsel %vm499_vm10, %v1982_v18, %v1932_v14  ;;  %v2194_v59 = vsel %vm505_vm13, %v2193_v38, %v2152_v19 }
 0x2da   : > { %v3986_v5 = vpop.permute.xlu2 %1534  ;;  %v1295_v40 = vrot.slane %v1288_v26, 4  ;;  %v2195_v31 = vsel %vm507_vm14, %v2194_v59, %v3973_v58 }
 0x2dc   : > { %1771 = vrot.lane.b32.xlu1 %v1717_v52, %s2615_s9  ;;  %v1296_v29 = vsel %vm329_vm7, 0.0, %v1295_v40 }
 0x2de   : > { %v1960_v2 = vpop.permute.xlu1 %1959  ;;  %1554 = vrot.lane.b32.xlu0 %v1496_v13, %s2610_s4 }
 0x2df   : > { %v1990_v36 = vsel %vm499_vm10, %v1989_v53, %v1960_v2 }
 0x2e0   : > { %v2176_v32 = vpop.permute.xlu0 %2175 }
 0x2e1   : > { %v2200_v19 = vsel %vm503_vm12, %v2199_v24, %v2176_v32 }
 0x2e2   : > { %v1944_v56 = vpop.permute.xlu2 %1943 }
 0x2e4   : > { %1530 = vrot.lane.b32.xlu1 %v1448_v20, %s2615_s9 }
 0x2e6   : > { %v1720_v28 = vpop.permute.xlu1 %1719  ;;  %1346 = vrot.lane.b32.xlu0 %v1288_v26, %s2610_s4  ;;  %s2295_s4 = sshll.u32 %s204_s30, 4  ;;  %s2296_s4 = int_to_ptr.vmem [resolvable:$true] %s2295_s4 }
 0x2e7   : > { %v1774_v10 = vsel %vm497_vm9, %v3779_v22, %v1720_v28 }
 0x2e8   : > { %v1936_v37 = vpop.permute.xlu0 %1935 }
 0x2e9   : > { %v1984_v54 = vsel %vm501_vm11, %v1983_v7, %v1936_v37 }
 0x2ea   : > { %v2188_v61 = vpop.permute.xlu2 %2187 }
 0x2ec   : > { %1350 = vrot.lane.b32.xlu1 %v1296_v29, %s2615_s9 }
 0x2ee   : > { %v1964_v21 = vpop.permute.xlu1 %1963 }
 0x2ef   : > { %v1991_v30 = vsel %vm501_vm11, %v1990_v36, %v1964_v21  ;;  %v1568_v21 = vsel %vm497_vm9, %v3813_v42, %v3986_v5 }
 0x2f0   : > { %v2180_v23 = vpop.permute.xlu0 %2179 }
 0x2f1   : > { %v2201_v33 = vsel %vm505_vm13, %v2200_v19, %v2180_v23 }
 0x2f2   : > { %v1732_v16 = vpop.permute.xlu2 %1731 }
 0x2f6   : > { %v1724_v34 = vpop.permute.xlu1 %1723 }
 0x2f7   : > { %v1775_v63 = vsel %vm499_vm10, %v1774_v10, %v1724_v34 }
 0x2f8   : > { %v1940_v47 = vpop.permute.xlu0 %1939 }
 0x2f9   : > { %v1985_v44 = vsel %vm503_vm12, %v1984_v54, %v1940_v47 }
 0x2fa   : > { %v1976_v45 = vpop.permute.xlu2 %1975  ;;  %v1986_v1 = vsel %vm505_vm13, %v1985_v44, %v1944_v56 }
 0x2fe   : > { %v1968_v3 = vpop.permute.xlu1 %1967 }
 0x2ff   : > { %v1992_v51 = vsel %vm503_vm12, %v1991_v30, %v1968_v3 }
 0x300   : > { %v2184_v39 = vpop.permute.xlu0 %2183 }
 0x301   : > { %v2202_v57 = vsel %vm507_vm14, %v2201_v33, %v2184_v39 }
 0x302   : > { %v2203_v43 = vsel %vm509_vm15, %v2202_v57, %v2188_v61  ;;  %v1736_v11 = vpop.permute.xlu2 %1735 }
 0x303   : > { %2205 = vst [vmem:[#allocation3 + $0x60] sm:$0xf] %v2203_v43 }
 0x306   : > { %v1507_v22 = vpop.permute.xlu1 %1506 }
 0x307   : > { %v1561_v42 = vsel %vm497_vm9, %v3854_v46, %v1507_v22 }
 0x308   : > { %v1728_v9 = vpop.permute.xlu0 %1727 }
 0x309   : > { %v1776_v13 = vsel %vm501_vm11, %v1775_v63, %v1728_v9 }
 0x30a   : > { %v1777_v49 = vsel %vm503_vm12, %v1776_v13, %v1732_v16  ;;  %v2224_v48 = vld [vmem:[#allocation3 + $0x60] sm:$0xff]  ;;  %v1980_v15 = vpop.permute.xlu2 %1979 }
 0x30b   : > { %2262 = vmatpush.msra.mxu1 %v2224_v48  ;;  %v1778_v40 = vsel %vm505_vm13, %v1777_v49, %v1736_v11  ;;  %v2616_v11 = vmov 0  }
 0x30c   : > { %2485 = vset.pattern.permute.xlu2 %v2616_v11  ;;  %2486 = vset.pattern.permute.xlu0 %v2616_v11 }
 0x30e   : > { %v1756_v60 = vpop.permute.xlu1 %1755 }
 0x30f   : > { %v1783_v23 = vsel %vm501_vm11, %v3960_v0, %v1756_v60 }
 0x310   : > { %v1972_v17 = vpop.permute.xlu0 %1971 }
 0x311   : > { %v1993_v4 = vsel %vm505_vm13, %v1992_v51, %v1972_v17 }
 0x312   : > { %v1994_v27 = vsel %vm507_vm14, %v1993_v4, %v1976_v45  ;;  %v1740_v52 = vpop.permute.xlu2 %1739 }
 0x313   : > { %v1995_v24 = vsel %vm509_vm15, %v1994_v27, %v1980_v15  ;;  %v1779_v54 = vsel %vm507_vm14, %v1778_v40, %v1740_v52  ;;  %v2215_v15 = vld [vmem:[#allocation3 + $0x88] sm:$0xff]  ;;  %v2213_v27 = vld [vmem:[#allocation3 + $0x70] sm:$0xff] }
 0x314   : > { %1997 = vst [vmem:[#allocation3 + $0x18] sm:$0xf] %v1995_v24  ;;  %v2211_v24 = vld [vmem:[#allocation3 + $0x20] sm:$0xff] }
 0x316   : > { %v2160_v6 = vpop.permute.xlu1 %2159 }
 0x317   : > { %v2196_v50 = vsel %vm509_vm15, %v2195_v31, %v2160_v6  ;;  %v2209_v6 = vld [vmem:[#allocation3 + $0x78] sm:$0xff] }
 0x318   : > { %2204 = vst [vmem:[#allocation3 + $0x68] sm:$0xf] %v2196_v50  ;;  %v1511_v62 = vpop.permute.xlu0 %1510  ;;  %v2207_v50 = vld [vmem:[#allocation3] sm:$0xff] }
 0x319   : > { %v1562_v0 = vsel %vm499_vm10, %v1561_v42, %v1511_v62  ;;  %v2214_v62 = vld [vmem:[#allocation3 + $0x80] sm:$0xff] }
 0x31a   : > { %v1551_v59 = vpop.permute.xlu2 %1550 }
 0x31b   : > { %v2222_v25 = vld [vmem:[#allocation3 + $0x18] sm:$0xff] }
 0x31c   : > { %2263 = vmatpush.msra.mxu1 %v2222_v25  ;;  %v2212_v25 = vld [vmem:[#allocation3 + $0x8] sm:$0xff] }
 0x31e   : > { %v1539_v41 = vpop.permute.xlu1 %1538 }
 0x31f   : > { %v2223_v35 = vld [vmem:[#allocation3 + $0x68] sm:$0xff]  ;;  %v1569_v16 = vsel %vm499_vm10, %v1568_v21, %v1539_v41  ;;  %v2210_v41 = vld [vmem:[#allocation3 + $0x58] sm:$0xff] }
 0x320   : > { %v1760_v12 = vpop.permute.xlu0 %1759  ;;  %2242 = vmatpush.msra.mxu0 %v2223_v35  ;;  %v2208_v35 = vld [vmem:[#allocation3 + $0x38] sm:$0xff] }
 0x321   : > { %v1784_v10 = vsel %vm503_vm12, %v1783_v23, %v1760_v12 }
 0x322   : > { %v1527_v37 = vpop.permute.xlu2 %1526 }
 0x326   : > { %v1948_v18 = vpop.permute.xlu1 %1947 }
 0x327   : > { %v1987_v2 = vsel %vm507_vm14, %v1986_v1, %v1948_v18  ;;  %v2225_v1 = vld [vmem:[%s4100_s2] sm:$0xff] }
 0x328   : > { %v1515_v38 = vpop.permute.xlu0 %1514  ;;  %2228 = vperm.xlu2 %2485, %v2225_v1  }
 0x329   : > { %v1563_v33 = vsel %vm501_vm11, %v1562_v0, %v1515_v38 }
 0x32a   : > { %v1559_v39 = vpop.permute.xlu2 %1558 }
 0x32e   : > { %v1543_v14 = vpop.permute.xlu1 %1542 }
 0x32f   : > { %v1570_v34 = vsel %vm501_vm11, %v1569_v16, %v1543_v14 }
 0x330   : > { %v1764_v7 = vpop.permute.xlu0 %1763 }
 0x331   : > { %v1785_v63 = vsel %vm505_vm13, %v1784_v10, %v1764_v7 }
 0x336   : > { %v1952_v8 = vpop.permute.xlu1 %1951 }
 0x337   : > { %v1988_v58 = vsel %vm509_vm15, %v1987_v2, %v1952_v8 }
 0x338   : > { %1996 = vst [vmem:[#allocation3 + $0x30] sm:$0xf] %v1988_v58  ;;  %v1519_v32 = vpop.permute.xlu0 %1518 }
 0x339   : > { %v1564_v46 = vsel %vm503_vm12, %v1563_v33, %v1519_v32 }
 0x33e   : > { %v1547_v56 = vpop.permute.xlu1 %1546 }
 0x33f   : > { %v2221_v20 = vld [vmem:[#allocation3 + $0x30] sm:$0xff]  ;;  %v1571_v47 = vsel %vm503_vm12, %v1570_v34, %v1547_v56 }
 0x340   : > { %v1768_v26 = vpop.permute.xlu0 %1767  ;;  %2243 = vmatpush.msra.mxu0 %v2221_v20  ;;  %v1572_v44 = vsel %vm505_vm13, %v1571_v47, %v1551_v59 }
 0x341   : > { %v1786_v45 = vsel %vm507_vm14, %v1785_v63, %v1768_v26 }
 0x346   : > { %v1523_v28 = vpop.permute.xlu1 %1522 }
 0x347   : > { %v1565_v9 = vsel %vm505_vm13, %v1564_v46, %v1523_v28 }
 0x348   : > { %v1744_v61 = vpop.permute.xlu0 %1743  ;;  %v1566_v49 = vsel %vm507_vm14, %v1565_v9, %v1527_v37 }
 0x349   : > { %v1780_v29 = vsel %vm509_vm15, %v1779_v54, %v1744_v61 }
 0x34a   : > { %1788 = vst [vmem:[#allocation3 + $0x10] sm:$0xf] %v1780_v29 }
 0x34e   : > { %v1772_v3 = vpop.permute.xlu1 %1771 }
 0x34f   : > { %v1787_v5 = vsel %vm509_vm15, %v1786_v45, %v1772_v3 }
 0x350   : > { %1789 = vst [vmem:[#allocation3 + $0x48] sm:$0xf] %v1787_v5  ;;  %v1555_v19 = vpop.permute.xlu0 %1554 }
 0x351   : > { %v1573_v57 = vsel %vm507_vm14, %v1572_v44, %v1555_v19  ;;  %v2219_v43 = vld [vmem:[#allocation3 + $0x10] sm:$0xff] }
 0x352   : > { %v1574_v22 = vsel %vm509_vm15, %v1573_v57, %v1559_v39  ;;  %2244 = vmatpush.msra.mxu0 %v2219_v43 }
 0x353   : > { %1576 = vst [vmem:[#allocation3 + $0x28] sm:$0xf] %v1574_v22 }
 0x356   : > { %v1531_v13 = vpop.permute.xlu1 %1530 }
 0x357   : > { %v1567_v48 = vsel %vm509_vm15, %v1566_v49, %v1531_v13  ;;  %v2220_v53 = vld [vmem:[#allocation3 + $0x48] sm:$0xff] }
 0x358   : > { %1575 = vst [vmem:[#allocation3 + $0x50] sm:$0xf] %v1567_v48  ;;  %2264 = vmatpush.msra.mxu1 %v2220_v53  ;;  %v1347_v60 = vpop.permute.xlu0 %1346 }
 0x359   : > { %v1365_v30 = vsel %vm507_vm14, %v3572_v55, %v1347_v60  ;;  %v2206_v55 = vld [vmem:[%s4099_s1] sm:$0xff] }
 0x35a   : > { %v2218_v36 = vld [vmem:[#allocation3 + $0x28] sm:$0xff] }
 0x35b   : > { %2265 = vmatpush.msra.mxu1 %v2218_v36 }
 0x35e   : > { %v1351_v51 = vpop.permute.xlu1 %1350 }
 0x35f   : > { %v1366_v17 = vsel %vm509_vm15, %v1365_v30, %v1351_v51  ;;  %v2217_v4 = vld [vmem:[#allocation3 + $0x50] sm:$0xff] }
 0x360   : > { %1368 = vst [vmem:[#allocation3 + $0x40] sm:$0xf] %v1366_v17  ;;  %2245 = vmatpush.msra.mxu0 %v2217_v4 }
 0x362   : > { %2246 = vmatpush.msra.mxu0 %v2215_v15 }
 0x364   : > { %2247 = vmatpush.msra.mxu0 %v2213_v27 }
 0x366   : > { %2248 = vmatpush.msra.mxu0 %v2211_v24 }
 0x367   : > { %v2216_v31 = vld [vmem:[#allocation3 + $0x40] sm:$0xff] }
 0x368   : > { %2249 = vmatpush.msra.mxu0 %v2209_v6  ;;  %2266 = vmatpush.msra.mxu1 %v2216_v31 }
 0x36a   : > { %2250 = vmatpush.msra.mxu0 %v2207_v50  ;;  %2267 = vmatpush.msra.mxu1 %v2214_v62 }
 0x36b   : > { %2397 = vmatmul.msk.f32.vlgmr.msra.gmra.mxu0 %vm2231_vm0, %v2206_v55 }
 0x36c   : > { %2268 = vmatpush.msra.mxu1 %v2212_v25 }
 0x36e   : > { %2269 = vmatpush.msra.mxu1 %v2210_v41 }
 0x370   : > { %2270 = vmatpush.msra.mxu1 %v2208_v35 }
 0x371   : > { %2398 = vmatmul.msk.f32.vlgmr.msra.gmra.mxu1 %vm2231_vm0, %v2206_v55 }
 0x382   : > { %v2229_v12 = vpop.permute.xlu2 %2228 }
 0x3e8   : > { %v2252_v18 = vpop.f32.mrf.mxu0 }
 0x3e9   : > { %v2253_v38 = vadd.f32 %v2252_v18, %v2229_v12 }
 0x3eb   : > { %v2275_v14 = vmax.f32 %v2253_v38, 0.0 }
 0x3ed   : > { %2277 = vst [vmem:[%s204_s30] sm:$0xff] %v2275_v14 }
 0x3ee   : > { %v2272_v7 = vpop.f32.mrf.mxu1 }
 0x3ef   : > { %v2273_v52 = vadd.f32 %v2272_v7, %v2229_v12 }
 0x3f1   : > { %v2276_v2 = vmax.f32 %v2273_v52, 0.0 }
 0x3f3   : > { %2278 = vst [vmem:[%s204_s30 + $0x8] sm:$0xff] %v2276_v2 }
 0x3f4   : > { %2544 = shalt.err (!%p2541_p13)
}
 0x3f5   : > { %2409 = dma.vmem_to_hbm [thread:$0]  (%p2688_p9), %s2296_s4, 256, %s2298_s5, %s2280_s6  }
 0x3f6 PF: > { %s2309_s19 = sand.u32 1, %s2579_s12   ;;  %p2416_p0 = pnand %p2390_p12, %p2695_p11 }
 0x3f7   : > { %s2310_s21 = scalar_lea.sflag [#allocation7], %s2309_s19 }
 0x3f8   : > { %p2417_p1 = pneg %p2416_p0 }
 0x3fa   : > { %2574 = dma.done.wait (%p2417_p1), %s2310_s21, 256  }
 0x3fb   : > { %2576 = vsyncadd (%p2417_p1), %s2310_s21, 4294967040  ;;  %s19_s17 = sadd.s32 1, %s2599_s17   ;;  %s4106_s12 = smov %s2583_s13 }
 0x3fc   : > { %p16_p2 = scmp.ge.s32.totalorder %s19_s17, 4   ;;  %s4107_s13 = smov %s2587_s14 }
 0x3fd   : > { %s4108_s14 = smov %s2693_s26  ;;  %s4109_s15 = smov %s2595_s16 }
 0x3fe   : > { %s4110_s16 = smov %s4112_s20  ;;  %18 = sbr.rel (!%p16_p2) target bundleno = 6 (0x6), region = 82 }
 0x403   :  { %2316 = vsyncpa [#allocation6], 1 }
 0x404   :  { %2318 = vsyncpa [#allocation6 + $0x1], 1 }
 0x405   :  { %2319 = vsyncpa [#allocation7], 1 }
 0x406   :  { %2321 = vsyncpa [#allocation7 + $0x1], 1 }
 0x407   :  { %2322 = vsyncmov [#allocation4] }
 0x40a   :  { %s2323_s25 = vpop.sfrf %2322 }
 0x40b   :  { %p2404_p9 = scmp.ne.s32.totalorder %s2323_s25, 0 }
 0x40d   :  { %2327 = shalt.err (%p2404_p9)  }

// kernel: tpu_custom_call.1
= control target key start
LH: loop header
LB: loop body
LE: loop exit
PB: predicated region body
PF: predicated region fallthrough
CT: control target
= control target key end

     0   :  { %8 = vsyncpa [#allocation6], 0  ;;  %s4098_s0 = inlined_call_operand.hbm [shape: f32[2,4,16,16], index: 0, kind: input, shape index: {}]   ;;  %s4099_s1 = inlined_call_operand.vmem [shape: f32[8,72], index: 1, kind: input, shape index: {}]   ;;  %s4100_s2 = inlined_call_operand.vmem [shape: f32[8,1], index: 2, kind: input, shape index: {}]   ;;  %s4101_s3 = inlined_call_operand.hbm [shape: f32[2,8,256], index: 3, kind: output, shape index: {}]  }
   0x1   :  { %10 = vsyncpa [#allocation6 + $0x1], 0 }
   0x2   :  { %11 = vsyncpa [#allocation7], 0 }
   0x3   :  { %13 = vsyncpa [#allocation7 + $0x1], 0  ;;  %s2637_s12 = smov 0   ;;  %s2639_s13 = smov 0  }
   0x4   :  { %s2641_s14 = smov 0   ;;  %s2643_s15 = smov 0  }
   0x5   :  { %s2645_s16 = smov 0   ;;  %s2647_s17 = smov 0  }
   0x6 LB: > { %s2387_s18 = sadd.s32 4294967295, %s2599_s17   ;;  %s2388_s19 = sadd.s32 4294967294, %s2599_s17   ;;  %s2599_s17 = sphi %s2647_s17, %s19_s17   ;;  %s2595_s16 = sphi %s2645_s16, %s4110_s16   ;;  %s2591_s15 = sphi %s2643_s15, %s4109_s15   ;;  %s2587_s14 = sphi %s2641_s14, %s4108_s14   ;;  %s2583_s13 = sphi %s2639_s13, %s4107_s13   ;;  %s2579_s12 = sphi %s2637_s12, %s4106_s12  }
   0x7   : > { %s31_s20 = sadd.s32 1, %s2595_s16  ;;  %s38_s21 = sadd.s32 1, %s2587_s14 }
   0x8   : > { %p33_p0 = scmp.ge.s32.totalorder %s31_s20, 2  ;;  %p45_p1 = scmp.ne.s32.totalorder %s2587_s14, %s2583_s13 }
   0x9   : > { %p46_p2 = scmp.eq.s32.totalorder %s2599_s17, 0  ;;  %p51_p3 = scmp.ne.s32.totalorder %s2583_s13, %s2579_s12 }
   0xa   : > { %s4112_s20 = smov (%p33_p0, %s31_s20), 0  ;;  %p52_p5 = scmp.eq.s32.totalorder %s2387_s18, 0 }
   0xb   : > { %p2678_p4 = por %p46_p2, %p45_p1  ;;  %s35_s23 = ssub.s32 %s2595_s16, %s4112_s20 }
   0xc   : > { %p119_p6 = scmp.eq.s32.totalorder %s2387_s18, 1  ;;  %p36_p7 = scmp.eq.s32.totalorder %s35_s23, 0 }
   0xd   : > { %p2684_p8 = por %p52_p5, %p51_p3  ;;  %p125_p10 = scmp.eq.s32.totalorder %s2388_s19, 1 }
   0xe   : > { %p2688_p9 = por %p119_p6, %p45_p1  ;;  %p2390_p12 = scmp.ge.s32.totalorder %s2599_s17, 2 }
   0xf   : > { %s2693_s26 = scalar_select %p36_p7, %s2587_s14, %s38_s21  }
  0x10   : > { %p2695_p11 = por %p125_p10, %p51_p3  ;;  %p2419_p13 = scmp.lt.s32.totalorder %s2599_s17, 2 }
  0x11   : > { %s151_s28 = sand.u32 1, %s2587_s14   ;;  %s2405_s30 = sshll.u32 %s2595_s16, 6 }
  0x12   : > { %s2391_s29 = sshll.u32 %s151_s28, 6  ;;  %s160_s6 = scalar_lea.hbm %s4098_s0, %s2405_s30 }
  0x13   : > { %s155_s7 = scalar_lea.vmem [#allocation5], %s2391_s29  ;;  %s161_s9 = sshll.u32 %s160_s6, 4  ;;  %s162_s9 = int_to_ptr.hbm [resolvable:$true] %s161_s9 }
  0x14   : > { %s163_s8 = sshll.u32 %s155_s7, 4  ;;  %p2412_p0 = pnand %p2419_p13, %p2678_p4  ;;  %s164_s8 = int_to_ptr.vmem [resolvable:$true] %s163_s8 }
  0x15   : > { %p2394_p1 = scmp.ge.s32.totalorder %s2599_s17, 1  ;;  %s152_s10 = scalar_lea.sflag [#allocation6], %s151_s28 }
  0x16   : > { %s2601_s11 = smov 128   ;;  %s2602_s18 = smov 8  }
  0x17   : > { %2414 = dma.hbm_to_vmem [thread:$0]  (!%p2412_p0), %s162_s9, 1024, %s164_s8, %s152_s10, %s2601_s11, %s2601_s11, %s2602_s18  }
  0x18   : > { %p171_p2 = scmp.lt.s32.totalorder %s2599_s17, 3 }
  0x1a   : > { %p172_p3 = pnand %p2394_p1, %p171_p2 }
  0x1b   : > { %s2711_s19 = sand.u32 (!%p172_p3), 1, %s2583_s13  }
  0x1c   : > { %175 = sbr.rel (%p172_p3) target bundleno = 1014 (0x3f6), region = 32  ;;  %s2395_s21 = sshll.u32 (!%p172_p3), %s2711_s19, 6 }
  0x1d   : > { %s178_s23 = scalar_lea.sflag (!%p172_p3), [#allocation6], %s2711_s19  ;;  %s2715_s29 = scalar_lea.vmem (!%p172_p3), [#allocation5], %s2395_s21 }
  0x21   : > { %2570 = dma.done.wait (%p2684_p8), %s178_s23, 1024  }
  0x22   : > { %2572 = vsyncadd (%p2684_p8), %s178_s23, 4294966272  ;;  %vm210_vm0 = vcmask 139264   ;;  %vm219_vm1 = vcmask 7168   ;;  %vm233_vm2 = vcmask 146568   ;;  %v2603_v0 = vmov 0.0   ;;  %v267_v1 = vld [vmem:[%s2715_s29 + $0x10] sm:$0xff] }
  0x23   : > { %213 = vst.msk [vmem:[#allocation2 + $0x30] sm:$0x1] %vm210_vm0, %v2603_v0  ;;  %v265_v2 = vld [vmem:[%s2715_s29] sm:$0xff]  ;;  %s2604_s22 = smov 1   ;;  %v268_v4 = vld [vmem:[%s2715_s29 + $0x18] sm:$0xff]  ;;  %v266_v5 = vld [vmem:[%s2715_s29 + $0x8] sm:$0xff] }
  0x24   : > { %227 = vst.msk [vmem:[#allocation2 + $0x30] sm:$0xff] %vm219_vm1, %v2603_v0  ;;  %285 = vrot.lane.b32.xlu1 %v267_v1, %s2604_s22  ;;  %281 = vrot.lane.b32.xlu0 %v265_v2, %s2604_s22  ;;  %v269_v3 = vld [vmem:[%s2715_s29 + $0x20] sm:$0xff]  ;;  %v270_v6 = vld [vmem:[%s2715_s29 + $0x28] sm:$0xff]  ;;  %vm222_vm3 = vcmask 1024   ;;  %vm236_vm4 = vcmask 140424   ;;  %vm305_vm5 = vcmask 138248  }
  0x25   : > { %228 = vst.msk [vmem:[#allocation2 + $0x38] sm:$0xff] %vm219_vm1, %v2603_v0  ;;  %289 = vrot.lane.b32.xlu2 %v269_v3, %s2604_s22  ;;  %v272_v7 = vld [vmem:[%s2715_s29 + $0x38] sm:$0xff]  ;;  %v271_v8 = vld [vmem:[%s2715_s29 + $0x30] sm:$0xff]  ;;  %s2605_s24 = smov 127   ;;  %vm1577_vm6 = vcmask 1045504   ;;  %s2606_s28 = smov 126  }
  0x26   : > { %241 = vst.msk [vmem:[#allocation2 + $0x30] sm:$0xff] %vm233_vm2, %v2603_v0  ;;  %v2607_v31 = vmov 1983009808   ;;  %vm329_vm7 = vcmask 1047556   ;;  %vm948_vm8 = vcmask 1046528   ;;  %s2609_s30 = smov 32  }
  0x27   : > { %242 = vst.msk [vmem:[#allocation2 + $0x38] sm:$0xff] %vm233_vm2, %v2603_v0  ;;  %v334_v32 = vunpack.c.l.s4 %v2607_v31  ;;  %v2608_v47 = vmov 1934713408   ;;  %s2610_s4 = smov 96   ;;  %s2611_s5 = smov 64   ;;  %vm497_vm9 = vcmask 130048  }
  0x28   : > { %211 = vst.msk [vmem:[#allocation2] sm:$0x1] %vm210_vm0, %v2603_v0  ;;  %v358_v48 = vunpack.c.l.s4 %v2608_v47  ;;  %s2612_s6 = smov 80   ;;  %s2613_s7 = smov 48   ;;  %vm499_vm10 = vcmask 261120   ;;  %vm501_vm11 = vcmask 392192  }
  0x29   : > { %212 = vst.msk [vmem:[#allocation2 + $0x18] sm:$0x1] %vm210_vm0, %v2603_v0  ;;  %v2869_v37 = vunpack.c.0.s8 %v334_v32  ;;  %s2614_s8 = smov 16   ;;  %s2615_s9 = smov 112   ;;  %vm503_vm12 = vcmask 523264   ;;  %vm505_vm13 = vcmask 654336  }
  0x2a   : > { %214 = vst.msk [vmem:[#allocation2 + $0x48] sm:$0x1] %vm210_vm0, %v2603_v0  ;;  %vm507_vm14 = vcmask 785408   ;;  %vm509_vm15 = vcmask 916480   ;;  %s2396_s23 = sshll.u32 %s2711_s19, 4  ;;  %s2406_s29 = sshll.u32 %s2591_s15, 4 }
  0x2b   : > { %215 = vst.msk [vmem:[#allocation2 + $0x11] sm:$0x1] %vm210_vm0, %v2603_v0  ;;  %s2537_s10 = scalar_lea.hbm %s4101_s3, 32 }
  0x2c   : > { %216 = vst.msk [vmem:[#allocation2 + $0x29] sm:$0x1] %vm210_vm0, %v2603_v0  ;;  %287 = vrot.lane.b32.xlu1 %v268_v4, %s2604_s22  ;;  %283 = vrot.lane.b32.xlu0 %v266_v5, %s2604_s22 }
  0x2d   : > { %217 = vst.msk [vmem:[#allocation2 + $0x41] sm:$0x1] %vm210_vm0, %v2603_v0  ;;  %291 = vrot.lane.b32.xlu2 %v270_v6, %s2604_s22 }
  0x2e   : > { %218 = vst.msk [vmem:[#allocation2 + $0x59] sm:$0x1] %vm210_vm0, %v2603_v0  ;;  %vm2231_vm0 = vcmask 588800  }
  0x2f   : > { %221 = vst.msk [vmem:[#allocation2 + $0x8] sm:$0xff] %vm219_vm1, %v2603_v0 }
  0x30   : > { %225 = vst.msk [vmem:[#allocation2 + $0x20] sm:$0xff] %vm219_vm1, %v2603_v0 }
  0x31   : > { %231 = vst.msk [vmem:[#allocation2 + $0x50] sm:$0xff] %vm219_vm1, %v2603_v0 }
  0x32   : > { %247 = vst [vmem:[#allocation3] sm:$0xf0] %v2603_v0 }
  0x33   : > { %248 = vst [vmem:[#allocation3 + $0x38] sm:$0xf0] %v2603_v0 }
  0x34   : > { %249 = vst [vmem:[#allocation3 + $0x78] sm:$0xf0] %v2603_v0  ;;  %295 = vrot.lane.b32.xlu1 %v272_v7, %s2604_s22  ;;  %293 = vrot.lane.b32.xlu0 %v271_v8, %s2604_s22 }
  0x35   : > { %250 = vst [vmem:[#allocation3 + $0x58] sm:$0xf0] %v2603_v0 }
  0x36   : > { %251 = vst [vmem:[#allocation3 + $0x20] sm:$0xf0] %v2603_v0 }
  0x37   : > { %252 = vst [vmem:[#allocation3 + $0x8] sm:$0xf0] %v2603_v0 }
  0x38   : > { %253 = vst [vmem:[#allocation3 + $0x70] sm:$0xf0] %v2603_v0 }
  0x39   : > { %254 = vst [vmem:[#allocation3 + $0x80] sm:$0xf0] %v2603_v0 }
  0x3a   : > { %255 = vst [vmem:[#allocation3 + $0x88] sm:$0xf0] %v2603_v0 }
  0x3b   : > { %256 = vst [vmem:[#allocation3 + $0x40] sm:$0xf0] %v2603_v0 }
  0x3c   : > { %257 = vst [vmem:[#allocation3 + $0x50] sm:$0xf0] %v2603_v0 }
  0x3d   : > { %258 = vst [vmem:[#allocation3 + $0x28] sm:$0xf0] %v2603_v0 }
  0x3e   : > { %259 = vst [vmem:[#allocation3 + $0x10] sm:$0xf0] %v2603_v0 }
  0x3f   : > { %260 = vst [vmem:[#allocation3 + $0x48] sm:$0xf0] %v2603_v0 }
  0x40   : > { %261 = vst [vmem:[#allocation3 + $0x30] sm:$0xf0] %v2603_v0 }
  0x41   : > { %262 = vst [vmem:[#allocation3 + $0x18] sm:$0xf0] %v2603_v0 }
  0x42   : > { %263 = vst [vmem:[#allocation3 + $0x68] sm:$0xf0] %v2603_v0 }
  0x43   : > { %264 = vst [vmem:[#allocation3 + $0x60] sm:$0xf0] %v2603_v0 }
  0x44   : > { %220 = vst.msk [vmem:[#allocation2] sm:$0xff] %vm219_vm1, %v2603_v0 }
  0x45   : > { %224 = vst.msk [vmem:[#allocation2 + $0x18] sm:$0xff] %vm219_vm1, %v2603_v0 }
  0x46   : > { %230 = vst.msk [vmem:[#allocation2 + $0x48] sm:$0xff] %vm219_vm1, %v2603_v0 }
  0x47   : > { %235 = vst.msk [vmem:[#allocation2 + $0x8] sm:$0xff] %vm233_vm2, %v2603_v0 }
  0x48   : > { %239 = vst.msk [vmem:[#allocation2 + $0x20] sm:$0xff] %vm233_vm2, %v2603_v0 }
  0x49   : > { %245 = vst.msk [vmem:[#allocation2 + $0x50] sm:$0xff] %vm233_vm2, %v2603_v0 }
  0x4a   : > { %238 = vst.msk [vmem:[#allocation2 + $0x18] sm:$0xff] %vm233_vm2, %v2603_v0 }
  0x4b   : > { %234 = vst.msk [vmem:[#allocation2] sm:$0xff] %vm233_vm2, %v2603_v0 }
  0x4c   : > { %244 = vst.msk [vmem:[#allocation2 + $0x48] sm:$0xff] %vm233_vm2, %v2603_v0 }
  0x4d   : > { %229 = vst.msk [vmem:[#allocation2 + $0x40] sm:$0x3] %vm222_vm3, %v2603_v0 }
  0x4e   : > { %243 = vst.msk [vmem:[#allocation2 + $0x40] sm:$0x3] %vm236_vm4, %v2603_v0 }
  0x4f   : > { %223 = vst.msk [vmem:[#allocation2 + $0x10] sm:$0x3] %vm222_vm3, %v2603_v0 }
  0x50   : > { %226 = vst.msk [vmem:[#allocation2 + $0x28] sm:$0x3] %vm222_vm3, %v2603_v0 }
  0x51   : > { %232 = vst.msk [vmem:[#allocation2 + $0x58] sm:$0x3] %vm222_vm3, %v2603_v0 }
  0x52   : > { %237 = vst.msk [vmem:[#allocation2 + $0x10] sm:$0x3] %vm236_vm4, %v2603_v0 }
  0x53   : > { %240 = vst.msk [vmem:[#allocation2 + $0x28] sm:$0x3] %vm236_vm4, %v2603_v0 }
  0x54   : > { %246 = vst.msk [vmem:[#allocation2 + $0x58] sm:$0x3] %vm236_vm4, %v2603_v0 }
  0x7f   : > { %v290_v9 = vpop.permute.xlu2 %289 }
  0x80   : > { %310 = vst.msk [vmem:[#allocation2 + $0x31] sm:$0xff] %vm305_vm5, %v290_v9 }
  0x87   : > { %v292_v10 = vpop.permute.xlu2 %291  ;;  %v2807_v13 = vld [vmem:[#allocation2 + $0x30] sm:$0xff] }
  0x88   : > { %311 = vst.msk [vmem:[#allocation2 + $0x39] sm:$0xff] %vm305_vm5, %v292_v10  ;;  %v1588_v20 = vrot.slane %v2807_v13, 2  ;;  %v328_v33 = vrot.slane %v2807_v13, 4  ;;  %v2936_v10 = vunpack.c.0.s8 %v358_v48 }
  0x8f   : > { %v2809_v14 = vld [vmem:[#allocation2 + $0x38] sm:$0xff]  ;;  %v2813_v18 = vld [vmem:[#allocation2 + $0x40] sm:$0x3] }
  0x90   : > { %v1589_v21 = vrot.slane %v2809_v14, 2  ;;  %v1591_v22 = vrot.slane %v2813_v18, 2  ;;  %v385_v55 = vrot.slane %v2809_v14, 4 }
  0x92   : > { %v2827_v23 = vsel %vm1577_vm6, %v1588_v20, %v1589_v21  ;;  %v2830_v24 = vsel %vm1577_vm6, %v1589_v21, %v1591_v22 }
  0x96   : > { %v286_v11 = vpop.permute.xlu1 %285  ;;  %v282_v12 = vpop.permute.xlu0 %281 }
  0x97   : > { %308 = vst.msk [vmem:[#allocation2 + $0x19] sm:$0xff] %vm305_vm5, %v286_v11 }
  0x98   : > { %306 = vst.msk [vmem:[#allocation2 + $0x1] sm:$0xff] %vm305_vm5, %v282_v12 }
  0x9e   : > { %v288_v15 = vpop.permute.xlu1 %287  ;;  %v284_v16 = vpop.permute.xlu0 %283  ;;  %v2811_v17 = vld [vmem:[#allocation2 + $0x18] sm:$0xff] }
  0x9f   : > { %309 = vst.msk [vmem:[#allocation2 + $0x21] sm:$0xff] %vm305_vm5, %v288_v15  ;;  %532 = vrot.lane.b32.xlu0 %v2811_v17, %s2605_s24  ;;  %v2818_v19 = vld [vmem:[#allocation2] sm:$0xff]  ;;  %v343_v38 = vrot.slane %v2811_v17, 4  ;;  %v954_v46 = vrot.slane %v2811_v17, 1  ;;  %v1583_v61 = vrot.slane %v2811_v17, 2 }
  0xa0   : > { %307 = vst.msk [vmem:[#allocation2 + $0x9] sm:$0xff] %vm305_vm5, %v284_v16  ;;  %528 = vrot.lane.b32.xlu1 %v2818_v19, %s2605_s24  ;;  %v331_v34 = vrot.slane %v2818_v19, 4  ;;  %v330_v39 = vsel %vm329_vm7, %v328_v33, %v2818_v19  ;;  %v949_v48 = vrot.slane %v2818_v19, 1 }
  0xa1   : > { %v2888_v51 = vperm.slane %v330_v39, %v2869_v37 }
  0xa2   : > { %v332_v44 = vsel %vm329_vm7, %v2807_v13, %v331_v34 }
  0xa3   : > { %v340_v54 = vperm.slane %v332_v44, %v2869_v37  ;;  %v355_v2 = vrot.slane %v2888_v51, 4 }
  0xa5   : > { %v367_v6 = vrot.slane %v340_v54, 4 }
  0xa6   : > { %v296_v25 = vpop.permute.xlu1 %295  ;;  %v294_v26 = vpop.permute.xlu0 %293  ;;  %v2832_v27 = vld [vmem:[#allocation2 + $0x20] sm:$0xff]  ;;  %v2874_v40 = vld [vmem:[#allocation2 + $0x28] sm:$0x3] }
  0xa7   : > { %313 = vst.msk [vmem:[#allocation2 + $0x51] sm:$0xff] %vm305_vm5, %v296_v25  ;;  %538 = vrot.lane.b32.xlu0 %v2809_v14, %s2605_s24  ;;  %v2837_v28 = vld [vmem:[#allocation2 + $0x8] sm:$0xff]  ;;  %v318_v35 = vld [vmem:[#allocation2 + $0x10] sm:$0x3]  ;;  %v955_v43 = vrot.slane %v2832_v27, 1  ;;  %v1584_v52 = vrot.slane %v2832_v27, 2 }
  0xa8   : > { %312 = vst.msk [vmem:[#allocation2 + $0x49] sm:$0xff] %vm305_vm5, %v294_v26  ;;  %530 = vrot.lane.b32.xlu2 %v2837_v28, %s2605_s24  ;;  %534 = vrot.lane.b32.xlu1 %v2832_v27, %s2605_s24  ;;  %v950_v41 = vrot.slane %v2837_v28, 1  ;;  %v952_v42 = vrot.slane %v318_v35, 1  ;;  %v1586_v53 = vrot.slane %v2874_v40, 2  ;;  %v399_v56 = vrot.slane %v2832_v27, 4 }
  0xa9   : > { %v2904_v59 = vsel %vm948_vm8, %v954_v46, %v955_v43  ;;  %v2927_v5 = vsel %vm1577_vm6, %v1583_v61, %v1584_v52  ;;  %v387_v7 = vrot.slane %v2837_v28, 4  ;;  %v386_v12 = vsel %vm329_vm7, %v385_v55, %v2837_v28 }
  0xaa   : > { %v2899_v58 = vsel %vm948_vm8, %v950_v41, %v952_v42  ;;  %v2924_v4 = vsel %vm1577_vm6, %v1584_v52, %v1586_v53  ;;  %v1579_v20 = vrot.slane %v2837_v28, 2  ;;  %v1581_v21 = vrot.slane %v318_v35, 2 }
  0xab   : > { %v392_v26 = vperm.slane %v386_v12, %v2869_v37  ;;  %v388_v31 = vsel %vm329_vm7, %v2809_v14, %v387_v7  ;;  %v2980_v53 = vsel %vm948_vm8, %v949_v48, %v950_v41  ;;  %v991_v12 = vrot.slane %v2904_v59, 4 }
  0xac   : > { %v396_v39 = vperm.slane %v388_v31, %v2869_v37 }
  0xad   : > { %v411_v42 = vrot.slane %v392_v26, 4 }
  0xae   : > { %v2880_v45 = vld [vmem:[#allocation2 + $0x58] sm:$0x3] }
  0xaf   : > { %738 = vrot.lane.b32.xlu0 %v2837_v28, %s2606_s28  ;;  %v2846_v29 = vld [vmem:[#allocation2 + $0x48] sm:$0xff]  ;;  %v2854_v30 = vld [vmem:[#allocation2 + $0x50] sm:$0xff]  ;;  %v1596_v57 = vrot.slane %v2880_v45, 2 }
  0xb0   : > { %536 = vrot.lane.b32.xlu2 %v2807_v13, %s2605_s24  ;;  %540 = vrot.lane.b32.xlu1 %v2846_v29, %s2605_s24  ;;  %v341_v36 = vrot.slane %v2846_v29, 4  ;;  %v344_v50 = vsel %vm329_vm7, %v2846_v29, %v343_v38  ;;  %v400_v63 = vsel %vm329_vm7, %v2854_v30, %v399_v56  ;;  %v1593_v0 = vrot.slane %v2846_v29, 2 }
  0xb1   : > { %v352_v62 = vperm.slane %v344_v50, %v2869_v37  ;;  %v1594_v1 = vrot.slane %v2854_v30, 2  ;;  %v397_v3 = vrot.slane %v2854_v30, 4  ;;  %v408_v15 = vperm.slane %v400_v63, %v2869_v37 }
  0xb2   : > { %v342_v49 = vsel %vm329_vm7, %v341_v36, %v2811_v17  ;;  %v2959_v36 = vsel %vm1577_vm6, %v1579_v20, %v1581_v21  ;;  %v964_v56 = vrot.slane %v2846_v29, 1  ;;  %v965_v28 = vrot.slane %v2854_v30, 1 }
  0xb3   : > { %v2907_v60 = vperm.slane %v342_v49, %v2869_v37  ;;  %v2931_v8 = vsel %vm1577_vm6, %v1593_v0, %v1594_v1  ;;  %v2934_v9 = vsel %vm1577_vm6, %v1594_v1, %v1596_v57  ;;  %v368_v16 = vsel %vm329_vm7, %v352_v62, %v367_v6 }
  0xb4   : > { %v398_v22 = vsel %vm329_vm7, %v397_v3, %v2832_v27  ;;  %v2956_v33 = vperm.slane %v368_v16, %v2936_v10  ;;  %v421_v34 = vrot.slane %v408_v15, 4  ;;  %v365_v38 = vrot.slane %v352_v62, 4 }
  0xb5   : > { %v356_v11 = vsel %vm329_vm7, %v2907_v60, %v355_v2  ;;  %v404_v35 = vperm.slane %v398_v22, %v2869_v37  ;;  %v957_v57 = vrot.slane %v2874_v40, 1  ;;  %v2994_v63 = vsel %vm948_vm8, %v964_v56, %v965_v28 }
  0xb6   : > { %v364_v25 = vperm.slane %v356_v11, %v2936_v10  ;;  %v422_v44 = vsel %vm329_vm7, %v421_v34, %v396_v39  ;;  %v366_v47 = vsel %vm329_vm7, %v365_v38, %v340_v54  ;;  %v959_v54 = vrot.slane %v2807_v13, 1 }
  0xb7   : > { %744 = vrot.lane.b32.xlu0 %v2807_v13, %s2606_s28  ;;  %v412_v46 = vsel %vm329_vm7, %v404_v35, %v411_v42  ;;  %v428_v49 = vperm.slane %v422_v44, %v2936_v10  ;;  %v372_v52 = vperm.slane %v366_v47, %v2936_v10  ;;  %v409_v55 = vrot.slane %v404_v35, 4 }
  0xb8   : > { %542 = vrot.lane.b32.xlu2 %v2854_v30, %s2605_s24  ;;  %740 = vrot.lane.b32.xlu1 %v2811_v17, %s2606_s28  ;;  %v1578_v17 = vrot.slane %v2818_v19, 2  ;;  %v2974_v50 = vperm.slane %v412_v46, %v2936_v10  ;;  %v379_v61 = vrot.slane %v364_v25, 4  ;;  %v989_v40 = vrot.slane %v2994_v63, 4 }
  0xb9   : > { %v381_v41 = vrot.slane %v372_v52, 4  ;;  %v410_v62 = vsel %vm329_vm7, %v409_v55, %v392_v26  ;;  %v423_v2 = vrot.slane %v396_v39, 4  ;;  %v437_v6 = vrot.slane %v428_v49, 4 }
  0xba   : > { %v2953_v32 = vsel %vm1577_vm6, %v1578_v17, %v1579_v20  ;;  %v3001_v13 = vperm.slane %v410_v62, %v2936_v10  ;;  %v990_v11 = vsel %vm329_vm7, %v989_v40, %v2904_v59  ;;  %v992_v22 = vsel %vm329_vm7, %v2994_v63, %v991_v12 }
  0xbb   : > { %v424_v7 = vsel %vm329_vm7, %v408_v15, %v423_v2  ;;  %v996_v15 = vperm.slane %v990_v11, %v2869_v37  ;;  %v353_v31 = vrot.slane %v2907_v60, 4  ;;  %v962_v34 = vrot.slane %v2813_v18, 1 }
  0xbc   : > { %v433_v3 = vrot.slane %v3001_v13, 4  ;;  %v432_v21 = vperm.slane %v424_v7, %v2936_v10  ;;  %v979_v35 = vrot.slane %v2980_v53, 4  ;;  %v1035_v39 = vrot.slane %v2899_v58, 4 }
  0xbd   : > { %v1000_v44 = vperm.slane %v992_v22, %v2869_v37  ;;  %v354_v48 = vsel %vm329_vm7, %v353_v31, %v2888_v51 }
  0xbe   : > { %v434_v20 = vsel %vm329_vm7, 0.0, %v433_v3  ;;  %v439_v42 = vrot.slane %v432_v21, 4 }
  0xbf   : > { %750 = vrot.lane.b32.xlu0 %v2854_v30, %s2606_s28  ;;  %v380_v30 = vsel %vm329_vm7, 0.0, %v379_v61 }
  0xc0   : > { %736 = vrot.lane.b32.xlu2 %v2818_v19, %s2606_s28  ;;  %746 = vrot.lane.b32.xlu1 %v2809_v14, %s2606_s28  ;;  %v960_v19 = vrot.slane %v2809_v14, 1  ;;  %v382_v14 = vsel %vm329_vm7, 0.0, %v381_v41 }
  0xc2   : > { %v2997_v0 = vsel %vm948_vm8, %v959_v54, %v960_v19  ;;  %v1013_v54 = vrot.slane %v1000_v44, 4 }
  0xc3   : > { %v977_v1 = vrot.slane %v2997_v0, 4  ;;  %v980_v60 = vsel %vm329_vm7, %v2997_v0, %v979_v35 }
  0xc7   : > { %1163 = vrot.lane.b32.xlu0 %v2899_v58, %s2605_s24 }
  0xc8   : > { %742 = vrot.lane.b32.xlu2 %v2832_v27, %s2606_s28  ;;  %1165 = vrot.lane.b32.xlu1 %v2904_v59, %s2605_s24  ;;  %v967_v27 = vrot.slane %v2880_v45, 1 }
  0xca   : > { %v3025_v17 = vsel %vm948_vm8, %v965_v28, %v967_v27  ;;  %v988_v28 = vperm.slane %v980_v60, %v2869_v37 }
  0xcb   : > { %v1045_v18 = vrot.slane %v3025_v17, 4 }
  0xcc   : > { %v1014_v61 = vsel %vm329_vm7, %v1013_v54, %v988_v28 }
  0xcf   : > { %446 = vrot.lane.b32.xlu0 %v364_v25, %s2609_s30  ;;  %v438_v25 = vsel %vm329_vm7, 0.0, %v437_v6 }
  0xd0   : > { %748 = vrot.lane.b32.xlu2 %v2846_v29, %s2606_s28  ;;  %462 = vrot.lane.b32.xlu1 %v2956_v33, %s2610_s4  ;;  %v3006_v29 = vsel %vm948_vm8, %v955_v43, %v957_v57  ;;  %v978_v43 = vsel %vm329_vm7, %v977_v1, %v2980_v53  ;;  %v1020_v1 = vperm.slane %v1014_v61, %v2936_v10 }
  0xd1   : > { %v984_v16 = vperm.slane %v978_v43, %v2869_v37  ;;  %v1047_v45 = vrot.slane %v3006_v29, 4  ;;  %v1046_v41 = vsel %vm329_vm7, %v1045_v18, %v3006_v29  ;;  %v1001_v43 = vrot.slane %v996_v15, 4 }
  0xd3   : > { %v1048_v26 = vsel %vm329_vm7, %v3025_v17, %v1047_v45  ;;  %v1003_v38 = vrot.slane %v984_v16, 4  ;;  %v1029_v45 = vrot.slane %v1020_v1, 4 }
  0xd4   : > { %v1056_v47 = vperm.slane %v1048_v26, %v2869_v37 }
  0xd5   : > { %v1004_v46 = vsel %vm329_vm7, %v996_v15, %v1003_v38  ;;  %v1030_v26 = vsel %vm329_vm7, 0.0, %v1029_v45 }
  0xd6   : > { %v3056_v55 = vperm.slane %v1004_v46, %v2936_v10  ;;  %v1069_v51 = vrot.slane %v1056_v47, 4 }
  0xd7   : > { %482 = vrot.lane.b32.xlu0 %v428_v49, %s2611_s5  ;;  %v3049_v49 = vsel %vm948_vm8, %v960_v19, %v962_v34  ;;  %v3062_v19 = vperm.slane %v354_v48, %v2936_v10 }
  0xd8   : > { %1161 = vrot.lane.b32.xlu2 %v2980_v53, %s2605_s24  ;;  %474 = vrot.lane.b32.xlu1 %v2974_v50, %s2609_s30  ;;  %v1036_v56 = vsel %vm329_vm7, %v3049_v49, %v1035_v39  ;;  %v1033_v40 = vrot.slane %v3049_v49, 4  ;;  %v435_v39 = vrot.slane %v2974_v50, 4 }
  0xd9   : > { %v1044_v57 = vperm.slane %v1036_v56, %v2869_v37 }
  0xda   : > { %v1034_v2 = vsel %vm329_vm7, %v1033_v40, %v2899_v58  ;;  %v436_v18 = vsel %vm329_vm7, 0.0, %v435_v39 }
  0xdb   : > { %v1070_v62 = vsel %vm329_vm7, %v1069_v51, %v1044_v57  ;;  %v1071_v7 = vrot.slane %v1044_v57, 4  ;;  %v1040_v11 = vperm.slane %v1034_v2, %v2869_v37  ;;  %v1027_v2 = vrot.slane %v3056_v55, 4 }
  0xdc   : > { %v3078_v27 = vperm.slane %v1070_v62, %v2936_v10 }
  0xdd   : > { %v1072_v12 = vsel %vm329_vm7, %v1056_v47, %v1071_v7  ;;  %v1059_v60 = vrot.slane %v1040_v11, 4  ;;  %v1028_v7 = vsel %vm329_vm7, 0.0, %v1027_v2 }
  0xde   : > { %v1080_v15 = vperm.slane %v1072_v12, %v2936_v10 }
  0xdf   : > { %458 = vrot.lane.b32.xlu0 %v382_v14, %s2612_s6  ;;  %v377_v14 = vrot.slane %v3062_v19, 4 }
  0xe0   : > { %1167 = vrot.lane.b32.xlu2 %v3006_v29, %s2605_s24  ;;  %450 = vrot.lane.b32.xlu1 %v380_v30, %s2613_s7  ;;  %v1052_v30 = vperm.slane %v1046_v41, %v2869_v37  ;;  %v1087_v61 = vrot.slane %v1080_v15, 4 }
  0xe1   : > { %v378_v3 = vsel %vm329_vm7, 0.0, %v377_v14 }
  0xe2   : > { %v1057_v6 = vrot.slane %v1052_v30, 4  ;;  %v1060_v50 = vsel %vm329_vm7, %v1052_v30, %v1059_v60  ;;  %v1088_v14 = vsel %vm329_vm7, 0.0, %v1087_v61 }
  0xe3   : > { %v1068_v56 = vperm.slane %v1060_v50, %v2936_v10 }
  0xe4   : > { %v1058_v22 = vsel %vm329_vm7, %v1057_v6, %v1040_v11 }
  0xe5   : > { %v3100_v34 = vperm.slane %v1058_v22, %v2936_v10  ;;  %v1083_v57 = vrot.slane %v1068_v56, 4 }
  0xe7   : > { %470 = vrot.lane.b32.xlu0 %v434_v20, %s2614_s8  ;;  %v383_v20 = vrot.slane %v2956_v33, 4  ;;  %v1015_v33 = vrot.slane %v988_v28, 4  ;;  %v1081_v38 = vrot.slane %v3100_v34, 4  ;;  %v1084_v62 = vsel %vm329_vm7, 0.0, %v1083_v57 }
  0xe8   : > { %454 = vrot.lane.b32.xlu2 %v372_v52, %s2611_s5  ;;  %486 = vrot.lane.b32.xlu1 %v438_v25, %s2612_s6  ;;  %v440_v52 = vsel %vm329_vm7, 0.0, %v439_v42 }
  0xe9   : > { %v384_v31 = vsel %vm329_vm7, 0.0, %v383_v20  ;;  %v1016_v42 = vsel %vm329_vm7, %v1000_v44, %v1015_v33  ;;  %v1082_v48 = vsel %vm329_vm7, 0.0, %v1081_v38 }
  0xea   : > { %v1024_v47 = vperm.slane %v1016_v42, %v2936_v10 }
  0xec   : > { %v1031_v54 = vrot.slane %v1024_v47, 4 }
  0xee   : > { %v1032_v44 = vsel %vm329_vm7, 0.0, %v1031_v54 }
  0xef   : > { %494 = vrot.lane.b32.xlu0 %v440_v52, %s2615_s9 }
  0xf0   : > { %490 = vrot.lane.b32.xlu2 %v432_v21, %s2610_s4  ;;  %1094 = vrot.lane.b32.xlu1 %v3056_v55, %s2609_s30  ;;  %v1002_v21 = vsel %vm329_vm7, %v1001_v43, %v984_v16 }
  0xf1   : > { %v3094_v25 = vperm.slane %v1002_v21, %v2936_v10 }
  0xf3   : > { %v1025_v35 = vrot.slane %v3094_v25, 4 }
  0xf5   : > { %v1026_v46 = vsel %vm329_vm7, 0.0, %v1025_v35 }
  0xf7   : > { %1102 = vrot.lane.b32.xlu0 %v1020_v1, %s2611_s5 }
  0xf8   : > { %1130 = vrot.lane.b32.xlu1 %v3078_v27, %s2611_s5  ;;  %442 = vrot.lane.b32.xlu2 %v378_v3, %s2614_s8 }
  0xff   : > { %1138 = vrot.lane.b32.xlu0 %v1080_v15, %s2610_s4 }
 0x100   : > { %1106 = vrot.lane.b32.xlu1 %v1030_v26, %s2612_s6  ;;  %466 = vrot.lane.b32.xlu2 %v384_v31, %s2615_s9  ;;  %v1085_v31 = vrot.slane %v3078_v27, 4 }
 0x102   : > { %v3104_v16 = vpop.permute.xlu2 %530  ;;  %v1086_v27 = vsel %vm329_vm7, 0.0, %v1085_v31 }
 0x103   : > { %v610_v35 = vrot.slane %v3104_v16, 4 }
 0x107   : > { %1090 = vrot.lane.b32.xlu0 %v1026_v46, %s2614_s8 }
 0x108   : > { %1118 = vrot.lane.b32.xlu1 %v1082_v48, %s2614_s8  ;;  %478 = vrot.lane.b32.xlu2 %v436_v18, %s2613_s7 }
 0x10a   : > { %v537_v52 = vpop.permute.xlu2 %536 }
 0x10b   : > { %v552_v43 = vrot.slane %v537_v52, 4 }
 0x10f   : > { %1114 = vrot.lane.b32.xlu0 %v1032_v44, %s2615_s9 }
 0x110   : > { %1171 = vrot.lane.b32.xlu1 %v3049_v49, %s2605_s24  ;;  %1110 = vrot.lane.b32.xlu2 %v1024_v47, %s2610_s4 }
 0x111   : > { %v533_v51 = vpop.permute.xlu0 %532 }
 0x112   : > { %v3124_v28 = vpop.permute.xlu2 %542  ;;  %v529_v41 = vpop.permute.xlu1 %528  ;;  %v566_v11 = vrot.slane %v533_v51, 4 }
 0x113   : > { %v553_v3 = vsel %vm329_vm7, %v552_v43, %v529_v41  ;;  %v554_v12 = vrot.slane %v529_v41, 4 }
 0x114   : > { %v3145_v20 = vperm.slane %v553_v3, %v2869_v37 }
 0x115   : > { %v555_v38 = vsel %vm329_vm7, %v537_v52, %v554_v12  ;;  %v620_v12 = vrot.slane %v3124_v28, 4 }
 0x116   : > { %v578_v42 = vrot.slane %v3145_v20, 4  ;;  %v563_v60 = vperm.slane %v555_v38, %v2869_v37 }
 0x117   : > { %1126 = vrot.lane.b32.xlu0 %v1084_v62, %s2613_s7 }
 0x118   : > { %1142 = vrot.lane.b32.xlu1 %v1088_v14, %s2615_s9  ;;  %1122 = vrot.lane.b32.xlu2 %v1068_v56, %s2609_s30 }
 0x119   : > { %v539_v30 = vpop.permute.xlu0 %538 }
 0x11a   : > { %v3131_v40 = vpop.permute.xlu2 %736  ;;  %v3133_v1 = vpop.permute.xlu1 %534  ;;  %v611_v18 = vsel %vm329_vm7, %v539_v30, %v610_v35  ;;  %v608_v62 = vrot.slane %v539_v30, 4 }
 0x11b   : > { %v622_v6 = vrot.slane %v3133_v1, 4  ;;  %v619_v44 = vperm.slane %v611_v18, %v2869_v37  ;;  %v762_v14 = vrot.slane %v3131_v40, 4 }
 0x11c   : > { %v609_v30 = vsel %vm329_vm7, %v608_v62, %v3104_v16 }
 0x11d   : > { %v623_v22 = vsel %vm329_vm7, %v3124_v28, %v622_v6  ;;  %v646_v3 = vrot.slane %v619_v44, 4 }
 0x11e   : > { %v631_v46 = vperm.slane %v623_v22, %v2869_v37 }
 0x11f   : > { %1169 = vrot.lane.b32.xlu0 %v2997_v0, %s2605_s24 }
 0x120   : > { %1098 = vrot.lane.b32.xlu2 %v1028_v7, %s2613_s7  ;;  %v644_v57 = vrot.slane %v631_v46, 4 }
 0x121   : > { %v3142_v45 = vpop.permute.xlu0 %738 }
 0x122   : > { %v3147_v55 = vpop.permute.xlu2 %742  ;;  %v541_v21 = vpop.permute.xlu1 %540  ;;  %v645_v7 = vsel %vm329_vm7, %v644_v57, %v619_v44 }
 0x123   : > { %v564_v15 = vrot.slane %v541_v21, 4  ;;  %v567_v26 = vsel %vm329_vm7, %v541_v21, %v566_v11  ;;  %v818_v21 = vrot.slane %v3142_v45, 4 }
 0x124   : > { %v575_v33 = vperm.slane %v567_v26, %v2869_v37  ;;  %v590_v26 = vrot.slane %v563_v60, 4 }
 0x125   : > { %v565_v39 = vsel %vm329_vm7, %v564_v15, %v533_v51  ;;  %v3197_v15 = vperm.slane %v645_v7, %v2936_v10 }
 0x126   : > { %v3160_v47 = vperm.slane %v565_v39, %v2869_v37  ;;  %v588_v48 = vrot.slane %v575_v33, 4  ;;  %v647_v39 = vsel %vm329_vm7, %v631_v46, %v646_v3  ;;  %v591_v18 = vsel %vm329_vm7, %v575_v33, %v590_v26 }
 0x127   : > { %1175 = vrot.lane.b32.xlu0 %v3025_v17, %s2605_s24 }
 0x128   : > { %1134 = vrot.lane.b32.xlu2 %v1086_v27, %s2612_s6  ;;  %v579_v52 = vsel %vm329_vm7, %v3160_v47, %v578_v42  ;;  %v589_v41 = vsel %vm329_vm7, %v588_v48, %v563_v60  ;;  %v615_v42 = vperm.slane %v609_v30, %v2869_v37  ;;  %v621_v60 = vsel %vm329_vm7, %v620_v12, %v3133_v1 }
 0x129   : > { %v745_v54 = vpop.permute.xlu0 %744  ;;  %v3171_v50 = vperm.slane %v579_v52, %v2936_v10  ;;  %v3183_v43 = vperm.slane %v589_v41, %v2936_v10  ;;  %v3211_v52 = vperm.slane %v647_v39, %v2936_v10  ;;  %v3215_v41 = vperm.slane %v591_v18, %v2936_v10 }
 0x12a   : > { %v3174_v56 = vpop.permute.xlu2 %748  ;;  %v741_v51 = vpop.permute.xlu1 %740  ;;  %v763_v11 = vsel %vm329_vm7, %v745_v54, %v762_v14  ;;  %v760_v27 = vrot.slane %v745_v54, 4  ;;  %v634_v1 = vrot.slane %v615_v42, 4  ;;  %v627_v62 = vperm.slane %v621_v60, %v2869_v37 }
 0x12b   : > { %v774_v61 = vrot.slane %v741_v51, 4  ;;  %669 = vrot.lane.b32.xlu1 %v3171_v50, %s2609_s30  ;;  %v771_v31 = vperm.slane %v763_v11, %v2869_v37 }
 0x12c   : > { %v761_v54 = vsel %vm329_vm7, %v760_v27, %v3131_v40 }
 0x12d   : > { %v775_v2 = vsel %vm329_vm7, %v3174_v56, %v774_v61  ;;  %v798_v44 = vrot.slane %v771_v31, 4  ;;  %v830_v61 = vrot.slane %v3147_v55, 4  ;;  %v3244_v26 = vperm.slane %v761_v54, %v2869_v37 }
 0x12e   : > { %v783_v6 = vperm.slane %v775_v2, %v2869_v37 }
 0x12f   : > { %677 = vrot.lane.b32.xlu0 %v3183_v43, %s2611_s5  ;;  %v786_v18 = vrot.slane %v3244_v26, 4 }
 0x130   : > { %1173 = vrot.lane.b32.xlu2 %v2994_v63, %s2605_s24  ;;  %v796_v16 = vrot.slane %v783_v6, 4 }
 0x131   : > { %v751_v22 = vpop.permute.xlu0 %750 }
 0x132   : > { %v747_v35 = vpop.permute.xlu1 %746  ;;  %v3200_v38 = vpop.permute.xlu2 %1161  ;;  %v797_v57 = vsel %vm329_vm7, %v796_v16, %v771_v31  ;;  %v828_v14 = vrot.slane %v751_v22, 4  ;;  %v831_v2 = vsel %vm329_vm7, %v751_v22, %v830_v61  ;;  %v635_v22 = vsel %vm329_vm7, %v627_v62, %v634_v1 }
 0x133   : > { %v816_v48 = vrot.slane %v747_v35, 4  ;;  %v819_v28 = vsel %vm329_vm7, %v747_v35, %v818_v21  ;;  %705 = vrot.lane.b32.xlu1 %v3197_v15, %s2611_s5  ;;  %v3232_v7 = vperm.slane %v797_v57, %v2936_v10  ;;  %v799_v21 = vsel %vm329_vm7, %v783_v6, %v798_v44 }
 0x134   : > { %v827_v46 = vperm.slane %v819_v28, %v2869_v37  ;;  %v829_v31 = vsel %vm329_vm7, %v828_v14, %v3147_v55  ;;  %v3253_v35 = vperm.slane %v799_v21, %v2936_v10  ;;  %v3257_v6 = vperm.slane %v635_v22, %v2936_v10 }
 0x135   : > { %v817_v33 = vsel %vm329_vm7, %v816_v48, %v3142_v45  ;;  %v772_v45 = vrot.slane %v3174_v56, 4  ;;  %v839_v56 = vperm.slane %v831_v2, %v2869_v37  ;;  %v576_v28 = vrot.slane %v3160_v47, 4 }
 0x136   : > { %v3236_v11 = vperm.slane %v817_v33, %v2869_v37  ;;  %v854_v30 = vrot.slane %v827_v46, 4  ;;  %v3266_v55 = vperm.slane %v829_v31, %v2869_v37  ;;  %v632_v61 = vrot.slane %v627_v62, 4 }
 0x137   : > { %713 = vrot.lane.b32.xlu0 %v3211_v52, %s2610_s4  ;;  %v773_v39 = vsel %vm329_vm7, %v772_v45, %v741_v51  ;;  %v577_v1 = vsel %vm329_vm7, %v576_v28, %v3145_v20  ;;  %v604_v2 = vrot.slane %v3183_v43, 4  ;;  %v852_v62 = vrot.slane %v839_v56, 4 }
 0x138   : > { %685 = vrot.lane.b32.xlu2 %v3215_v41, %s2610_s4  ;;  %v855_v16 = vsel %vm329_vm7, %v839_v56, %v854_v30  ;;  %v842_v48 = vrot.slane %v3236_v11, 4  ;;  %v779_v51 = vperm.slane %v773_v39, %v2869_v37  ;;  %v3289_v45 = vperm.slane %v577_v1, %v2936_v10 }
 0x139   : > { %v3229_v3 = vpop.permute.xlu0 %1163  ;;  %v3272_v60 = vperm.slane %v855_v16, %v2936_v10  ;;  %v633_v30 = vsel %vm329_vm7, %v632_v61, %v615_v42  ;;  %v605_v31 = vsel %vm329_vm7, 0.0, %v604_v2  ;;  %v853_v56 = vsel %vm329_vm7, %v852_v62, %v827_v46 }
 0x13a   : > { %v3238_v40 = vpop.permute.xlu1 %1165  ;;  %v3240_v12 = vpop.permute.xlu2 %1167  ;;  %v843_v47 = vsel %vm329_vm7, %v3266_v55, %v842_v48  ;;  %v787_v33 = vsel %vm329_vm7, %v779_v51, %v786_v18  ;;  %v600_v43 = vrot.slane %v3289_v45, 4  ;;  %v3303_v39 = vperm.slane %v633_v30, %v2936_v10 }
 0x13b   : > { %885 = vrot.lane.b32.xlu1 %v3232_v7, %s2611_s5  ;;  %v3282_v54 = vperm.slane %v843_v47, %v2936_v10  ;;  %v3285_v14 = vperm.slane %v787_v33, %v2936_v10  ;;  %v3309_v16 = vperm.slane %v853_v56, %v2936_v10  ;;  %v606_v61 = vrot.slane %v3215_v41, 4 }
 0x13c   : > { %v601_v42 = vsel %vm329_vm7, 0.0, %v600_v43  ;;  %v656_v48 = vrot.slane %v3303_v39, 4  ;;  %v784_v33 = vrot.slane %v779_v51, 4  ;;  %v602_v2 = vrot.slane %v3171_v50, 4 }
 0x13d   : > { %v662_v41 = vrot.slane %v3211_v52, 4 }
 0x13e   : > { %v657_v46 = vsel %vm329_vm7, 0.0, %v656_v48  ;;  %v785_v50 = vsel %vm329_vm7, %v784_v33, %v3244_v26  ;;  %v658_v48 = vrot.slane %v3257_v6, 4  ;;  %v660_v26 = vrot.slane %v3197_v15, 4 }
 0x13f   : > { %893 = vrot.lane.b32.xlu0 %v3253_v35, %s2610_s4  ;;  %v663_v52 = vsel %vm329_vm7, 0.0, %v662_v41 }
 0x140   : > { %697 = vrot.lane.b32.xlu2 %v3257_v6, %s2609_s30  ;;  %v661_v6 = vsel %vm329_vm7, 0.0, %v660_v26 }
 0x141   : > { %v447_v27 = vpop.permute.xlu0 %446 }
 0x142   : > { %v463_v44 = vpop.permute.xlu1 %462  ;;  %v455_v57 = vpop.permute.xlu2 %454 }
 0x143   : > { %921 = vrot.lane.b32.xlu1 %v3272_v60, %s2610_s4 }
 0x147   : > { %905 = vrot.lane.b32.xlu0 %v3282_v54, %s2609_s30 }
 0x148   : > { %877 = vrot.lane.b32.xlu2 %v3285_v14, %s2609_s30 }
 0x149   : > { %v3296_v20 = vpop.permute.xlu0 %482 }
 0x14a   : > { %v475_v21 = vpop.permute.xlu1 %474  ;;  %v3298_v22 = vpop.permute.xlu2 %490 }
 0x14b   : > { %681 = vrot.lane.b32.xlu1 %v605_v31, %s2612_s6  ;;  %v607_v31 = vsel %vm329_vm7, 0.0, %v606_v61  ;;  %v840_v61 = vrot.slane %v3266_v55, 4 }
 0x14f   : > { %665 = vrot.lane.b32.xlu0 %v601_v42, %s2614_s8 }
 0x150   : > { %913 = vrot.lane.b32.xlu2 %v3309_v16, %s2611_s5 }
 0x151   : > { %v459_v28 = vpop.permute.xlu0 %458 }
 0x152   : > { %v451_v18 = vpop.permute.xlu1 %450  ;;  %v443_v47 = vpop.permute.xlu2 %442 }
 0x153   : > { %v498_v1 = vsel %vm497_vm9, %v3062_v19, %v443_v47  ;;  %693 = vrot.lane.b32.xlu1 %v657_v46, %s2614_s8  ;;  %v603_v19 = vsel %vm329_vm7, 0.0, %v602_v2  ;;  %v659_v47 = vsel %vm329_vm7, 0.0, %v658_v48 }
 0x154   : > { %v500_v62 = vsel %vm499_vm10, %v498_v1, %v447_v27 }
 0x155   : > { %v502_v30 = vsel %vm501_vm11, %v500_v62, %v451_v18  ;;  %v3336_v18 = vperm.slane %v785_v50, %v2936_v10 }
 0x156   : > { %v504_v43 = vsel %vm503_vm12, %v502_v30, %v455_v57  ;;  %v810_v30 = vrot.slane %v3285_v14, 4  ;;  %v814_v14 = vrot.slane %v3253_v35, 4 }
 0x157   : > { %689 = vrot.lane.b32.xlu0 %v607_v31, %s2615_s9  ;;  %v506_v51 = vsel %vm505_vm13, %v504_v43, %v459_v28  ;;  %v808_v46 = vrot.slane %v3336_v18, 4  ;;  %v841_v43 = vsel %vm329_vm7, %v840_v61, %v3236_v11 }
 0x158   : > { %673 = vrot.lane.b32.xlu2 %v603_v19, %s2613_s7  ;;  %v508_v42 = vsel %vm507_vm14, %v506_v51, %v463_v44  ;;  %v811_v19 = vsel %vm329_vm7, 0.0, %v810_v30 }
 0x159   : > { %v471_v27 = vpop.permute.xlu0 %470  ;;  %v809_v62 = vsel %vm329_vm7, 0.0, %v808_v46 }
 0x15a   : > { %v487_v56 = vpop.permute.xlu1 %486  ;;  %v467_v57 = vpop.permute.xlu2 %466  ;;  %v511_v44 = vsel %vm497_vm9, %v3001_v13, %v471_v27  ;;  %v812_v13 = vrot.slane %v3232_v7, 4 }
 0x15b   : > { %v510_v28 = vsel %vm509_vm15, %v508_v42, %v467_v57  ;;  %717 = vrot.lane.b32.xlu1 %v663_v52, %s2615_s9  ;;  %v512_v15 = vsel %vm499_vm10, %v511_v44, %v475_v21  ;;  %v866_v57 = vrot.slane %v3282_v54, 4 }
 0x15c   : > { %518 = vst [vmem:[#allocation3] sm:$0xf] %v510_v28  ;;  %v813_v7 = vsel %vm329_vm7, 0.0, %v812_v13 }
 0x15f   : > { %701 = vrot.lane.b32.xlu0 %v659_v47, %s2613_s7  ;;  %v867_v47 = vsel %vm329_vm7, 0.0, %v866_v57 }
 0x160   : > { %709 = vrot.lane.b32.xlu2 %v661_v6, %s2612_s6 }
 0x161   : > { %v495_v33 = vpop.permute.xlu0 %494 }
 0x162   : > { %v1095_v1 = vpop.permute.xlu1 %1094  ;;  %v479_v2 = vpop.permute.xlu2 %478 }
 0x163   : > { %v513_v31 = vsel %vm501_vm11, %v512_v15, %v479_v2  ;;  %873 = vrot.lane.b32.xlu1 %v809_v62, %s2614_s8 }
 0x164   : > { %v514_v55 = vsel %vm503_vm12, %v513_v31, %v3296_v20  ;;  %v3368_v20 = vperm.slane %v841_v43, %v2936_v10 }
 0x165   : > { %v515_v41 = vsel %vm505_vm13, %v514_v55, %v487_v56  ;;  %v868_v56 = vrot.slane %v3309_v16, 4  ;;  %v870_v16 = vrot.slane %v3272_v60, 4 }
 0x166   : > { %v516_v21 = vsel %vm507_vm14, %v515_v41, %v3298_v22  ;;  %v815_v22 = vsel %vm329_vm7, 0.0, %v814_v14  ;;  %v864_v35 = vrot.slane %v3368_v20, 4  ;;  %v1199_v41 = vrot.slane %v3238_v40, 4 }
 0x167   : > { %v517_v51 = vsel %vm509_vm15, %v516_v21, %v495_v33  ;;  %881 = vrot.lane.b32.xlu0 %v811_v19, %s2613_s7  ;;  %v869_v42 = vsel %vm329_vm7, 0.0, %v868_v56  ;;  %v871_v46 = vsel %vm329_vm7, 0.0, %v870_v16 }
 0x168   : > { %519 = vst [vmem:[#allocation3 + $0x38] sm:$0xf] %v517_v51  ;;  %889 = vrot.lane.b32.xlu2 %v813_v7, %s2612_s6  ;;  %v865_v52 = vsel %vm329_vm7, 0.0, %v864_v35 }
 0x169   : > { %v1103_v11 = vpop.permute.xlu0 %1102 }
 0x16a   : > { %v1131_v50 = vpop.permute.xlu1 %1130  ;;  %v1111_v27 = vpop.permute.xlu2 %1110 }
 0x16b   : > { %897 = vrot.lane.b32.xlu1 %v815_v22, %s2615_s9 }
 0x16f   : > { %917 = vrot.lane.b32.xlu0 %v869_v42, %s2612_s6  ;;  %v1187_v42 = vrot.slane %v3200_v38, 4 }
 0x170   : > { %901 = vrot.lane.b32.xlu2 %v865_v52, %s2614_s8  ;;  %v1243_v52 = vrot.slane %v3229_v3, 4 }
 0x171   : > { %v1139_v48 = vpop.permute.xlu0 %1138 }
 0x172   : > { %v1107_v28 = vpop.permute.xlu1 %1106  ;;  %v1123_v26 = vpop.permute.xlu2 %1122 }
 0x173   : > { %909 = vrot.lane.b32.xlu1 %v867_v47, %s2613_s7 }
 0x178   : > { %925 = vrot.lane.b32.xlu2 %v871_v46, %s2615_s9 }
 0x179   : > { %v1091_v54 = vpop.permute.xlu0 %1090 }
 0x17a   : > { %v1145_v44 = vsel %vm497_vm9, %v3094_v25, %v1091_v54  ;;  %v1119_v6 = vpop.permute.xlu1 %1118  ;;  %v1099_v61 = vpop.permute.xlu2 %1098 }
 0x17b   : > { %v1146_v33 = vsel %vm499_vm10, %v1145_v44, %v1095_v1  ;;  %v1152_v25 = vsel %vm497_vm9, %v3100_v34, %v1119_v6 }
 0x17c   : > { %v1147_v15 = vsel %vm501_vm11, %v1146_v33, %v1099_v61  ;;  %v1153_v1 = vsel %vm499_vm10, %v1152_v25, %v1123_v26 }
 0x17d   : > { %v1148_v2 = vsel %vm503_vm12, %v1147_v15, %v1103_v11 }
 0x17e   : > { %v1149_v62 = vsel %vm505_vm13, %v1148_v2, %v1107_v28 }
 0x17f   : > { %v1150_v60 = vsel %vm507_vm14, %v1149_v62, %v1111_v27 }
 0x181   : > { %v1115_v30 = vpop.permute.xlu0 %1114 }
 0x182   : > { %v1151_v31 = vsel %vm509_vm15, %v1150_v60, %v1115_v30  ;;  %v1135_v13 = vpop.permute.xlu2 %1134  ;;  %v1172_v55 = vpop.permute.xlu1 %1171 }
 0x183   : > { %1159 = vst [vmem:[#allocation3 + $0x70] sm:$0xf] %v1151_v31  ;;  %v1241_v28 = vrot.slane %v1172_v55, 4  ;;  %v1244_v46 = vsel %vm329_vm7, %v1172_v55, %v1243_v52 }
 0x184   : > { %v1252_v2 = vperm.slane %v1244_v46, %v2869_v37 }
 0x185   : > { %v1242_v33 = vsel %vm329_vm7, %v1241_v28, %v3229_v3 }
 0x186   : > { %v1248_v3 = vperm.slane %v1242_v33, %v2869_v37 }
 0x189   : > { %v1127_v43 = vpop.permute.xlu0 %1126 }
 0x18a   : > { %v1154_v21 = vsel %vm501_vm11, %v1153_v1, %v1127_v43  ;;  %v1174_v19 = vpop.permute.xlu2 %1173  ;;  %v1143_v27 = vpop.permute.xlu1 %1142 }
 0x18b   : > { %v1155_v14 = vsel %vm503_vm12, %v1154_v21, %v1131_v50  ;;  %v1197_v51 = vrot.slane %v1174_v19, 4  ;;  %v1200_v11 = vsel %vm329_vm7, %v1174_v19, %v1199_v41  ;;  %v1279_v19 = vrot.slane %v1252_v2, 4 }
 0x18c   : > { %v1156_v7 = vsel %vm505_vm13, %v1155_v14, %v1135_v13  ;;  %v1208_v35 = vperm.slane %v1200_v11, %v2869_v37  ;;  %v1267_v11 = vrot.slane %v1248_v3, 4 }
 0x18d   : > { %v1157_v22 = vsel %vm507_vm14, %v1156_v7, %v1139_v48  ;;  %v1198_v56 = vsel %vm329_vm7, %v1197_v51, %v3238_v40 }
 0x18e   : > { %v1158_v34 = vsel %vm509_vm15, %v1157_v22, %v1143_v27  ;;  %v1204_v50 = vperm.slane %v1198_v56, %v2869_v37  ;;  %v1221_v48 = vrot.slane %v1208_v35, 4 }
 0x18f   : > { %1160 = vst [vmem:[#allocation3 + $0x80] sm:$0xf] %v1158_v34 }
 0x190   : > { %v1209_v54 = vrot.slane %v1204_v50, 4 }
 0x191   : > { %v1170_v57 = vpop.permute.xlu0 %1169 }
 0x192   : > { %v1185_v26 = vrot.slane %v1170_v57, 4  ;;  %v1188_v47 = vsel %vm329_vm7, %v1170_v57, %v1187_v42  ;;  %v3429_v55 = vpop.permute.xlu2 %685 }
 0x193   : > { %v1196_v16 = vperm.slane %v1188_v47, %v2869_v37 }
 0x194   : > { %v1186_v40 = vsel %vm329_vm7, %v1185_v26, %v3200_v38  ;;  %v1255_v38 = vrot.slane %v3240_v12, 4 }
 0x195   : > { %v1192_v44 = vperm.slane %v1186_v40, %v2869_v37  ;;  %v1223_v6 = vrot.slane %v1196_v16, 4  ;;  %v1222_v61 = vsel %vm329_vm7, %v1221_v48, %v1196_v16 }
 0x196   : > { %v1228_v15 = vperm.slane %v1222_v61, %v2936_v10 }
 0x197   : > { %v1211_v62 = vrot.slane %v1192_v44, 4  ;;  %v1224_v30 = vsel %vm329_vm7, %v1208_v35, %v1223_v6  ;;  %v1210_v60 = vsel %vm329_vm7, %v1209_v54, %v1192_v44 }
 0x198   : > { %1310 = vrot.lane.b32.xlu1 %v1228_v15, %s2611_s5  ;;  %v1232_v31 = vperm.slane %v1224_v30, %v2936_v10  ;;  %v3426_v13 = vperm.slane %v1210_v60, %v2936_v10  ;;  %v1237_v40 = vrot.slane %v1228_v15, 4 }
 0x199   : > { %v1176_v25 = vpop.permute.xlu0 %1175  ;;  %v1212_v43 = vsel %vm329_vm7, %v1204_v50, %v1211_v62 }
 0x19a   : > { %v1253_v1 = vrot.slane %v1176_v25, 4  ;;  %v1256_v41 = vsel %vm329_vm7, %v1176_v25, %v1255_v38  ;;  %1318 = vrot.lane.b32.xlu0 %v1232_v31, %s2610_s4  ;;  %v1220_v21 = vperm.slane %v1212_v43, %v2936_v10  ;;  %v1233_v51 = vrot.slane %v3426_v13, 4  ;;  %v698_v28 = vpop.permute.xlu2 %697 }
 0x19b   : > { %v1264_v14 = vperm.slane %v1256_v41, %v2869_v37  ;;  %v1239_v26 = vrot.slane %v1232_v31, 4  ;;  %v1238_v61 = vsel %vm329_vm7, 0.0, %v1237_v40 }
 0x19c   : > { %v1254_v7 = vsel %vm329_vm7, %v1253_v1, %v3240_v12  ;;  %1302 = vrot.lane.b32.xlu2 %v1220_v21, %s2609_s30  ;;  %v1234_v35 = vsel %vm329_vm7, 0.0, %v1233_v51  ;;  %v1235_v16 = vrot.slane %v1220_v21, 4 }
 0x19d   : > { %v1260_v27 = vperm.slane %v1254_v7, %v2869_v37  ;;  %v1277_v22 = vrot.slane %v1264_v14, 4  ;;  %v3442_v34 = vsel %vm329_vm7, %v1264_v14, %v1279_v19  ;;  %v670_v56 = vpop.permute.xlu1 %669  ;;  %v1240_v46 = vsel %vm329_vm7, 0.0, %v1239_v26 }
 0x19e   : > { %v1236_v6 = vsel %vm329_vm7, 0.0, %v1235_v16 }
 0x19f   : > { %v1268_v42 = vsel %vm329_vm7, %v1260_v27, %v1267_v11  ;;  %v1278_v50 = vsel %vm329_vm7, %v1277_v22, %v1252_v2  ;;  %v1265_v47 = vrot.slane %v1260_v27, 4 }
 0x1a0   : > { %1298 = vrot.lane.b32.xlu1 %v1234_v35, %s2614_s8  ;;  %v1276_v12 = vperm.slane %v1268_v42, %v2936_v10  ;;  %v1284_v52 = vperm.slane %v1278_v50, %v2936_v10 }
 0x1a1   : > { %v678_v57 = vpop.permute.xlu0 %677  ;;  %v1266_v54 = vsel %vm329_vm7, %v1265_v47, %v1248_v3 }
 0x1a2   : > { %1330 = vrot.lane.b32.xlu0 %v1276_v12, %s2609_s30  ;;  %v1291_v33 = vrot.slane %v1276_v12, 4  ;;  %v3459_v2 = vperm.slane %v1266_v54, %v2936_v10  ;;  %v878_v62 = vpop.permute.xlu2 %877  ;;  %v1293_v15 = vrot.slane %v1284_v52, 4 }
 0x1a4   : > { %1338 = vrot.lane.b32.xlu2 %v1284_v52, %s2611_s5  ;;  %v1292_v60 = vsel %vm329_vm7, 0.0, %v1291_v33  ;;  %v1289_v38 = vrot.slane %v3459_v2, 4  ;;  %v1294_v3 = vsel %vm329_vm7, 0.0, %v1293_v15 }
 0x1a5   : > { %v706_v48 = vpop.permute.xlu1 %705 }
 0x1a6   : > { %v1290_v25 = vsel %vm329_vm7, 0.0, %v1289_v38 }
 0x1a8   : > { %1322 = vrot.lane.b32.xlu1 %v1240_v46, %s2615_s9 }
 0x1a9   : > { %v714_v44 = vpop.permute.xlu0 %713 }
 0x1aa   : > { %1306 = vrot.lane.b32.xlu0 %v1236_v6, %s2613_s7  ;;  %v3471_v1 = vpop.permute.xlu2 %913 }
 0x1ac   : > { %1314 = vrot.lane.b32.xlu2 %v1238_v61, %s2612_s6 }
 0x1ad   : > { %v886_v30 = vpop.permute.xlu1 %885 }
 0x1b0   : > { %1334 = vrot.lane.b32.xlu1 %v1292_v60, %s2613_s7 }
 0x1b1   : > { %v894_v31 = vpop.permute.xlu0 %893 }
 0x1b2   : > { %1342 = vrot.lane.b32.xlu0 %v1294_v3, %s2612_s6  ;;  %v674_v19 = vpop.permute.xlu2 %673 }
 0x1b4   : > { %1326 = vrot.lane.b32.xlu2 %v1290_v25, %s2614_s8 }
 0x1b5   : > { %v3469_v43 = vpop.permute.xlu1 %921 }
 0x1b8   : > { %2010 = vrot.lane.b32.xlu1 %v2931_v8, %s2606_s28 }
 0x1b9   : > { %v906_v41 = vpop.permute.xlu0 %905 }
 0x1ba   : > { %1802 = vrot.lane.b32.xlu0 %v2931_v8, %s2605_s24 }
 0x1bc   : > { %2012 = vrot.lane.b32.xlu2 %v2934_v9, %s2606_s28 }
 0x1bd   : > { %v682_v21 = vpop.permute.xlu1 %681 }
 0x1c0   : > { %1804 = vrot.lane.b32.xlu1 %v2934_v9, %s2605_s24 }
 0x1c1   : > { %v666_v14 = vpop.permute.xlu0 %665 }
 0x1c2   : > { %v720_v51 = vsel %vm497_vm9, %v3289_v45, %v666_v14  ;;  %2004 = vrot.lane.b32.xlu0 %v2924_v4, %s2606_s28 }
 0x1c3   : > { %v721_v7 = vsel %vm499_vm10, %v720_v51, %v670_v56  ;;  %v710_v56 = vpop.permute.xlu2 %709 }
 0x1c4   : > { %v722_v11 = vsel %vm501_vm11, %v721_v7, %v674_v19  ;;  %2002 = vrot.lane.b32.xlu2 %v2927_v5, %s2606_s28 }
 0x1c5   : > { %v694_v27 = vpop.permute.xlu1 %693  ;;  %v723_v22 = vsel %vm503_vm12, %v722_v11, %v678_v57 }
 0x1c6   : > { %v724_v35 = vsel %vm505_vm13, %v723_v22, %v682_v21  ;;  %v727_v57 = vsel %vm497_vm9, %v3303_v39, %v694_v27 }
 0x1c7   : > { %v725_v45 = vsel %vm507_vm14, %v724_v35, %v3429_v55  ;;  %v728_v55 = vsel %vm499_vm10, %v727_v57, %v698_v28 }
 0x1c8   : > { %2006 = vrot.lane.b32.xlu1 %v2827_v23, %s2606_s28 }
 0x1c9   : > { %v690_v42 = vpop.permute.xlu0 %689 }
 0x1ca   : > { %v726_v50 = vsel %vm509_vm15, %v725_v45, %v690_v42  ;;  %1794 = vrot.lane.b32.xlu0 %v2927_v5, %s2605_s24 }
 0x1cb   : > { %734 = vst [vmem:[#allocation3 + $0x78] sm:$0xf] %v726_v50  ;;  %v890_v46 = vpop.permute.xlu2 %889 }
 0x1cc   : > { %2008 = vrot.lane.b32.xlu2 %v2830_v24, %s2606_s28 }
 0x1cd   : > { %v718_v12 = vpop.permute.xlu1 %717 }
 0x1d0   : > { %1796 = vrot.lane.b32.xlu1 %v2924_v4, %s2605_s24 }
 0x1d1   : > { %v702_v52 = vpop.permute.xlu0 %701 }
 0x1d2   : > { %v729_v26 = vsel %vm501_vm11, %v728_v55, %v702_v52  ;;  %1800 = vrot.lane.b32.xlu0 %v2830_v24, %s2605_s24 }
 0x1d3   : > { %v730_v47 = vsel %vm503_vm12, %v729_v26, %v706_v48  ;;  %v902_v38 = vpop.permute.xlu2 %901 }
 0x1d4   : > { %v731_v16 = vsel %vm505_vm13, %v730_v47, %v710_v56  ;;  %1798 = vrot.lane.b32.xlu2 %v2827_v23, %s2605_s24 }
 0x1d5   : > { %v732_v39 = vsel %vm507_vm14, %v731_v16, %v714_v44  ;;  %v874_v40 = vpop.permute.xlu1 %873 }
 0x1d6   : > { %v733_v54 = vsel %vm509_vm15, %v732_v39, %v718_v12  ;;  %v928_v28 = vsel %vm497_vm9, %v3336_v18, %v874_v40 }
 0x1d7   : > { %735 = vst [vmem:[#allocation3 + $0x58] sm:$0xf] %v733_v54  ;;  %v929_v48 = vsel %vm499_vm10, %v928_v28, %v878_v62 }
 0x1d8   : > { %1998 = vrot.lane.b32.xlu1 %v2953_v32, %s2606_s28 }
 0x1d9   : > { %v882_v6 = vpop.permute.xlu0 %881 }
 0x1da   : > { %v930_v61 = vsel %vm501_vm11, %v929_v48, %v882_v6  ;;  %1381 = vrot.lane.b32.xlu0 %v2994_v63, %s2606_s28  ;;  %v935_v63 = vsel %vm497_vm9, %v3368_v20, %v902_v38 }
 0x1db   : > { %v931_v44 = vsel %vm503_vm12, %v930_v61, %v886_v30  ;;  %v936_v30 = vsel %vm499_vm10, %v935_v63, %v906_v41  ;;  %v926_v20 = vpop.permute.xlu2 %925 }
 0x1dc   : > { %v932_v33 = vsel %vm505_vm13, %v931_v44, %v890_v46  ;;  %2000 = vrot.lane.b32.xlu2 %v2959_v36, %s2606_s28 }
 0x1dd   : > { %v898_v18 = vpop.permute.xlu1 %897  ;;  %v933_v15 = vsel %vm507_vm14, %v932_v33, %v894_v31 }
 0x1de   : > { %v934_v60 = vsel %vm509_vm15, %v933_v15, %v898_v18 }
 0x1df   : > { %942 = vst [vmem:[#allocation3 + $0x20] sm:$0xf] %v934_v60 }
 0x1e0   : > { %1383 = vrot.lane.b32.xlu1 %v3025_v17, %s2606_s28 }
 0x1e1   : > { %v918_v3 = vpop.permute.xlu0 %917 }
 0x1e2   : > { %1792 = vrot.lane.b32.xlu0 %v2959_v36, %s2605_s24 }
 0x1e4   : > { %1790 = vrot.lane.b32.xlu2 %v2953_v32, %s2605_s24 }
 0x1e5   : > { %v910_v62 = vpop.permute.xlu1 %909 }
 0x1e6   : > { %v937_v31 = vsel %vm501_vm11, %v936_v30, %v910_v62 }
 0x1e7   : > { %v938_v25 = vsel %vm503_vm12, %v937_v31, %v3471_v1 }
 0x1e8   : > { %v939_v17 = vsel %vm505_vm13, %v938_v25, %v918_v3  ;;  %1373 = vrot.lane.b32.xlu1 %v2904_v59, %s2606_s28 }
 0x1e9   : > { %v940_v21 = vsel %vm507_vm14, %v939_v17, %v3469_v43 }
 0x1ea   : > { %v941_v19 = vsel %vm509_vm15, %v940_v21, %v926_v20  ;;  %1377 = vrot.lane.b32.xlu0 %v2997_v0, %s2606_s28 }
 0x1eb   : > { %943 = vst [vmem:[#allocation3 + $0x8] sm:$0xf] %v941_v19 }
 0x1ec   : > { %1375 = vrot.lane.b32.xlu2 %v3006_v29, %s2606_s28 }
 0x1f0   : > { %1379 = vrot.lane.b32.xlu1 %v3049_v49, %s2606_s28 }
 0x1f2   : > { %1371 = vrot.lane.b32.xlu0 %v2899_v58, %s2606_s28 }
 0x1f4   : > { %1369 = vrot.lane.b32.xlu2 %v2980_v53, %s2606_s28  ;;  %s2293_s28 = scalar_lea.hbm %s4101_s3, %s2406_s29 }
 0x1f6   : > { %v1303_v59 = vpop.permute.xlu2 %1302 }
 0x1fe   : > { %v1339_v43 = vpop.permute.xlu2 %1338 }
 0x206   : > { %v1315_v1 = vpop.permute.xlu2 %1314 }
 0x20a   : > { %v1311_v41 = vpop.permute.xlu1 %1310 }
 0x20c   : > { %v1319_v14 = vpop.permute.xlu0 %1318 }
 0x20e   : > { %v1327_v51 = vpop.permute.xlu2 %1326 }
 0x20f   : > { %v1360_v7 = vsel %vm497_vm9, %v3459_v2, %v1327_v51 }
 0x212   : > { %v1299_v0 = vpop.permute.xlu1 %1298 }
 0x213   : > { %v1353_v58 = vsel %vm497_vm9, %v3426_v13, %v1299_v0 }
 0x214   : > { %v1331_v29 = vpop.permute.xlu0 %1330  ;;  %v1354_v53 = vsel %vm499_vm10, %v1353_v58, %v1303_v59 }
 0x215   : > { %v1361_v11 = vsel %vm499_vm10, %v1360_v7, %v1331_v29 }
 0x216   : > { %v2013_v49 = vpop.permute.xlu2 %2012 }
 0x217   : > { %v2090_v40 = vrot.slane %v2013_v49, 4 }
 0x21a   : > { %v1323_v27 = vpop.permute.xlu1 %1322 }
 0x21c   : > { %v1307_v22 = vpop.permute.xlu0 %1306 }
 0x21d   : > { %v1355_v35 = vsel %vm501_vm11, %v1354_v53, %v1307_v22 }
 0x21e   : > { %v1356_v42 = vsel %vm503_vm12, %v1355_v35, %v1311_v41  ;;  %v3564_v45 = vpop.permute.xlu2 %2002 }
 0x21f   : > { %v1357_v50 = vsel %vm505_vm13, %v1356_v42, %v1315_v1 }
 0x220   : > { %v1358_v2 = vsel %vm507_vm14, %v1357_v50, %v1319_v14 }
 0x221   : > { %v1359_v56 = vsel %vm509_vm15, %v1358_v2, %v1323_v27  ;;  %v1674_v2 = vrot.slane %v2934_v9, 4 }
 0x222   : > { %1367 = vst [vmem:[#allocation3 + $0x88] sm:$0xf] %v1359_v56  ;;  %v1335_v12 = vpop.permute.xlu1 %1334 }
 0x223   : > { %v1362_v13 = vsel %vm501_vm11, %v1361_v11, %v1335_v12 }
 0x224   : > { %v1343_v57 = vpop.permute.xlu0 %1342  ;;  %v1363_v52 = vsel %vm503_vm12, %v1362_v13, %v1339_v43 }
 0x225   : > { %v3572_v55 = vsel %vm505_vm13, %v1363_v52, %v1343_v57 }
 0x226   : > { %v2009_v26 = vpop.permute.xlu2 %2008 }
 0x227   : > { %v2078_v28 = vrot.slane %v2009_v26, 4 }
 0x22a   : > { %v3574_v47 = vpop.permute.xlu1 %2010 }
 0x22b   : > { %v2034_v22 = vrot.slane %v3574_v47, 4 }
 0x22c   : > { %v1803_v16 = vpop.permute.xlu0 %1802 }
 0x22d   : > { %v1826_v3 = vrot.slane %v1803_v16, 4 }
 0x22e   : > { %v1799_v46 = vpop.permute.xlu2 %1798 }
 0x22f   : > { %v1814_v21 = vrot.slane %v1799_v46, 4 }
 0x232   : > { %v3576_v39 = vpop.permute.xlu1 %1804 }
 0x234   : > { %v2005_v54 = vpop.permute.xlu0 %2004 }
 0x235   : > { %v2091_v6 = vsel %vm329_vm7, %v2090_v40, %v2005_v54  ;;  %v2092_v48 = vrot.slane %v2005_v54, 4  ;;  %v1675_v54 = vsel %vm329_vm7, %v1674_v2, %v2924_v4 }
 0x236   : > { %v2097_v61 = vperm.slane %v2091_v6, %v2869_v37  ;;  %v2001_v44 = vpop.permute.xlu2 %2000 }
 0x237   : > { %v2093_v33 = vsel %vm329_vm7, %v2013_v49, %v2092_v48  ;;  %v2079_v18 = vsel %vm329_vm7, %v2078_v28, %v2001_v44  ;;  %v2080_v15 = vrot.slane %v2001_v44, 4  ;;  %v2036_v48 = vrot.slane %v3564_v45, 4 }
 0x238   : > { %v2102_v60 = vrot.slane %v2097_v61, 4  ;;  %v2085_v38 = vperm.slane %v2079_v18, %v2869_v37  ;;  %v2101_v62 = vperm.slane %v2093_v33, %v2869_v37  ;;  %v3635_v18 = vperm.slane %v1675_v54, %v2869_v37 }
 0x239   : > { %v2081_v63 = vsel %vm329_vm7, %v2009_v26, %v2080_v15  ;;  %v2037_v15 = vsel %vm329_vm7, %v3574_v47, %v2036_v48 }
 0x23a   : > { %v2007_v30 = vpop.permute.xlu1 %2006  ;;  %v2103_v31 = vsel %vm329_vm7, %v2102_v60, %v2085_v38  ;;  %v2089_v17 = vperm.slane %v2081_v63, %v2869_v37  ;;  %v2114_v1 = vrot.slane %v2101_v62, 4  ;;  %v2104_v11 = vrot.slane %v2085_v38, 4 }
 0x23b   : > { %v3587_v25 = vperm.slane %v2103_v31, %v2936_v10  ;;  %v2022_v33 = vrot.slane %v2007_v30, 4  ;;  %v1662_v31 = vrot.slane %v2830_v24, 4  ;;  %v3652_v47 = vperm.slane %v2037_v15, %v2869_v37 }
 0x23c   : > { %v1795_v20 = vpop.permute.xlu0 %1794  ;;  %v2116_v49 = vrot.slane %v2089_v17, 4  ;;  %v2105_v57 = vsel %vm329_vm7, %v2097_v61, %v2104_v11  ;;  %v3617_v52 = vsel %vm329_vm7, %v2114_v1, %v2089_v17 }
 0x23d   : > { %v1827_v19 = vsel %vm329_vm7, %v1826_v3, %v1795_v20  ;;  %v1828_v59 = vrot.slane %v1795_v20, 4  ;;  %v2126_v43 = vrot.slane %v3587_v25, 4  ;;  %v3629_v6 = vperm.slane %v2105_v57, %v2936_v10 }
 0x23e   : > { %v3593_v41 = vperm.slane %v1827_v19, %v2869_v37  ;;  %v1791_v14 = vpop.permute.xlu2 %1790  ;;  %v3620_v26 = vsel %vm329_vm7, %v2101_v62, %v2116_v49  ;;  %v1882_v19 = vrot.slane %v3576_v39, 4  ;;  %v1663_v1 = vsel %vm329_vm7, %v1662_v31, %v2959_v36 }
 0x23f   : > { %v1829_v51 = vsel %vm329_vm7, %v1803_v16, %v1828_v59  ;;  %v1815_v0 = vsel %vm329_vm7, %v1814_v21, %v1791_v14  ;;  %v1816_v7 = vrot.slane %v1791_v14, 4  ;;  %v2127_v29 = vsel %vm329_vm7, 0.0, %v2126_v43 }
 0x240   : > { %v1838_v58 = vrot.slane %v3593_v41, 4  ;;  %v3600_v27 = vperm.slane %v1815_v0, %v2869_v37  ;;  %2163 = vrot.lane.b32.xlu2 %v2127_v29, %s2614_s8  ;;  %v1837_v35 = vperm.slane %v1829_v51, %v2869_v37  ;;  %v2035_v16 = vsel %vm329_vm7, %v2034_v22, %v3564_v45 }
 0x241   : > { %v1817_v53 = vsel %vm329_vm7, %v1799_v46, %v1816_v7  ;;  %v2041_v61 = vperm.slane %v2035_v16, %v2869_v37  ;;  %v2128_v45 = vrot.slane %v3629_v6, 4  ;;  %v1686_v43 = vrot.slane %v3635_v18, 4 }
 0x242   : > { %v3606_v42 = vpop.permute.xlu1 %1796  ;;  %v1839_v50 = vsel %vm329_vm7, %v1838_v58, %v3600_v27  ;;  %v1825_v12 = vperm.slane %v1817_v53, %v2869_v37  ;;  %v1850_v40 = vrot.slane %v1837_v35, 4  ;;  %v3674_v58 = vperm.slane %v1663_v1, %v2869_v37 }
 0x243   : > { %v3612_v56 = vperm.slane %v1839_v50, %v2936_v10  ;;  %v2046_v3 = vrot.slane %v2041_v61, 4  ;;  %v1883_v7 = vsel %vm329_vm7, %v1882_v19, %v3606_v42  ;;  %v2129_v11 = vsel %vm329_vm7, 0.0, %v2128_v45 }
 0x244   : > { %v1801_v13 = vpop.permute.xlu0 %1800  ;;  %v1852_v44 = vrot.slane %v1825_v12, 4  ;;  %v3640_v38 = vsel %vm329_vm7, %v1850_v40, %v1825_v12  ;;  %v2058_v22 = vrot.slane %v3652_v47, 4  ;;  %v3680_v50 = vperm.slane %v1883_v7, %v2869_v37 }
 0x245   : > { %v1862_v46 = vrot.slane %v3612_v56, 4  ;;  %v1870_v12 = vrot.slane %v1801_v13, 4  ;;  %v1884_v40 = vrot.slane %v3606_v42, 4 }
 0x246   : > { %v3649_v21 = vsel %vm329_vm7, %v1837_v35, %v1852_v44  ;;  %v3659_v14 = vpop.permute.xlu2 %1375 }
 0x247   : > { %v1863_v28 = vsel %vm329_vm7, 0.0, %v1862_v46  ;;  %v1687_v46 = vsel %vm329_vm7, %v1686_v43, %v3674_v58  ;;  %v1885_v42 = vsel %vm329_vm7, %v3576_v39, %v1884_v40  ;;  %v1606_v40 = vrot.slane %v2827_v23, 4 }
 0x248   : > { %1927 = vrot.lane.b32.xlu2 %v1863_v28, %s2614_s8  ;;  %v3697_v15 = vperm.slane %v1687_v46, %v2936_v10  ;;  %v1893_v19 = vperm.slane %v1885_v42, %v2869_v37 }
 0x24a   : > { %v1999_v60 = vpop.permute.xlu1 %1998 }
 0x24b   : > { %v2023_v63 = vsel %vm329_vm7, %v2022_v33, %v1999_v60  ;;  %v2024_v62 = vrot.slane %v1999_v60, 4 }
 0x24c   : > { %v2029_v17 = vperm.slane %v2023_v63, %v2869_v37  ;;  %v3646_v20 = vpop.permute.xlu0 %1381  ;;  %v1618_v63 = vrot.slane %v2931_v8, 4 }
 0x24d   : > { %v2025_v59 = vsel %vm329_vm7, %v2007_v30, %v2024_v62 }
 0x24e   : > { %v2048_v51 = vrot.slane %v2029_v17, 4  ;;  %v2047_v0 = vsel %vm329_vm7, %v2046_v3, %v2029_v17  ;;  %v3665_v29 = vperm.slane %v2025_v59, %v2869_v37  ;;  %v3703_v62 = vpop.permute.xlu2 %1369  ;;  %v1619_v1 = vsel %vm329_vm7, %v1618_v63, %v2927_v5 }
 0x24f   : > { %v3669_v30 = vperm.slane %v2047_v0, %v2936_v10  ;;  %v1395_v59 = vrot.slane %v3703_v62, 4  ;;  %v1840_v0 = vrot.slane %v3600_v27, 4 }
 0x250   : > { %2171 = vrot.lane.b32.xlu2 %v2129_v11, %s2613_s7  ;;  %v2049_v49 = vsel %vm329_vm7, %v2041_v61, %v2048_v51  ;;  %v2059_v16 = vsel %vm329_vm7, %v2058_v22, %v3665_v29  ;;  %v1894_v61 = vrot.slane %v3680_v50, 4 }
 0x251   : > { %v2057_v53 = vperm.slane %v2049_v49, %v2936_v10  ;;  %v2070_v35 = vrot.slane %v3669_v30, 4  ;;  %v2065_v33 = vperm.slane %v2059_v16, %v2936_v10 }
 0x252   : > { %v3682_v2 = vpop.permute.xlu1 %1383 }
 0x253   : > { %2139 = vrot.lane.b32.xlu0 %v2057_v53, %s2609_s30  ;;  %v2071_v57 = vsel %vm329_vm7, 0.0, %v2070_v35  ;;  %v2072_v16 = vrot.slane %v2057_v53, 4  ;;  %v2074_v42 = vrot.slane %v2065_v33, 4 }
 0x254   : > { %v1793_v54 = vpop.permute.xlu0 %1792  ;;  %2135 = vrot.lane.b32.xlu1 %v2071_v57, %s2614_s8 }
 0x255   : > { %v1871_v28 = vsel %vm329_vm7, %v1870_v12, %v1793_v54  ;;  %v1872_v48 = vrot.slane %v1793_v54, 4  ;;  %v1906_v12 = vrot.slane %v1893_v19, 4  ;;  %v1841_v54 = vsel %vm329_vm7, %v3593_v41, %v1840_v0 }
 0x256   : > { %v1877_v44 = vperm.slane %v1871_v28, %v2869_v37  ;;  %v2073_v63 = vsel %vm329_vm7, 0.0, %v2072_v16  ;;  %v1849_v41 = vperm.slane %v1841_v54, %v2936_v10 }
 0x257   : > { %v1873_v60 = vsel %vm329_vm7, %v1801_v13, %v1872_v48  ;;  %v1710_v13 = vrot.slane %v3697_v15, 4 }
 0x258   : > { %2147 = vrot.lane.b32.xlu2 %v2065_v33, %s2611_s5  ;;  %v1895_v45 = vsel %vm329_vm7, %v1894_v61, %v1877_v44  ;;  %v1881_v3 = vperm.slane %v1873_v60, %v2869_v37  ;;  %v1607_v61 = vsel %vm329_vm7, %v1606_v40, %v2953_v32  ;;  %v1896_v60 = vrot.slane %v1877_v44, 4 }
 0x259   : > { %v3708_v31 = vperm.slane %v1895_v45, %v2936_v10  ;;  %v1711_v57 = vsel %vm329_vm7, 0.0, %v1710_v13  ;;  %v1613_v13 = vperm.slane %v1607_v61, %v2869_v37  ;;  %v2075_v44 = vsel %vm329_vm7, 0.0, %v2074_v42 }
 0x25a   : > { %v3711_v17 = vpop.permute.xlu1 %1373  ;;  %v1908_v22 = vrot.slane %v1881_v3, 4  ;;  %v3742_v28 = vsel %vm329_vm7, %v1906_v12, %v1881_v3  ;;  %v1897_v33 = vsel %vm329_vm7, %v3680_v50, %v1896_v60 }
 0x25b   : > { %v1407_v39 = vrot.slane %v3711_v17, 4  ;;  %v1918_v43 = vrot.slane %v3708_v31, 4 }
 0x25c   : > { %v3720_v51 = vpop.permute.xlu0 %1377  ;;  %2167 = vrot.lane.b32.xlu1 %v3629_v6, %s2609_s30  ;;  %v3734_v6 = vperm.slane %v1619_v1, %v2869_v37  ;;  %v3748_v53 = vsel %vm329_vm7, %v1893_v19, %v1908_v22  ;;  %v1461_v19 = vrot.slane %v3682_v2, 4  ;;  %v1688_v1 = vrot.slane %v3674_v58, 4 }
 0x25d   : > { %v1408_v7 = vsel %vm329_vm7, %v3646_v20, %v1407_v39  ;;  %v1396_v11 = vsel %vm329_vm7, %v3720_v51, %v1395_v59  ;;  %v1919_v49 = vsel %vm329_vm7, 0.0, %v1918_v43  ;;  %v2121_v58 = vperm.slane %v3617_v52, %v2936_v10 }
 0x25e   : > { %v1416_v35 = vperm.slane %v1408_v7, %v2869_v37  ;;  %1955 = vrot.lane.b32.xlu0 %v1919_v49, %s2614_s8  ;;  %v1404_v46 = vperm.slane %v1396_v11, %v2869_v37  ;;  %v1630_v45 = vrot.slane %v3734_v6, 4  ;;  %v1905_v11 = vperm.slane %v1897_v33, %v2936_v10 }
 0x25f   : > { %v1462_v49 = vsel %vm329_vm7, %v1461_v19, %v3659_v14  ;;  %v1689_v50 = vsel %vm329_vm7, %v3635_v18, %v1688_v1  ;;  %v2060_v18 = vrot.slane %v3665_v29, 4  ;;  %v1864_v52 = vrot.slane %v1849_v41, 4 }
 0x260   : > { %v1429_v27 = vrot.slane %v1416_v35, 4  ;;  %1747 = vrot.lane.b32.xlu2 %v1711_v57, %s2614_s8  ;;  %v1431_v3 = vrot.slane %v1404_v46, 4  ;;  %v1631_v39 = vsel %vm329_vm7, %v1630_v45, %v1613_v13  ;;  %v3787_v12 = vperm.slane %v1462_v49, %v2869_v37 }
 0x261   : > { %v3779_v22 = vperm.slane %v1631_v39, %v2936_v10  ;;  %v3791_v57 = vperm.slane %v1689_v50, %v2936_v10  ;;  %v2061_v54 = vsel %vm329_vm7, %v3652_v47, %v2060_v18  ;;  %v1865_v29 = vsel %vm329_vm7, 0.0, %v1864_v52 }
 0x262   : > { %v3745_v48 = vsel %vm329_vm7, %v1429_v27, %v1404_v46  ;;  %v3757_v59 = vpop.permute.xlu1 %1379  ;;  %v3769_v0 = vsel %vm329_vm7, %v1416_v35, %v1431_v3  ;;  %v1473_v46 = vrot.slane %v3787_v12, 4  ;;  %v3810_v60 = vperm.slane %v2061_v54, %v2936_v10 }
 0x263   : > { %v1449_v43 = vrot.slane %v3757_v59, 4  ;;  %v1654_v16 = vrot.slane %v3779_v22, 4  ;;  %v2130_v47 = vrot.slane %v2121_v58, 4  ;;  %v1405_v3 = vrot.slane %v3646_v20, 4 }
 0x264   : > { %2143 = vrot.lane.b32.xlu1 %v2073_v63, %s2613_s7  ;;  %v3771_v7 = vpop.permute.xlu0 %1371  ;;  %v1920_v63 = vrot.slane %v1905_v11, 4  ;;  %v1393_v19 = vrot.slane %v3720_v51, 4  ;;  %v1632_v33 = vrot.slane %v1613_v13, 4  ;;  %v1620_v50 = vrot.slane %v2927_v5, 4 }
 0x265   : > { %v1450_v35 = vsel %vm329_vm7, %v1449_v43, %v3771_v7  ;;  %v1655_v40 = vsel %vm329_vm7, 0.0, %v1654_v16  ;;  %v1406_v39 = vsel %vm329_vm7, %v1405_v3, %v3711_v17  ;;  %v1608_v18 = vrot.slane %v2953_v32, 4 }
 0x266   : > { %1931 = vrot.lane.b32.xlu0 %v1849_v41, %s2609_s30  ;;  %v3796_v27 = vperm.slane %v1450_v35, %v2869_v37  ;;  %v1921_v45 = vsel %vm329_vm7, 0.0, %v1920_v63  ;;  %v1633_v1 = vsel %vm329_vm7, %v3734_v6, %v1632_v33  ;;  %v1394_v20 = vsel %vm329_vm7, %v1393_v19, %v3703_v62 }
 0x267   : > { %v1412_v51 = vperm.slane %v1406_v39, %v2869_v37  ;;  %v1641_v13 = vperm.slane %v1633_v1, %v2936_v10  ;;  %v1400_v17 = vperm.slane %v1394_v20, %v2869_v37  ;;  %v1621_v62 = vsel %vm329_vm7, %v2931_v8, %v1620_v50 }
 0x268   : > { %2151 = vrot.lane.b32.xlu2 %v2075_v44, %s2612_s6  ;;  %v1474_v61 = vsel %vm329_vm7, %v1473_v46, %v3796_v27  ;;  %v2131_v44 = vsel %vm329_vm7, 0.0, %v2130_v47  ;;  %v1913_v5 = vperm.slane %v3742_v28, %v2936_v10  ;;  %v3851_v16 = vperm.slane %v1621_v62, %v2869_v37 }
 0x269   : > { %v3813_v42 = vperm.slane %v1474_v61, %v2936_v10  ;;  %v1417_v6 = vrot.slane %v1412_v51, 4  ;;  %v1609_v8 = vsel %vm329_vm7, %v2827_v23, %v1608_v18  ;;  %v1712_v47 = vrot.slane %v3791_v57, 4 }
 0x26a   : > { %v1642_v28 = vrot.slane %v3851_v16, 4  ;;  %v1617_v54 = vperm.slane %v1609_v8, %v2869_v37  ;;  %v1676_v19 = vrot.slane %v2924_v4, 4  ;;  %v1664_v1 = vrot.slane %v2959_v36, 4 }
 0x26b   : > { %v1497_v41 = vrot.slane %v3813_v42, 4  ;;  %v1418_v35 = vsel %vm329_vm7, %v1417_v6, %v1400_v17  ;;  %v1713_v3 = vsel %vm329_vm7, 0.0, %v1712_v47  ;;  %v1463_v50 = vrot.slane %v3659_v14, 4 }
 0x26c   : > { %1959 = vrot.lane.b32.xlu1 %v1905_v11, %s2609_s30  ;;  %v1857_v11 = vperm.slane %v3640_v38, %v2936_v10  ;;  %v3854_v46 = vperm.slane %v1418_v35, %v2936_v10  ;;  %v1677_v39 = vsel %vm329_vm7, %v2934_v9, %v1676_v19  ;;  %v1475_v9 = vrot.slane %v3796_v27, 4 }
 0x26d   : > { %v1498_v43 = vsel %vm329_vm7, 0.0, %v1497_v41  ;;  %v3888_v4 = vperm.slane %v1677_v39, %v2869_v37  ;;  %v1464_v62 = vsel %vm329_vm7, %v3682_v2, %v1463_v50  ;;  %v1644_v2 = vrot.slane %v1617_v54, 4 }
 0x26e   : > { %2175 = vrot.lane.b32.xlu0 %v2121_v58, %s2611_s5  ;;  %v1866_v49 = vrot.slane %v1857_v11, 4  ;;  %v2125_v58 = vperm.slane %v3620_v26, %v2936_v10  ;;  %v1441_v32 = vrot.slane %v3854_v46, 4  ;;  %v1472_v14 = vperm.slane %v1464_v62, %v2869_v37 }
 0x270   : > { %1751 = vrot.lane.b32.xlu2 %v3791_v57, %s2609_s30  ;;  %v1867_v38 = vsel %vm329_vm7, 0.0, %v1866_v49  ;;  %v2132_v52 = vrot.slane %v2125_v58, 4  ;;  %v1442_v61 = vsel %vm329_vm7, 0.0, %v1441_v32  ;;  %v1917_v57 = vperm.slane %v3748_v53, %v2936_v10 }
 0x271   : > { %v1665_v53 = vsel %vm329_vm7, %v2830_v24, %v1664_v1  ;;  %v1451_v24 = vrot.slane %v3771_v7, 4  ;;  %v1485_v8 = vrot.slane %v1472_v14, 4  ;;  %v1861_v32 = vperm.slane %v3649_v21, %v2936_v10 }
 0x272   : > { %v2133_v26 = vsel %vm329_vm7, 0.0, %v2132_v52  ;;  %v1673_v27 = vperm.slane %v1665_v53, %v2869_v37  ;;  %v1924_v35 = vrot.slane %v1917_v57, 4 }
 0x273   : > { %v1452_v18 = vsel %vm329_vm7, %v3757_v59, %v1451_v24  ;;  %v1645_v59 = vsel %vm329_vm7, %v3851_v16, %v1644_v2 }
 0x274   : > { %1719 = vrot.lane.b32.xlu1 %v1655_v40, %s2614_s8  ;;  %v1656_v40 = vrot.slane %v1641_v13, 4  ;;  %v1925_v7 = vsel %vm329_vm7, 0.0, %v1924_v35 }
 0x276   : > { %1935 = vrot.lane.b32.xlu0 %v1865_v29, %s2613_s7  ;;  %v1643_v29 = vsel %vm329_vm7, %v1642_v28, %v1617_v54  ;;  %v1657_v23 = vsel %vm329_vm7, 0.0, %v1656_v40 }
 0x277   : > { %v1649_v63 = vperm.slane %v1643_v29, %v2936_v10 }
 0x278   : > { %2155 = vrot.lane.b32.xlu2 %v3810_v60, %s2610_s4 }
 0x279   : > { %v1658_v49 = vrot.slane %v1649_v63, 4 }
 0x27c   : > { %1963 = vrot.lane.b32.xlu1 %v1921_v45, %s2613_s7  ;;  %v1922_v45 = vrot.slane %v1913_v5, 4 }
 0x27e   : > { %2179 = vrot.lane.b32.xlu0 %v2131_v44, %s2612_s6  ;;  %v1419_v44 = vrot.slane %v1400_v17, 4  ;;  %v1923_v33 = vsel %vm329_vm7, 0.0, %v1922_v45  ;;  %v1476_v17 = vsel %vm329_vm7, %v3787_v12, %v1475_v9  ;;  %v1868_v45 = vrot.slane %v1861_v32, 4 }
 0x27f   : > { %v1700_v9 = vrot.slane %v1673_v27, 4 }
 0x280   : > { %1534 = vrot.lane.b32.xlu2 %v1498_v43, %s2614_s8  ;;  %v2076_v43 = vrot.slane %v3810_v60, 4  ;;  %v1698_v60 = vrot.slane %v3888_v4, 4 }
 0x282   : > { %v1699_v6 = vsel %vm329_vm7, %v1698_v60, %v1673_v27 }
 0x283   : > { %v1705_v12 = vperm.slane %v1699_v6, %v2936_v10 }
 0x284   : > { %1723 = vrot.lane.b32.xlu1 %v1641_v13, %s2609_s30  ;;  %v2077_v13 = vsel %vm329_vm7, 0.0, %v2076_v43  ;;  %v1440_v43 = vperm.slane %v3769_v0, %v2936_v10 }
 0x285   : > { %v1714_v29 = vrot.slane %v1705_v12, 4 }
 0x286   : > { %1939 = vrot.lane.b32.xlu0 %v1857_v11, %s2611_s5  ;;  %v1420_v11 = vsel %vm329_vm7, %v1412_v51, %v1419_v44  ;;  %v1659_v51 = vsel %vm329_vm7, 0.0, %v1658_v49  ;;  %v1869_v44 = vsel %vm329_vm7, 0.0, %v1868_v45 }
 0x287   : > { %v1428_v36 = vperm.slane %v1420_v11, %v2936_v10 }
 0x288   : > { %1943 = vrot.lane.b32.xlu2 %v1867_v38, %s2612_s6 }
 0x289   : > { %v1443_v52 = vrot.slane %v1428_v36, 4 }
 0x28b   : > { %v1444_v40 = vsel %vm329_vm7, 0.0, %v1443_v52 }
 0x28c   : > { %1967 = vrot.lane.b32.xlu1 %v1913_v5, %s2611_s5  ;;  %v1460_v5 = vperm.slane %v1452_v18, %v2869_v37  ;;  %v1653_v37 = vperm.slane %v1645_v59, %v2936_v10 }
 0x28e   : > { %2183 = vrot.lane.b32.xlu0 %v2125_v58, %s2610_s4  ;;  %v1484_v58 = vperm.slane %v1476_v17, %v2936_v10  ;;  %v1486_v28 = vsel %vm329_vm7, %v1485_v8, %v1460_v5  ;;  %v1660_v6 = vrot.slane %v1653_v37, 4  ;;  %v1447_v8 = vrot.slane %v1440_v43, 4 }
 0x290   : > { %2187 = vrot.lane.b32.xlu2 %v2133_v26, %s2615_s9  ;;  %v1499_v54 = vrot.slane %v1484_v58, 4 }
 0x294   : > { %1506 = vrot.lane.b32.xlu1 %v1442_v61, %s2614_s8  ;;  %v1492_v61 = vperm.slane %v1486_v28, %v2936_v10 }
 0x296   : > { %1727 = vrot.lane.b32.xlu0 %v1657_v23, %s2613_s7  ;;  %v1500_v23 = vsel %vm329_vm7, 0.0, %v1499_v54  ;;  %v1501_v16 = vrot.slane %v1492_v61, 4 }
 0x298   : > { %1731 = vrot.lane.b32.xlu2 %v1649_v63, %s2611_s5  ;;  %v1715_v63 = vsel %vm329_vm7, 0.0, %v1714_v29  ;;  %v1502_v47 = vsel %vm329_vm7, 0.0, %v1501_v16 }
 0x29a   : > { %v3873_v41 = vpop.permute.xlu2 %2163 }
 0x29c   : > { %1755 = vrot.lane.b32.xlu1 %v1713_v3, %s2613_s7  ;;  %v1487_v3 = vrot.slane %v1460_v5, 4 }
 0x29e   : > { %1971 = vrot.lane.b32.xlu0 %v1923_v33, %s2612_s6  ;;  %v1436_v33 = vperm.slane %v3745_v48, %v2936_v10  ;;  %v1488_v39 = vsel %vm329_vm7, %v1472_v14, %v1487_v3  ;;  %v1701_v48 = vsel %vm329_vm7, %v3888_v4, %v1700_v9 }
 0x2a0   : > { %1975 = vrot.lane.b32.xlu2 %v1917_v57, %s2610_s4  ;;  %v1445_v27 = vrot.slane %v1436_v33, 4 }
 0x2a2   : > { %v3891_v20 = vpop.permute.xlu2 %1927  ;;  %v1446_v62 = vsel %vm329_vm7, 0.0, %v1445_v27 }
 0x2a3   : > { %v1982_v18 = vsel %vm497_vm9, %v3612_v56, %v3891_v20  ;;  %v1448_v20 = vsel %vm329_vm7, 0.0, %v1447_v8 }
 0x2a4   : > { %2159 = vrot.lane.b32.xlu1 %v2077_v13, %s2615_s9  ;;  %v1496_v13 = vperm.slane %v1488_v39, %v2936_v10 }
 0x2a6   : > { %1510 = vrot.lane.b32.xlu0 %v1428_v36, %s2609_s30  ;;  %v1503_v60 = vrot.slane %v1496_v13, 4 }
 0x2a8   : > { %1735 = vrot.lane.b32.xlu2 %v1659_v51, %s2612_s6  ;;  %v2197_v51 = vsel %vm497_vm9, %v3587_v25, %v3873_v41  ;;  %v1661_v25 = vsel %vm329_vm7, 0.0, %v1660_v6 }
 0x2aa   : > { %v3909_v38 = vpop.permute.xlu2 %2171 }
 0x2ac   : > { %1538 = vrot.lane.b32.xlu1 %v1484_v58, %s2609_s30  ;;  %s204_s30 = scalar_lea.vmem [#allocation8], %s2396_s23 }
 0x2ae   : > { %1759 = vrot.lane.b32.xlu0 %v1705_v12, %s2611_s5 }
 0x2b0   : > { %1979 = vrot.lane.b32.xlu2 %v1925_v7, %s2615_s9 }
 0x2b2   : > { %v3923_v26 = vpop.permute.xlu2 %2147 }
 0x2b4   : > { %1947 = vrot.lane.b32.xlu1 %v1861_v32, %s2610_s4 }
 0x2b6   : > { %1514 = vrot.lane.b32.xlu0 %v1444_v40, %s2613_s7 }
 0x2b8   : > { %1739 = vrot.lane.b32.xlu2 %v1653_v37, %s2610_s4 }
 0x2ba   : > { %v1748_v21 = vpop.permute.xlu2 %1747 }
 0x2bb   : > { %v1781_v53 = vsel %vm497_vm9, %v3697_v15, %v1748_v21  ;;  %v1504_v15 = vsel %vm329_vm7, 0.0, %v1503_v60 }
 0x2bc   : > { %1542 = vrot.lane.b32.xlu1 %v1500_v23, %s2613_s7 }
 0x2be   : > { %1763 = vrot.lane.b32.xlu0 %v1715_v63, %s2612_s6 }
 0x2c0   : > { %1550 = vrot.lane.b32.xlu2 %v1502_v47, %s2612_s6 }
 0x2c2   : > { %v2152_v19 = vpop.permute.xlu2 %2151 }
 0x2c4   : > { %1951 = vrot.lane.b32.xlu1 %v1869_v44, %s2615_s9 }
 0x2c5   : > { %v2140_v1 = vpop.permute.xlu0 %2139 }
 0x2c6   : > { %v2136_v57 = vpop.permute.xlu1 %2135  ;;  %1518 = vrot.lane.b32.xlu0 %v1436_v33, %s2611_s5 }
 0x2c7   : > { %v2190_v11 = vsel %vm497_vm9, %v3669_v30, %v2136_v57  ;;  %v1709_v30 = vperm.slane %v1701_v48, %v2936_v10 }
 0x2c8   : > { %1526 = vrot.lane.b32.xlu2 %v1440_v43, %s2610_s4  ;;  %v2191_v49 = vsel %vm499_vm10, %v2190_v11, %v2140_v1 }
 0x2c9   : > { %v1716_v12 = vrot.slane %v1709_v30, 4 }
 0x2ca   : > { %v1752_v36 = vpop.permute.xlu2 %1751 }
 0x2cb   : > { %v3960_v0 = vsel %vm499_vm10, %v1781_v53, %v1752_v36  ;;  %v1717_v52 = vsel %vm329_vm7, 0.0, %v1716_v12 }
 0x2cc   : > { %1546 = vrot.lane.b32.xlu1 %v1492_v61, %s2611_s5  ;;  %s2297_s5 = sshll.u32 %s2293_s28, 4  ;;  %s2298_s5 = int_to_ptr.hbm [resolvable:$true] %s2297_s5 }
 0x2cd   : > { %s2531_s7 = sshra.s32 %s2298_s5, 4  ;;  %s2532_s7 = int_to_ptr.hbm [resolvable:$true] %s2531_s7 }
 0x2ce   : > { %v2168_v17 = vpop.permute.xlu1 %2167  ;;  %1767 = vrot.lane.b32.xlu0 %v1709_v30, %s2610_s4  ;;  %s2533_s15 = scalar_lea.hbm %s2532_s7, 16  ;;  %p2538_p7 = scmp.lt.s32.totalorder %s2532_s7, %s4101_s3 }
 0x2cf   : > { %v2198_v4 = vsel %vm499_vm10, %v2197_v51, %v2168_v17  ;;  %p2534_p4 = scmp.ne.s32.totalorder %s2532_s7, %s2533_s15  ;;  %p2539_p8 = scmp.lt.s32.totalorder %s2537_s10, %s2533_s15 }
 0x2d0   : > { %v1956_v50 = vpop.permute.xlu0 %1955  ;;  %1558 = vrot.lane.b32.xlu2 %v1504_v15, %s2615_s9  ;;  %v2199_v24 = vsel %vm501_vm11, %v2198_v4, %v3909_v38 }
 0x2d1   : > { %v1989_v53 = vsel %vm497_vm9, %v3708_v31, %v1956_v50  ;;  %p2535_p5 = pnand %p2534_p4, %p2688_p9  ;;  %p2540_p10 = por %p2539_p8, %p2538_p7 }
 0x2d2   : > { %v3973_v58 = vpop.permute.xlu2 %2155 }
 0x2d3   : > { %p2536_p6 = pneg %p2535_p5 }
 0x2d4   : > { %1522 = vrot.lane.b32.xlu1 %v1446_v62, %s2612_s6  ;;  %s2280_s6 = scalar_lea.sflag [#allocation7], %s2711_s19 }
 0x2d5   : > { %p2541_p13 = pnand %p2540_p10, %p2536_p6 }
 0x2d6   : > { %v2144_v41 = vpop.permute.xlu1 %2143  ;;  %1743 = vrot.lane.b32.xlu0 %v1661_v25, %s2615_s9 }
 0x2d7   : > { %v2192_v35 = vsel %vm501_vm11, %v2191_v49, %v2144_v41 }
 0x2d8   : > { %v2193_v38 = vsel %vm503_vm12, %v2192_v35, %v3923_v26  ;;  %v1932_v14 = vpop.permute.xlu0 %1931  ;;  %v1288_v26 = vperm.slane %v3442_v34, %v2936_v10 }
 0x2d9   : > { %v1983_v7 = vsel %vm499_vm10, %v1982_v18, %v1932_v14  ;;  %v2194_v59 = vsel %vm505_vm13, %v2193_v38, %v2152_v19 }
 0x2da   : > { %v3986_v5 = vpop.permute.xlu2 %1534  ;;  %v1295_v40 = vrot.slane %v1288_v26, 4  ;;  %v2195_v31 = vsel %vm507_vm14, %v2194_v59, %v3973_v58 }
 0x2dc   : > { %1771 = vrot.lane.b32.xlu1 %v1717_v52, %s2615_s9  ;;  %v1296_v29 = vsel %vm329_vm7, 0.0, %v1295_v40 }
 0x2de   : > { %v1960_v2 = vpop.permute.xlu1 %1959  ;;  %1554 = vrot.lane.b32.xlu0 %v1496_v13, %s2610_s4 }
 0x2df   : > { %v1990_v36 = vsel %vm499_vm10, %v1989_v53, %v1960_v2 }
 0x2e0   : > { %v2176_v32 = vpop.permute.xlu0 %2175 }
 0x2e1   : > { %v2200_v19 = vsel %vm503_vm12, %v2199_v24, %v2176_v32 }
 0x2e2   : > { %v1944_v56 = vpop.permute.xlu2 %1943 }
 0x2e4   : > { %1530 = vrot.lane.b32.xlu1 %v1448_v20, %s2615_s9 }
 0x2e6   : > { %v1720_v28 = vpop.permute.xlu1 %1719  ;;  %1346 = vrot.lane.b32.xlu0 %v1288_v26, %s2610_s4  ;;  %s2295_s4 = sshll.u32 %s204_s30, 4  ;;  %s2296_s4 = int_to_ptr.vmem [resolvable:$true] %s2295_s4 }
 0x2e7   : > { %v1774_v10 = vsel %vm497_vm9, %v3779_v22, %v1720_v28 }
 0x2e8   : > { %v1936_v37 = vpop.permute.xlu0 %1935 }
 0x2e9   : > { %v1984_v54 = vsel %vm501_vm11, %v1983_v7, %v1936_v37 }
 0x2ea   : > { %v2188_v61 = vpop.permute.xlu2 %2187 }
 0x2ec   : > { %1350 = vrot.lane.b32.xlu1 %v1296_v29, %s2615_s9 }
 0x2ee   : > { %v1964_v21 = vpop.permute.xlu1 %1963 }
 0x2ef   : > { %v1991_v30 = vsel %vm501_vm11, %v1990_v36, %v1964_v21  ;;  %v1568_v21 = vsel %vm497_vm9, %v3813_v42, %v3986_v5 }
 0x2f0   : > { %v2180_v23 = vpop.permute.xlu0 %2179 }
 0x2f1   : > { %v2201_v33 = vsel %vm505_vm13, %v2200_v19, %v2180_v23 }
 0x2f2   : > { %v1732_v16 = vpop.permute.xlu2 %1731 }
 0x2f6   : > { %v1724_v34 = vpop.permute.xlu1 %1723 }
 0x2f7   : > { %v1775_v63 = vsel %vm499_vm10, %v1774_v10, %v1724_v34 }
 0x2f8   : > { %v1940_v47 = vpop.permute.xlu0 %1939 }
 0x2f9   : > { %v1985_v44 = vsel %vm503_vm12, %v1984_v54, %v1940_v47 }
 0x2fa   : > { %v1976_v45 = vpop.permute.xlu2 %1975  ;;  %v1986_v1 = vsel %vm505_vm13, %v1985_v44, %v1944_v56 }
 0x2fe   : > { %v1968_v3 = vpop.permute.xlu1 %1967 }
 0x2ff   : > { %v1992_v51 = vsel %vm503_vm12, %v1991_v30, %v1968_v3 }
 0x300   : > { %v2184_v39 = vpop.permute.xlu0 %2183 }
 0x301   : > { %v2202_v57 = vsel %vm507_vm14, %v2201_v33, %v2184_v39 }
 0x302   : > { %v2203_v43 = vsel %vm509_vm15, %v2202_v57, %v2188_v61  ;;  %v1736_v11 = vpop.permute.xlu2 %1735 }
 0x303   : > { %2205 = vst [vmem:[#allocation3 + $0x60] sm:$0xf] %v2203_v43 }
 0x306   : > { %v1507_v22 = vpop.permute.xlu1 %1506 }
 0x307   : > { %v1561_v42 = vsel %vm497_vm9, %v3854_v46, %v1507_v22 }
 0x308   : > { %v1728_v9 = vpop.permute.xlu0 %1727 }
 0x309   : > { %v1776_v13 = vsel %vm501_vm11, %v1775_v63, %v1728_v9 }
 0x30a   : > { %v1777_v49 = vsel %vm503_vm12, %v1776_v13, %v1732_v16  ;;  %v2224_v48 = vld [vmem:[#allocation3 + $0x60] sm:$0xff]  ;;  %v1980_v15 = vpop.permute.xlu2 %1979 }
 0x30b   : > { %2262 = vmatpush.msra.mxu1 %v2224_v48  ;;  %v1778_v40 = vsel %vm505_vm13, %v1777_v49, %v1736_v11  ;;  %v2616_v11 = vmov 0  }
 0x30c   : > { %2485 = vset.pattern.permute.xlu2 %v2616_v11  ;;  %2486 = vset.pattern.permute.xlu0 %v2616_v11 }
 0x30e   : > { %v1756_v60 = vpop.permute.xlu1 %1755 }
 0x30f   : > { %v1783_v23 = vsel %vm501_vm11, %v3960_v0, %v1756_v60 }
 0x310   : > { %v1972_v17 = vpop.permute.xlu0 %1971 }
 0x311   : > { %v1993_v4 = vsel %vm505_vm13, %v1992_v51, %v1972_v17 }
 0x312   : > { %v1994_v27 = vsel %vm507_vm14, %v1993_v4, %v1976_v45  ;;  %v1740_v52 = vpop.permute.xlu2 %1739 }
 0x313   : > { %v1995_v24 = vsel %vm509_vm15, %v1994_v27, %v1980_v15  ;;  %v1779_v54 = vsel %vm507_vm14, %v1778_v40, %v1740_v52  ;;  %v2215_v15 = vld [vmem:[#allocation3 + $0x88] sm:$0xff]  ;;  %v2213_v27 = vld [vmem:[#allocation3 + $0x70] sm:$0xff] }
 0x314   : > { %1997 = vst [vmem:[#allocation3 + $0x18] sm:$0xf] %v1995_v24  ;;  %v2211_v24 = vld [vmem:[#allocation3 + $0x20] sm:$0xff] }
 0x316   : > { %v2160_v6 = vpop.permute.xlu1 %2159 }
 0x317   : > { %v2196_v50 = vsel %vm509_vm15, %v2195_v31, %v2160_v6  ;;  %v2209_v6 = vld [vmem:[#allocation3 + $0x78] sm:$0xff] }
 0x318   : > { %2204 = vst [vmem:[#allocation3 + $0x68] sm:$0xf] %v2196_v50  ;;  %v1511_v62 = vpop.permute.xlu0 %1510  ;;  %v2207_v50 = vld [vmem:[#allocation3] sm:$0xff] }
 0x319   : > { %v1562_v0 = vsel %vm499_vm10, %v1561_v42, %v1511_v62  ;;  %v2214_v62 = vld [vmem:[#allocation3 + $0x80] sm:$0xff] }
 0x31a   : > { %v1551_v59 = vpop.permute.xlu2 %1550 }
 0x31b   : > { %v2222_v25 = vld [vmem:[#allocation3 + $0x18] sm:$0xff] }
 0x31c   : > { %2263 = vmatpush.msra.mxu1 %v2222_v25  ;;  %v2212_v25 = vld [vmem:[#allocation3 + $0x8] sm:$0xff] }
 0x31e   : > { %v1539_v41 = vpop.permute.xlu1 %1538 }
 0x31f   : > { %v2223_v35 = vld [vmem:[#allocation3 + $0x68] sm:$0xff]  ;;  %v1569_v16 = vsel %vm499_vm10, %v1568_v21, %v1539_v41  ;;  %v2210_v41 = vld [vmem:[#allocation3 + $0x58] sm:$0xff] }
 0x320   : > { %v1760_v12 = vpop.permute.xlu0 %1759  ;;  %2242 = vmatpush.msra.mxu0 %v2223_v35  ;;  %v2208_v35 = vld [vmem:[#allocation3 + $0x38] sm:$0xff] }
 0x321   : > { %v1784_v10 = vsel %vm503_vm12, %v1783_v23, %v1760_v12 }
 0x322   : > { %v1527_v37 = vpop.permute.xlu2 %1526 }
 0x326   : > { %v1948_v18 = vpop.permute.xlu1 %1947 }
 0x327   : > { %v1987_v2 = vsel %vm507_vm14, %v1986_v1, %v1948_v18  ;;  %v2225_v1 = vld [vmem:[%s4100_s2] sm:$0xff] }
 0x328   : > { %v1515_v38 = vpop.permute.xlu0 %1514  ;;  %2228 = vperm.xlu2 %2485, %v2225_v1  }
 0x329   : > { %v1563_v33 = vsel %vm501_vm11, %v1562_v0, %v1515_v38 }
 0x32a   : > { %v1559_v39 = vpop.permute.xlu2 %1558 }
 0x32e   : > { %v1543_v14 = vpop.permute.xlu1 %1542 }
 0x32f   : > { %v1570_v34 = vsel %vm501_vm11, %v1569_v16, %v1543_v14 }
 0x330   : > { %v1764_v7 = vpop.permute.xlu0 %1763 }
 0x331   : > { %v1785_v63 = vsel %vm505_vm13, %v1784_v10, %v1764_v7 }
 0x336   : > { %v1952_v8 = vpop.permute.xlu1 %1951 }
 0x337   : > { %v1988_v58 = vsel %vm509_vm15, %v1987_v2, %v1952_v8 }
 0x338   : > { %1996 = vst [vmem:[#allocation3 + $0x30] sm:$0xf] %v1988_v58  ;;  %v1519_v32 = vpop.permute.xlu0 %1518 }
 0x339   : > { %v1564_v46 = vsel %vm503_vm12, %v1563_v33, %v1519_v32 }
 0x33e   : > { %v1547_v56 = vpop.permute.xlu1 %1546 }
 0x33f   : > { %v2221_v20 = vld [vmem:[#allocation3 + $0x30] sm:$0xff]  ;;  %v1571_v47 = vsel %vm503_vm12, %v1570_v34, %v1547_v56 }
 0x340   : > { %v1768_v26 = vpop.permute.xlu0 %1767  ;;  %2243 = vmatpush.msra.mxu0 %v2221_v20  ;;  %v1572_v44 = vsel %vm505_vm13, %v1571_v47, %v1551_v59 }
 0x341   : > { %v1786_v45 = vsel %vm507_vm14, %v1785_v63, %v1768_v26 }
 0x346   : > { %v1523_v28 = vpop.permute.xlu1 %1522 }
 0x347   : > { %v1565_v9 = vsel %vm505_vm13, %v1564_v46, %v1523_v28 }
 0x348   : > { %v1744_v61 = vpop.permute.xlu0 %1743  ;;  %v1566_v49 = vsel %vm507_vm14, %v1565_v9, %v1527_v37 }
 0x349   : > { %v1780_v29 = vsel %vm509_vm15, %v1779_v54, %v1744_v61 }
 0x34a   : > { %1788 = vst [vmem:[#allocation3 + $0x10] sm:$0xf] %v1780_v29 }
 0x34e   : > { %v1772_v3 = vpop.permute.xlu1 %1771 }
 0x34f   : > { %v1787_v5 = vsel %vm509_vm15, %v1786_v45, %v1772_v3 }
 0x350   : > { %1789 = vst [vmem:[#allocation3 + $0x48] sm:$0xf] %v1787_v5  ;;  %v1555_v19 = vpop.permute.xlu0 %1554 }
 0x351   : > { %v1573_v57 = vsel %vm507_vm14, %v1572_v44, %v1555_v19  ;;  %v2219_v43 = vld [vmem:[#allocation3 + $0x10] sm:$0xff] }
 0x352   : > { %v1574_v22 = vsel %vm509_vm15, %v1573_v57, %v1559_v39  ;;  %2244 = vmatpush.msra.mxu0 %v2219_v43 }
 0x353   : > { %1576 = vst [vmem:[#allocation3 + $0x28] sm:$0xf] %v1574_v22 }
 0x356   : > { %v1531_v13 = vpop.permute.xlu1 %1530 }
 0x357   : > { %v1567_v48 = vsel %vm509_vm15, %v1566_v49, %v1531_v13  ;;  %v2220_v53 = vld [vmem:[#allocation3 + $0x48] sm:$0xff] }
 0x358   : > { %1575 = vst [vmem:[#allocation3 + $0x50] sm:$0xf] %v1567_v48  ;;  %2264 = vmatpush.msra.mxu1 %v2220_v53  ;;  %v1347_v60 = vpop.permute.xlu0 %1346 }
 0x359   : > { %v1365_v30 = vsel %vm507_vm14, %v3572_v55, %v1347_v60  ;;  %v2206_v55 = vld [vmem:[%s4099_s1] sm:$0xff] }
 0x35a   : > { %v2218_v36 = vld [vmem:[#allocation3 + $0x28] sm:$0xff] }
 0x35b   : > { %2265 = vmatpush.msra.mxu1 %v2218_v36 }
 0x35e   : > { %v1351_v51 = vpop.permute.xlu1 %1350 }
 0x35f   : > { %v1366_v17 = vsel %vm509_vm15, %v1365_v30, %v1351_v51  ;;  %v2217_v4 = vld [vmem:[#allocation3 + $0x50] sm:$0xff] }
 0x360   : > { %1368 = vst [vmem:[#allocation3 + $0x40] sm:$0xf] %v1366_v17  ;;  %2245 = vmatpush.msra.mxu0 %v2217_v4 }
 0x362   : > { %2246 = vmatpush.msra.mxu0 %v2215_v15 }
 0x364   : > { %2247 = vmatpush.msra.mxu0 %v2213_v27 }
 0x366   : > { %2248 = vmatpush.msra.mxu0 %v2211_v24 }
 0x367   : > { %v2216_v31 = vld [vmem:[#allocation3 + $0x40] sm:$0xff] }
 0x368   : > { %2249 = vmatpush.msra.mxu0 %v2209_v6  ;;  %2266 = vmatpush.msra.mxu1 %v2216_v31 }
 0x36a   : > { %2250 = vmatpush.msra.mxu0 %v2207_v50  ;;  %2267 = vmatpush.msra.mxu1 %v2214_v62 }
 0x36b   : > { %2397 = vmatmul.msk.f32.vlgmr.msra.gmra.mxu0 %vm2231_vm0, %v2206_v55 }
 0x36c   : > { %2268 = vmatpush.msra.mxu1 %v2212_v25 }
 0x36e   : > { %2269 = vmatpush.msra.mxu1 %v2210_v41 }
 0x370   : > { %2270 = vmatpush.msra.mxu1 %v2208_v35 }
 0x371   : > { %2398 = vmatmul.msk.f32.vlgmr.msra.gmra.mxu1 %vm2231_vm0, %v2206_v55 }
 0x382   : > { %v2229_v12 = vpop.permute.xlu2 %2228 }
 0x3e8   : > { %v2252_v18 = vpop.f32.mrf.mxu0 }
 0x3e9   : > { %v2253_v38 = vadd.f32 %v2252_v18, %v2229_v12 }
 0x3eb   : > { %v2275_v14 = vmax.f32 %v2253_v38, 0.0 }
 0x3ed   : > { %2277 = vst [vmem:[%s204_s30] sm:$0xff] %v2275_v14 }
 0x3ee   : > { %v2272_v7 = vpop.f32.mrf.mxu1 }
 0x3ef   : > { %v2273_v52 = vadd.f32 %v2272_v7, %v2229_v12 }
 0x3f1   : > { %v2276_v2 = vmax.f32 %v2273_v52, 0.0 }
 0x3f3   : > { %2278 = vst [vmem:[%s204_s30 + $0x8] sm:$0xff] %v2276_v2 }
 0x3f4   : > { %2544 = shalt.err (!%p2541_p13)
}
 0x3f5   : > { %2409 = dma.vmem_to_hbm [thread:$0]  (%p2688_p9), %s2296_s4, 256, %s2298_s5, %s2280_s6  }
 0x3f6 PF: > { %s2309_s19 = sand.u32 1, %s2579_s12   ;;  %p2416_p0 = pnand %p2390_p12, %p2695_p11 }
 0x3f7   : > { %s2310_s21 = scalar_lea.sflag [#allocation7], %s2309_s19 }
 0x3f8   : > { %p2417_p1 = pneg %p2416_p0 }
 0x3fa   : > { %2574 = dma.done.wait (%p2417_p1), %s2310_s21, 256  }
 0x3fb   : > { %2576 = vsyncadd (%p2417_p1), %s2310_s21, 4294967040  ;;  %s19_s17 = sadd.s32 1, %s2599_s17   ;;  %s4106_s12 = smov %s2583_s13 }
 0x3fc   : > { %p16_p2 = scmp.ge.s32.totalorder %s19_s17, 4   ;;  %s4107_s13 = smov %s2587_s14 }
 0x3fd   : > { %s4108_s14 = smov %s2693_s26  ;;  %s4109_s15 = smov %s2595_s16 }
 0x3fe   : > { %s4110_s16 = smov %s4112_s20  ;;  %18 = sbr.rel (!%p16_p2) target bundleno = 6 (0x6), region = 82 }
 0x403   :  { %2316 = vsyncpa [#allocation6], 1 }
 0x404   :  { %2318 = vsyncpa [#allocation6 + $0x1], 1 }
 0x405   :  { %2319 = vsyncpa [#allocation7], 1 }
 0x406   :  { %2321 = vsyncpa [#allocation7 + $0x1], 1 }
 0x407   :  { %2322 = vsyncmov [#allocation4] }
 0x40a   :  { %s2323_s25 = vpop.sfrf %2322 }
 0x40b   :  { %p2404_p9 = scmp.ne.s32.totalorder %s2323_s25, 0 }
 0x40d   :  { %2327 = shalt.err (%p2404_p9)  }

</bundles_post_ra>
